<compile_context>
chip_gen: v7x
topology: tpu7x:2x2x1
jax: 0.10.0
libtpu: 0.0.40
codegen_flags: <defaults>
</compile_context>

<pallas_src>
import jax
import jax.numpy as jnp
from jax import lax
from jax.experimental import pallas as pl
from jax.experimental.pallas import tpu as pltpu

_NUM_FEATURES = 8  # x, y, |x|, |y|, x*y, x+y, x^2, y^2  (x+y folded away pre-kernel)


def _delay_kernel(pos_ref, mask_ref, w1_ref, b1_ref, w2_ref, b2_ref, out_ref):
    # pos_ref : (2, TR, 128) f32  VMEM -- [0]=x, [1]=y, pins in (sublane, lane)
    # mask_ref: (TR, 128)    i32  VMEM -- nonzero = ignore pin
    # w1_ref  : (Fe, H)      f32  SMEM -- folded layer-1 weight (Fe = 7)
    # b1_ref  : (H,)         f32  SMEM
    # w2_ref  : (H,)         f32  SMEM
    # b2_ref  : (1,)         f32  SMEM
    # out_ref : (TR, 128)    f32       -- pin_delays
    Fe, H = w1_ref.shape
    tile_rows = out_ref.shape[0]
    n_slabs = tile_rows // 8

    # Hoist every SMEM weight scalar read out of the slab loop (loop-invariant).
    W1 = [[w1_ref[f, j] for f in range(Fe)] for j in range(H)]
    B1 = [b1_ref[j] for j in range(H)]
    W2 = [w2_ref[j] for j in range(H)]
    B2 = b2_ref[0]

    def slab_body(s, carry):
        r = pl.multiple_of(s * 8, 8)
        x = pos_ref[0, pl.ds(r, 8), :]   # (8, 128) lane-dense slab
        y = pos_ref[1, pl.ds(r, 8), :]

        # Synthetic per-pin features (x+y folded into the weights -> only 7).
        feats = (x, y, jnp.abs(x), jnp.abs(y), x * y, x * x, y * y)

        # 2-layer MLP unrolled as broadcast-scalar MACs on the VPU.
        d = jnp.full_like(x, B2)
        for j in range(H):
            acc = feats[0] * W1[j][0]
            for f in range(1, Fe):
                acc = acc + feats[f] * W1[j][f]
            h = jnp.maximum(acc + B1[j], 0.0)
            d = d + h * W2[j]

        # pin_delays[ignore_pin_masks] = 0  (exact zero, even if d is NaN/Inf)
        ignore = mask_ref[pl.ds(r, 8), :] != 0
        out_ref[pl.ds(r, 8), :] = jnp.where(ignore, 0.0, d)
        return carry

    lax.fori_loop(0, n_slabs, slab_body, 0)


def delay_estimation_forward(pos, ignore_pin_masks, w1, b1, w2, b2, *, tile_pins=32768):
    """Returns (pin_delays, ignore_pin_masks), mirroring DelayEstimation.forward."""
    P = pos.shape[0]
    F, H = w1.shape
    assert F == _NUM_FEATURES, "synthetic feature extractor produces 8 features per pin"
    assert tile_pins % 1024 == 0, "tile_pins must be a multiple of 1024 (8 sublanes x 128 lanes)"

    # Tile selection: big tiles to amortize pipeline-step overhead, but make sure
    # the grid has >= 2 steps whenever P > 1024 so v7x megacore can split the work.
    if P > 1024:
        half = -(-P // 2)                 # ceil(P / 2)
        half = -(-half // 1024) * 1024    # round up to 1024
        tile = min(tile_pins, half)
    else:
        tile = 1024
    tile_rows = tile // 128

    num_tiles = pl.cdiv(P, tile)
    P_pad = num_tiles * tile
    R = P_pad // 128

    # Pin-in-lane layout: (P, 2) -> (2, P_pad) -> (2, R, 128); zero-pad tail pins.
    pos_t = jnp.pad(pos.astype(jnp.float32).T, ((0, 0), (0, P_pad - P))).reshape(2, R, 128)

    # Ignore mask goes straight into the kernel (padded pins marked "ignore").
    mask_i = jnp.pad(ignore_pin_masks, (0, P_pad - P), constant_values=True)
    mask_i = mask_i.astype(jnp.int32).reshape(R, 128)

    # Fold the x+y feature (index 5) into the x / y weight columns.
    w1f = w1.astype(jnp.float32)
    w1_fold = jnp.concatenate(
        [w1f[0:1] + w1f[5:6],   # x column absorbs x+y
         w1f[1:2] + w1f[5:6],   # y column absorbs x+y
         w1f[2:5],              # |x|, |y|, x*y
         w1f[6:8]],             # x^2, y^2
        axis=0)                 # (7, H)

    b1_s = jnp.reshape(b1, (H,)).astype(jnp.float32)
    w2_s = jnp.reshape(w2, (H,)).astype(jnp.float32)
    b2_s = jnp.reshape(b2, (1,)).astype(jnp.float32)

    out2d = pl.pallas_call(
        _delay_kernel,
        out_shape=jax.ShapeDtypeStruct((R, 128), jnp.float32),
        grid_spec=pltpu.PrefetchScalarGridSpec(
            num_scalar_prefetch=0,
            grid=(num_tiles,),
            in_specs=[
                pl.BlockSpec((2, tile_rows, 128), lambda i: (0, i, 0)),  # pos (x/y planes)
                pl.BlockSpec((tile_rows, 128), lambda i: (i, 0)),        # ignore mask
                pl.BlockSpec(memory_space=pltpu.SMEM),                   # W1 (folded)
                pl.BlockSpec(memory_space=pltpu.SMEM),                   # b1
                pl.BlockSpec(memory_space=pltpu.SMEM),                   # W2
                pl.BlockSpec(memory_space=pltpu.SMEM),                   # b2
            ],
            out_specs=pl.BlockSpec((tile_rows, 128), lambda i: (i, 0)),
        ),
        compiler_params=pltpu.CompilerParams(
            dimension_semantics=("parallel",),
        ),
    )(pos_t, mask_i, w1_fold, b1_s, w2_s, b2_s)

    pin_delays = out2d.reshape(P_pad)[:P]
    return pin_delays, ignore_pin_masks


def _reference(pos, mask, w1, b1, w2, b2):
    x = pos[:, 0:1]
    y = pos[:, 1:2]
    feats = jnp.concatenate(
        [x, y, jnp.abs(x), jnp.abs(y), x * y, x + y, x * x, y * y], axis=-1
    )
    h = jnp.maximum(feats @ w1 + b1[None, :], 0.0)
    d = h @ w2 + b2[0]
    return jnp.where(mask, 0.0, d)


if __name__ == "__main__":
    P = 1536           # number of pins (deliberately NOT a multiple of the tile)
    F = _NUM_FEATURES  # per-pin feature count
    H = 32             # delay-model hidden width

    key = jax.random.PRNGKey(0)
    k_pos, k_mask, k_w1, k_b1, k_w2, k_b2 = jax.random.split(key, 6)

    pos = jax.random.uniform(k_pos, (P, 2), jnp.float32) * 10.0      # pin (x, y)
    ignore_pin_masks = jax.random.bernoulli(k_mask, 0.1, (P,))       # bool mask

    # Deterministic synthetic delay_model parameters.
    w1 = jax.random.normal(k_w1, (F, H), jnp.float32) * 0.1
    b1 = jax.random.normal(k_b1, (H,), jnp.float32) * 0.1
    w2 = jax.random.normal(k_w2, (H,), jnp.float32) * 0.1
    b2 = jax.random.normal(k_b2, (1,), jnp.float32) * 0.1

    pin_delays, out_mask = delay_estimation_forward(
        pos, ignore_pin_masks, w1, b1, w2, b2
    )
    pin_delays = jax.block_until_ready(pin_delays)

    ref = _reference(pos, ignore_pin_masks, w1, b1, w2, b2)
    assert pin_delays.shape == (P,)
    assert out_mask.shape == (P,)
    assert jnp.allclose(pin_delays, ref, atol=1e-3, rtol=1e-4)
    assert bool(jnp.all(pin_delays[ignore_pin_masks] == 0.0))

    print("KERNEL_OK")
</pallas_src>

<mosaic_0001>
module attributes {stable_mosaic.version = 11 : i64} {
  func.func @_delay_kernel(%arg0: i32, %arg1: memref<2x8x128xf32, #tpu.memory_space<vmem>>, %arg2: memref<8x128xi32, #tpu.memory_space<vmem>>, %arg3: memref<7x32xf32, #tpu.memory_space<smem>>, %arg4: memref<32xf32, #tpu.memory_space<smem>>, %arg5: memref<32xf32, #tpu.memory_space<smem>>, %arg6: memref<1xf32, #tpu.memory_space<smem>>, %arg7: memref<8x128xf32, #tpu.memory_space<vmem>>) attributes {dimension_semantics = [#tpu.dimension_semantics<parallel>], iteration_bounds = array<i64: 2>, scalar_prefetch = 0 : i64, scratch_operands = 0 : i64, tpu.core_type = #tpu.core_type<tc>, window_params = [{transform_indices = @transform_0, window_bounds = array<i64: 2, 8, 128>}, {transform_indices = @transform_1, window_bounds = array<i64: 8, 128>}, {transform_indices = @transform_2, window_bounds = array<i64: 7, 32>}, {transform_indices = @transform_3, window_bounds = array<i64: 32>}, {transform_indices = @transform_4, window_bounds = array<i64: 32>}, {transform_indices = @transform_5, window_bounds = array<i64: 1>}, {transform_indices = @transform_6, window_bounds = array<i64: 8, 128>}]} {
    %c0 = arith.constant 0 : index
    %c0_0 = arith.constant 0 : index
    %0 = memref.load %arg3[%c0, %c0_0] : memref<7x32xf32, #tpu.memory_space<smem>>
    %c1 = arith.constant 1 : index
    %c0_1 = arith.constant 0 : index
    %1 = memref.load %arg3[%c1, %c0_1] : memref<7x32xf32, #tpu.memory_space<smem>>
    %c2 = arith.constant 2 : index
    %c0_2 = arith.constant 0 : index
    %2 = memref.load %arg3[%c2, %c0_2] : memref<7x32xf32, #tpu.memory_space<smem>>
    %c3 = arith.constant 3 : index
    %c0_3 = arith.constant 0 : index
    %3 = memref.load %arg3[%c3, %c0_3] : memref<7x32xf32, #tpu.memory_space<smem>>
    %c4 = arith.constant 4 : index
    %c0_4 = arith.constant 0 : index
    %4 = memref.load %arg3[%c4, %c0_4] : memref<7x32xf32, #tpu.memory_space<smem>>
    %c5 = arith.constant 5 : index
    %c0_5 = arith.constant 0 : index
    %5 = memref.load %arg3[%c5, %c0_5] : memref<7x32xf32, #tpu.memory_space<smem>>
    %c6 = arith.constant 6 : index
    %c0_6 = arith.constant 0 : index
    %6 = memref.load %arg3[%c6, %c0_6] : memref<7x32xf32, #tpu.memory_space<smem>>
    %c0_7 = arith.constant 0 : index
    %c1_8 = arith.constant 1 : index
    %7 = memref.load %arg3[%c0_7, %c1_8] : memref<7x32xf32, #tpu.memory_space<smem>>
    %c1_9 = arith.constant 1 : index
    %c1_10 = arith.constant 1 : index
    %8 = memref.load %arg3[%c1_9, %c1_10] : memref<7x32xf32, #tpu.memory_space<smem>>
    %c2_11 = arith.constant 2 : index
    %c1_12 = arith.constant 1 : index
    %9 = memref.load %arg3[%c2_11, %c1_12] : memref<7x32xf32, #tpu.memory_space<smem>>
    %c3_13 = arith.constant 3 : index
    %c1_14 = arith.constant 1 : index
    %10 = memref.load %arg3[%c3_13, %c1_14] : memref<7x32xf32, #tpu.memory_space<smem>>
    %c4_15 = arith.constant 4 : index
    %c1_16 = arith.constant 1 : index
    %11 = memref.load %arg3[%c4_15, %c1_16] : memref<7x32xf32, #tpu.memory_space<smem>>
    %c5_17 = arith.constant 5 : index
    %c1_18 = arith.constant 1 : index
    %12 = memref.load %arg3[%c5_17, %c1_18] : memref<7x32xf32, #tpu.memory_space<smem>>
    %c6_19 = arith.constant 6 : index
    %c1_20 = arith.constant 1 : index
    %13 = memref.load %arg3[%c6_19, %c1_20] : memref<7x32xf32, #tpu.memory_space<smem>>
    %c0_21 = arith.constant 0 : index
    %c2_22 = arith.constant 2 : index
    %14 = memref.load %arg3[%c0_21, %c2_22] : memref<7x32xf32, #tpu.memory_space<smem>>
    %c1_23 = arith.constant 1 : index
    %c2_24 = arith.constant 2 : index
    %15 = memref.load %arg3[%c1_23, %c2_24] : memref<7x32xf32, #tpu.memory_space<smem>>
    %c2_25 = arith.constant 2 : index
    %c2_26 = arith.constant 2 : index
    %16 = memref.load %arg3[%c2_25, %c2_26] : memref<7x32xf32, #tpu.memory_space<smem>>
    %c3_27 = arith.constant 3 : index
    %c2_28 = arith.constant 2 : index
    %17 = memref.load %arg3[%c3_27, %c2_28] : memref<7x32xf32, #tpu.memory_space<smem>>
    %c4_29 = arith.constant 4 : index
    %c2_30 = arith.constant 2 : index
    %18 = memref.load %arg3[%c4_29, %c2_30] : memref<7x32xf32, #tpu.memory_space<smem>>
    %c5_31 = arith.constant 5 : index
    %c2_32 = arith.constant 2 : index
    %19 = memref.load %arg3[%c5_31, %c2_32] : memref<7x32xf32, #tpu.memory_space<smem>>
    %c6_33 = arith.constant 6 : index
    %c2_34 = arith.constant 2 : index
    %20 = memref.load %arg3[%c6_33, %c2_34] : memref<7x32xf32, #tpu.memory_space<smem>>
    %c0_35 = arith.constant 0 : index
    %c3_36 = arith.constant 3 : index
    %21 = memref.load %arg3[%c0_35, %c3_36] : memref<7x32xf32, #tpu.memory_space<smem>>
    %c1_37 = arith.constant 1 : index
    %c3_38 = arith.constant 3 : index
    %22 = memref.load %arg3[%c1_37, %c3_38] : memref<7x32xf32, #tpu.memory_space<smem>>
    %c2_39 = arith.constant 2 : index
    %c3_40 = arith.constant 3 : index
    %23 = memref.load %arg3[%c2_39, %c3_40] : memref<7x32xf32, #tpu.memory_space<smem>>
    %c3_41 = arith.constant 3 : index
    %c3_42 = arith.constant 3 : index
    %24 = memref.load %arg3[%c3_41, %c3_42] : memref<7x32xf32, #tpu.memory_space<smem>>
    %c4_43 = arith.constant 4 : index
    %c3_44 = arith.constant 3 : index
    %25 = memref.load %arg3[%c4_43, %c3_44] : memref<7x32xf32, #tpu.memory_space<smem>>
    %c5_45 = arith.constant 5 : index
    %c3_46 = arith.constant 3 : index
    %26 = memref.load %arg3[%c5_45, %c3_46] : memref<7x32xf32, #tpu.memory_space<smem>>
    %c6_47 = arith.constant 6 : index
    %c3_48 = arith.constant 3 : index
    %27 = memref.load %arg3[%c6_47, %c3_48] : memref<7x32xf32, #tpu.memory_space<smem>>
    %c0_49 = arith.constant 0 : index
    %c4_50 = arith.constant 4 : index
    %28 = memref.load %arg3[%c0_49, %c4_50] : memref<7x32xf32, #tpu.memory_space<smem>>
    %c1_51 = arith.constant 1 : index
    %c4_52 = arith.constant 4 : index
    %29 = memref.load %arg3[%c1_51, %c4_52] : memref<7x32xf32, #tpu.memory_space<smem>>
    %c2_53 = arith.constant 2 : index
    %c4_54 = arith.constant 4 : index
    %30 = memref.load %arg3[%c2_53, %c4_54] : memref<7x32xf32, #tpu.memory_space<smem>>
    %c3_55 = arith.constant 3 : index
    %c4_56 = arith.constant 4 : index
    %31 = memref.load %arg3[%c3_55, %c4_56] : memref<7x32xf32, #tpu.memory_space<smem>>
    %c4_57 = arith.constant 4 : index
    %c4_58 = arith.constant 4 : index
    %32 = memref.load %arg3[%c4_57, %c4_58] : memref<7x32xf32, #tpu.memory_space<smem>>
    %c5_59 = arith.constant 5 : index
    %c4_60 = arith.constant 4 : index
    %33 = memref.load %arg3[%c5_59, %c4_60] : memref<7x32xf32, #tpu.memory_space<smem>>
    %c6_61 = arith.constant 6 : index
    %c4_62 = arith.constant 4 : index
    %34 = memref.load %arg3[%c6_61, %c4_62] : memref<7x32xf32, #tpu.memory_space<smem>>
    %c0_63 = arith.constant 0 : index
    %c5_64 = arith.constant 5 : index
    %35 = memref.load %arg3[%c0_63, %c5_64] : memref<7x32xf32, #tpu.memory_space<smem>>
    %c1_65 = arith.constant 1 : index
    %c5_66 = arith.constant 5 : index
    %36 = memref.load %arg3[%c1_65, %c5_66] : memref<7x32xf32, #tpu.memory_space<smem>>
    %c2_67 = arith.constant 2 : index
    %c5_68 = arith.constant 5 : index
    %37 = memref.load %arg3[%c2_67, %c5_68] : memref<7x32xf32, #tpu.memory_space<smem>>
    %c3_69 = arith.constant 3 : index
    %c5_70 = arith.constant 5 : index
    %38 = memref.load %arg3[%c3_69, %c5_70] : memref<7x32xf32, #tpu.memory_space<smem>>
    %c4_71 = arith.constant 4 : index
    %c5_72 = arith.constant 5 : index
    %39 = memref.load %arg3[%c4_71, %c5_72] : memref<7x32xf32, #tpu.memory_space<smem>>
    %c5_73 = arith.constant 5 : index
    %c5_74 = arith.constant 5 : index
    %40 = memref.load %arg3[%c5_73, %c5_74] : memref<7x32xf32, #tpu.memory_space<smem>>
    %c6_75 = arith.constant 6 : index
    %c5_76 = arith.constant 5 : index
    %41 = memref.load %arg3[%c6_75, %c5_76] : memref<7x32xf32, #tpu.memory_space<smem>>
    %c0_77 = arith.constant 0 : index
    %c6_78 = arith.constant 6 : index
    %42 = memref.load %arg3[%c0_77, %c6_78] : memref<7x32xf32, #tpu.memory_space<smem>>
    %c1_79 = arith.constant 1 : index
    %c6_80 = arith.constant 6 : index
    %43 = memref.load %arg3[%c1_79, %c6_80] : memref<7x32xf32, #tpu.memory_space<smem>>
    %c2_81 = arith.constant 2 : index
    %c6_82 = arith.constant 6 : index
    %44 = memref.load %arg3[%c2_81, %c6_82] : memref<7x32xf32, #tpu.memory_space<smem>>
    %c3_83 = arith.constant 3 : index
    %c6_84 = arith.constant 6 : index
    %45 = memref.load %arg3[%c3_83, %c6_84] : memref<7x32xf32, #tpu.memory_space<smem>>
    %c4_85 = arith.constant 4 : index
    %c6_86 = arith.constant 6 : index
    %46 = memref.load %arg3[%c4_85, %c6_86] : memref<7x32xf32, #tpu.memory_space<smem>>
    %c5_87 = arith.constant 5 : index
    %c6_88 = arith.constant 6 : index
    %47 = memref.load %arg3[%c5_87, %c6_88] : memref<7x32xf32, #tpu.memory_space<smem>>
    %c6_89 = arith.constant 6 : index
    %c6_90 = arith.constant 6 : index
    %48 = memref.load %arg3[%c6_89, %c6_90] : memref<7x32xf32, #tpu.memory_space<smem>>
    %c0_91 = arith.constant 0 : index
    %c7 = arith.constant 7 : index
    %49 = memref.load %arg3[%c0_91, %c7] : memref<7x32xf32, #tpu.memory_space<smem>>
    %c1_92 = arith.constant 1 : index
    %c7_93 = arith.constant 7 : index
    %50 = memref.load %arg3[%c1_92, %c7_93] : memref<7x32xf32, #tpu.memory_space<smem>>
    %c2_94 = arith.constant 2 : index
    %c7_95 = arith.constant 7 : index
    %51 = memref.load %arg3[%c2_94, %c7_95] : memref<7x32xf32, #tpu.memory_space<smem>>
    %c3_96 = arith.constant 3 : index
    %c7_97 = arith.constant 7 : index
    %52 = memref.load %arg3[%c3_96, %c7_97] : memref<7x32xf32, #tpu.memory_space<smem>>
    %c4_98 = arith.constant 4 : index
    %c7_99 = arith.constant 7 : index
    %53 = memref.load %arg3[%c4_98, %c7_99] : memref<7x32xf32, #tpu.memory_space<smem>>
    %c5_100 = arith.constant 5 : index
    %c7_101 = arith.constant 7 : index
    %54 = memref.load %arg3[%c5_100, %c7_101] : memref<7x32xf32, #tpu.memory_space<smem>>
    %c6_102 = arith.constant 6 : index
    %c7_103 = arith.constant 7 : index
    %55 = memref.load %arg3[%c6_102, %c7_103] : memref<7x32xf32, #tpu.memory_space<smem>>
    %c0_104 = arith.constant 0 : index
    %c8 = arith.constant 8 : index
    %56 = memref.load %arg3[%c0_104, %c8] : memref<7x32xf32, #tpu.memory_space<smem>>
    %c1_105 = arith.constant 1 : index
    %c8_106 = arith.constant 8 : index
    %57 = memref.load %arg3[%c1_105, %c8_106] : memref<7x32xf32, #tpu.memory_space<smem>>
    %c2_107 = arith.constant 2 : index
    %c8_108 = arith.constant 8 : index
    %58 = memref.load %arg3[%c2_107, %c8_108] : memref<7x32xf32, #tpu.memory_space<smem>>
    %c3_109 = arith.constant 3 : index
    %c8_110 = arith.constant 8 : index
    %59 = memref.load %arg3[%c3_109, %c8_110] : memref<7x32xf32, #tpu.memory_space<smem>>
    %c4_111 = arith.constant 4 : index
    %c8_112 = arith.constant 8 : index
    %60 = memref.load %arg3[%c4_111, %c8_112] : memref<7x32xf32, #tpu.memory_space<smem>>
    %c5_113 = arith.constant 5 : index
    %c8_114 = arith.constant 8 : index
    %61 = memref.load %arg3[%c5_113, %c8_114] : memref<7x32xf32, #tpu.memory_space<smem>>
    %c6_115 = arith.constant 6 : index
    %c8_116 = arith.constant 8 : index
    %62 = memref.load %arg3[%c6_115, %c8_116] : memref<7x32xf32, #tpu.memory_space<smem>>
    %c0_117 = arith.constant 0 : index
    %c9 = arith.constant 9 : index
    %63 = memref.load %arg3[%c0_117, %c9] : memref<7x32xf32, #tpu.memory_space<smem>>
    %c1_118 = arith.constant 1 : index
    %c9_119 = arith.constant 9 : index
    %64 = memref.load %arg3[%c1_118, %c9_119] : memref<7x32xf32, #tpu.memory_space<smem>>
    %c2_120 = arith.constant 2 : index
    %c9_121 = arith.constant 9 : index
    %65 = memref.load %arg3[%c2_120, %c9_121] : memref<7x32xf32, #tpu.memory_space<smem>>
    %c3_122 = arith.constant 3 : index
    %c9_123 = arith.constant 9 : index
    %66 = memref.load %arg3[%c3_122, %c9_123] : memref<7x32xf32, #tpu.memory_space<smem>>
    %c4_124 = arith.constant 4 : index
    %c9_125 = arith.constant 9 : index
    %67 = memref.load %arg3[%c4_124, %c9_125] : memref<7x32xf32, #tpu.memory_space<smem>>
    %c5_126 = arith.constant 5 : index
    %c9_127 = arith.constant 9 : index
    %68 = memref.load %arg3[%c5_126, %c9_127] : memref<7x32xf32, #tpu.memory_space<smem>>
    %c6_128 = arith.constant 6 : index
    %c9_129 = arith.constant 9 : index
    %69 = memref.load %arg3[%c6_128, %c9_129] : memref<7x32xf32, #tpu.memory_space<smem>>
    %c0_130 = arith.constant 0 : index
    %c10 = arith.constant 10 : index
    %70 = memref.load %arg3[%c0_130, %c10] : memref<7x32xf32, #tpu.memory_space<smem>>
    %c1_131 = arith.constant 1 : index
    %c10_132 = arith.constant 10 : index
    %71 = memref.load %arg3[%c1_131, %c10_132] : memref<7x32xf32, #tpu.memory_space<smem>>
    %c2_133 = arith.constant 2 : index
    %c10_134 = arith.constant 10 : index
    %72 = memref.load %arg3[%c2_133, %c10_134] : memref<7x32xf32, #tpu.memory_space<smem>>
    %c3_135 = arith.constant 3 : index
    %c10_136 = arith.constant 10 : index
    %73 = memref.load %arg3[%c3_135, %c10_136] : memref<7x32xf32, #tpu.memory_space<smem>>
    %c4_137 = arith.constant 4 : index
    %c10_138 = arith.constant 10 : index
    %74 = memref.load %arg3[%c4_137, %c10_138] : memref<7x32xf32, #tpu.memory_space<smem>>
    %c5_139 = arith.constant 5 : index
    %c10_140 = arith.constant 10 : index
    %75 = memref.load %arg3[%c5_139, %c10_140] : memref<7x32xf32, #tpu.memory_space<smem>>
    %c6_141 = arith.constant 6 : index
    %c10_142 = arith.constant 10 : index
    %76 = memref.load %arg3[%c6_141, %c10_142] : memref<7x32xf32, #tpu.memory_space<smem>>
    %c0_143 = arith.constant 0 : index
    %c11 = arith.constant 11 : index
    %77 = memref.load %arg3[%c0_143, %c11] : memref<7x32xf32, #tpu.memory_space<smem>>
    %c1_144 = arith.constant 1 : index
    %c11_145 = arith.constant 11 : index
    %78 = memref.load %arg3[%c1_144, %c11_145] : memref<7x32xf32, #tpu.memory_space<smem>>
    %c2_146 = arith.constant 2 : index
    %c11_147 = arith.constant 11 : index
    %79 = memref.load %arg3[%c2_146, %c11_147] : memref<7x32xf32, #tpu.memory_space<smem>>
    %c3_148 = arith.constant 3 : index
    %c11_149 = arith.constant 11 : index
    %80 = memref.load %arg3[%c3_148, %c11_149] : memref<7x32xf32, #tpu.memory_space<smem>>
    %c4_150 = arith.constant 4 : index
    %c11_151 = arith.constant 11 : index
    %81 = memref.load %arg3[%c4_150, %c11_151] : memref<7x32xf32, #tpu.memory_space<smem>>
    %c5_152 = arith.constant 5 : index
    %c11_153 = arith.constant 11 : index
    %82 = memref.load %arg3[%c5_152, %c11_153] : memref<7x32xf32, #tpu.memory_space<smem>>
    %c6_154 = arith.constant 6 : index
    %c11_155 = arith.constant 11 : index
    %83 = memref.load %arg3[%c6_154, %c11_155] : memref<7x32xf32, #tpu.memory_space<smem>>
    %c0_156 = arith.constant 0 : index
    %c12 = arith.constant 12 : index
    %84 = memref.load %arg3[%c0_156, %c12] : memref<7x32xf32, #tpu.memory_space<smem>>
    %c1_157 = arith.constant 1 : index
    %c12_158 = arith.constant 12 : index
    %85 = memref.load %arg3[%c1_157, %c12_158] : memref<7x32xf32, #tpu.memory_space<smem>>
    %c2_159 = arith.constant 2 : index
    %c12_160 = arith.constant 12 : index
    %86 = memref.load %arg3[%c2_159, %c12_160] : memref<7x32xf32, #tpu.memory_space<smem>>
    %c3_161 = arith.constant 3 : index
    %c12_162 = arith.constant 12 : index
    %87 = memref.load %arg3[%c3_161, %c12_162] : memref<7x32xf32, #tpu.memory_space<smem>>
    %c4_163 = arith.constant 4 : index
    %c12_164 = arith.constant 12 : index
    %88 = memref.load %arg3[%c4_163, %c12_164] : memref<7x32xf32, #tpu.memory_space<smem>>
    %c5_165 = arith.constant 5 : index
    %c12_166 = arith.constant 12 : index
    %89 = memref.load %arg3[%c5_165, %c12_166] : memref<7x32xf32, #tpu.memory_space<smem>>
    %c6_167 = arith.constant 6 : index
    %c12_168 = arith.constant 12 : index
    %90 = memref.load %arg3[%c6_167, %c12_168] : memref<7x32xf32, #tpu.memory_space<smem>>
    %c0_169 = arith.constant 0 : index
    %c13 = arith.constant 13 : index
    %91 = memref.load %arg3[%c0_169, %c13] : memref<7x32xf32, #tpu.memory_space<smem>>
    %c1_170 = arith.constant 1 : index
    %c13_171 = arith.constant 13 : index
    %92 = memref.load %arg3[%c1_170, %c13_171] : memref<7x32xf32, #tpu.memory_space<smem>>
    %c2_172 = arith.constant 2 : index
    %c13_173 = arith.constant 13 : index
    %93 = memref.load %arg3[%c2_172, %c13_173] : memref<7x32xf32, #tpu.memory_space<smem>>
    %c3_174 = arith.constant 3 : index
    %c13_175 = arith.constant 13 : index
    %94 = memref.load %arg3[%c3_174, %c13_175] : memref<7x32xf32, #tpu.memory_space<smem>>
    %c4_176 = arith.constant 4 : index
    %c13_177 = arith.constant 13 : index
    %95 = memref.load %arg3[%c4_176, %c13_177] : memref<7x32xf32, #tpu.memory_space<smem>>
    %c5_178 = arith.constant 5 : index
    %c13_179 = arith.constant 13 : index
    %96 = memref.load %arg3[%c5_178, %c13_179] : memref<7x32xf32, #tpu.memory_space<smem>>
    %c6_180 = arith.constant 6 : index
    %c13_181 = arith.constant 13 : index
    %97 = memref.load %arg3[%c6_180, %c13_181] : memref<7x32xf32, #tpu.memory_space<smem>>
    %c0_182 = arith.constant 0 : index
    %c14 = arith.constant 14 : index
    %98 = memref.load %arg3[%c0_182, %c14] : memref<7x32xf32, #tpu.memory_space<smem>>
    %c1_183 = arith.constant 1 : index
    %c14_184 = arith.constant 14 : index
    %99 = memref.load %arg3[%c1_183, %c14_184] : memref<7x32xf32, #tpu.memory_space<smem>>
    %c2_185 = arith.constant 2 : index
    %c14_186 = arith.constant 14 : index
    %100 = memref.load %arg3[%c2_185, %c14_186] : memref<7x32xf32, #tpu.memory_space<smem>>
    %c3_187 = arith.constant 3 : index
    %c14_188 = arith.constant 14 : index
    %101 = memref.load %arg3[%c3_187, %c14_188] : memref<7x32xf32, #tpu.memory_space<smem>>
    %c4_189 = arith.constant 4 : index
    %c14_190 = arith.constant 14 : index
    %102 = memref.load %arg3[%c4_189, %c14_190] : memref<7x32xf32, #tpu.memory_space<smem>>
    %c5_191 = arith.constant 5 : index
    %c14_192 = arith.constant 14 : index
    %103 = memref.load %arg3[%c5_191, %c14_192] : memref<7x32xf32, #tpu.memory_space<smem>>
    %c6_193 = arith.constant 6 : index
    %c14_194 = arith.constant 14 : index
    %104 = memref.load %arg3[%c6_193, %c14_194] : memref<7x32xf32, #tpu.memory_space<smem>>
    %c0_195 = arith.constant 0 : index
    %c15 = arith.constant 15 : index
    %105 = memref.load %arg3[%c0_195, %c15] : memref<7x32xf32, #tpu.memory_space<smem>>
    %c1_196 = arith.constant 1 : index
    %c15_197 = arith.constant 15 : index
    %106 = memref.load %arg3[%c1_196, %c15_197] : memref<7x32xf32, #tpu.memory_space<smem>>
    %c2_198 = arith.constant 2 : index
    %c15_199 = arith.constant 15 : index
    %107 = memref.load %arg3[%c2_198, %c15_199] : memref<7x32xf32, #tpu.memory_space<smem>>
    %c3_200 = arith.constant 3 : index
    %c15_201 = arith.constant 15 : index
    %108 = memref.load %arg3[%c3_200, %c15_201] : memref<7x32xf32, #tpu.memory_space<smem>>
    %c4_202 = arith.constant 4 : index
    %c15_203 = arith.constant 15 : index
    %109 = memref.load %arg3[%c4_202, %c15_203] : memref<7x32xf32, #tpu.memory_space<smem>>
    %c5_204 = arith.constant 5 : index
    %c15_205 = arith.constant 15 : index
    %110 = memref.load %arg3[%c5_204, %c15_205] : memref<7x32xf32, #tpu.memory_space<smem>>
    %c6_206 = arith.constant 6 : index
    %c15_207 = arith.constant 15 : index
    %111 = memref.load %arg3[%c6_206, %c15_207] : memref<7x32xf32, #tpu.memory_space<smem>>
    %c0_208 = arith.constant 0 : index
    %c16 = arith.constant 16 : index
    %112 = memref.load %arg3[%c0_208, %c16] : memref<7x32xf32, #tpu.memory_space<smem>>
    %c1_209 = arith.constant 1 : index
    %c16_210 = arith.constant 16 : index
    %113 = memref.load %arg3[%c1_209, %c16_210] : memref<7x32xf32, #tpu.memory_space<smem>>
    %c2_211 = arith.constant 2 : index
    %c16_212 = arith.constant 16 : index
    %114 = memref.load %arg3[%c2_211, %c16_212] : memref<7x32xf32, #tpu.memory_space<smem>>
    %c3_213 = arith.constant 3 : index
    %c16_214 = arith.constant 16 : index
    %115 = memref.load %arg3[%c3_213, %c16_214] : memref<7x32xf32, #tpu.memory_space<smem>>
    %c4_215 = arith.constant 4 : index
    %c16_216 = arith.constant 16 : index
    %116 = memref.load %arg3[%c4_215, %c16_216] : memref<7x32xf32, #tpu.memory_space<smem>>
    %c5_217 = arith.constant 5 : index
    %c16_218 = arith.constant 16 : index
    %117 = memref.load %arg3[%c5_217, %c16_218] : memref<7x32xf32, #tpu.memory_space<smem>>
    %c6_219 = arith.constant 6 : index
    %c16_220 = arith.constant 16 : index
    %118 = memref.load %arg3[%c6_219, %c16_220] : memref<7x32xf32, #tpu.memory_space<smem>>
    %c0_221 = arith.constant 0 : index
    %c17 = arith.constant 17 : index
    %119 = memref.load %arg3[%c0_221, %c17] : memref<7x32xf32, #tpu.memory_space<smem>>
    %c1_222 = arith.constant 1 : index
    %c17_223 = arith.constant 17 : index
    %120 = memref.load %arg3[%c1_222, %c17_223] : memref<7x32xf32, #tpu.memory_space<smem>>
    %c2_224 = arith.constant 2 : index
    %c17_225 = arith.constant 17 : index
    %121 = memref.load %arg3[%c2_224, %c17_225] : memref<7x32xf32, #tpu.memory_space<smem>>
    %c3_226 = arith.constant 3 : index
    %c17_227 = arith.constant 17 : index
    %122 = memref.load %arg3[%c3_226, %c17_227] : memref<7x32xf32, #tpu.memory_space<smem>>
    %c4_228 = arith.constant 4 : index
    %c17_229 = arith.constant 17 : index
    %123 = memref.load %arg3[%c4_228, %c17_229] : memref<7x32xf32, #tpu.memory_space<smem>>
    %c5_230 = arith.constant 5 : index
    %c17_231 = arith.constant 17 : index
    %124 = memref.load %arg3[%c5_230, %c17_231] : memref<7x32xf32, #tpu.memory_space<smem>>
    %c6_232 = arith.constant 6 : index
    %c17_233 = arith.constant 17 : index
    %125 = memref.load %arg3[%c6_232, %c17_233] : memref<7x32xf32, #tpu.memory_space<smem>>
    %c0_234 = arith.constant 0 : index
    %c18 = arith.constant 18 : index
    %126 = memref.load %arg3[%c0_234, %c18] : memref<7x32xf32, #tpu.memory_space<smem>>
    %c1_235 = arith.constant 1 : index
    %c18_236 = arith.constant 18 : index
    %127 = memref.load %arg3[%c1_235, %c18_236] : memref<7x32xf32, #tpu.memory_space<smem>>
    %c2_237 = arith.constant 2 : index
    %c18_238 = arith.constant 18 : index
    %128 = memref.load %arg3[%c2_237, %c18_238] : memref<7x32xf32, #tpu.memory_space<smem>>
    %c3_239 = arith.constant 3 : index
    %c18_240 = arith.constant 18 : index
    %129 = memref.load %arg3[%c3_239, %c18_240] : memref<7x32xf32, #tpu.memory_space<smem>>
    %c4_241 = arith.constant 4 : index
    %c18_242 = arith.constant 18 : index
    %130 = memref.load %arg3[%c4_241, %c18_242] : memref<7x32xf32, #tpu.memory_space<smem>>
    %c5_243 = arith.constant 5 : index
    %c18_244 = arith.constant 18 : index
    %131 = memref.load %arg3[%c5_243, %c18_244] : memref<7x32xf32, #tpu.memory_space<smem>>
    %c6_245 = arith.constant 6 : index
    %c18_246 = arith.constant 18 : index
    %132 = memref.load %arg3[%c6_245, %c18_246] : memref<7x32xf32, #tpu.memory_space<smem>>
    %c0_247 = arith.constant 0 : index
    %c19 = arith.constant 19 : index
    %133 = memref.load %arg3[%c0_247, %c19] : memref<7x32xf32, #tpu.memory_space<smem>>
    %c1_248 = arith.constant 1 : index
    %c19_249 = arith.constant 19 : index
    %134 = memref.load %arg3[%c1_248, %c19_249] : memref<7x32xf32, #tpu.memory_space<smem>>
    %c2_250 = arith.constant 2 : index
    %c19_251 = arith.constant 19 : index
    %135 = memref.load %arg3[%c2_250, %c19_251] : memref<7x32xf32, #tpu.memory_space<smem>>
    %c3_252 = arith.constant 3 : index
    %c19_253 = arith.constant 19 : index
    %136 = memref.load %arg3[%c3_252, %c19_253] : memref<7x32xf32, #tpu.memory_space<smem>>
    %c4_254 = arith.constant 4 : index
    %c19_255 = arith.constant 19 : index
    %137 = memref.load %arg3[%c4_254, %c19_255] : memref<7x32xf32, #tpu.memory_space<smem>>
    %c5_256 = arith.constant 5 : index
    %c19_257 = arith.constant 19 : index
    %138 = memref.load %arg3[%c5_256, %c19_257] : memref<7x32xf32, #tpu.memory_space<smem>>
    %c6_258 = arith.constant 6 : index
    %c19_259 = arith.constant 19 : index
    %139 = memref.load %arg3[%c6_258, %c19_259] : memref<7x32xf32, #tpu.memory_space<smem>>
    %c0_260 = arith.constant 0 : index
    %c20 = arith.constant 20 : index
    %140 = memref.load %arg3[%c0_260, %c20] : memref<7x32xf32, #tpu.memory_space<smem>>
    %c1_261 = arith.constant 1 : index
    %c20_262 = arith.constant 20 : index
    %141 = memref.load %arg3[%c1_261, %c20_262] : memref<7x32xf32, #tpu.memory_space<smem>>
    %c2_263 = arith.constant 2 : index
    %c20_264 = arith.constant 20 : index
    %142 = memref.load %arg3[%c2_263, %c20_264] : memref<7x32xf32, #tpu.memory_space<smem>>
    %c3_265 = arith.constant 3 : index
    %c20_266 = arith.constant 20 : index
    %143 = memref.load %arg3[%c3_265, %c20_266] : memref<7x32xf32, #tpu.memory_space<smem>>
    %c4_267 = arith.constant 4 : index
    %c20_268 = arith.constant 20 : index
    %144 = memref.load %arg3[%c4_267, %c20_268] : memref<7x32xf32, #tpu.memory_space<smem>>
    %c5_269 = arith.constant 5 : index
    %c20_270 = arith.constant 20 : index
    %145 = memref.load %arg3[%c5_269, %c20_270] : memref<7x32xf32, #tpu.memory_space<smem>>
    %c6_271 = arith.constant 6 : index
    %c20_272 = arith.constant 20 : index
    %146 = memref.load %arg3[%c6_271, %c20_272] : memref<7x32xf32, #tpu.memory_space<smem>>
    %c0_273 = arith.constant 0 : index
    %c21 = arith.constant 21 : index
    %147 = memref.load %arg3[%c0_273, %c21] : memref<7x32xf32, #tpu.memory_space<smem>>
    %c1_274 = arith.constant 1 : index
    %c21_275 = arith.constant 21 : index
    %148 = memref.load %arg3[%c1_274, %c21_275] : memref<7x32xf32, #tpu.memory_space<smem>>
    %c2_276 = arith.constant 2 : index
    %c21_277 = arith.constant 21 : index
    %149 = memref.load %arg3[%c2_276, %c21_277] : memref<7x32xf32, #tpu.memory_space<smem>>
    %c3_278 = arith.constant 3 : index
    %c21_279 = arith.constant 21 : index
    %150 = memref.load %arg3[%c3_278, %c21_279] : memref<7x32xf32, #tpu.memory_space<smem>>
    %c4_280 = arith.constant 4 : index
    %c21_281 = arith.constant 21 : index
    %151 = memref.load %arg3[%c4_280, %c21_281] : memref<7x32xf32, #tpu.memory_space<smem>>
    %c5_282 = arith.constant 5 : index
    %c21_283 = arith.constant 21 : index
    %152 = memref.load %arg3[%c5_282, %c21_283] : memref<7x32xf32, #tpu.memory_space<smem>>
    %c6_284 = arith.constant 6 : index
    %c21_285 = arith.constant 21 : index
    %153 = memref.load %arg3[%c6_284, %c21_285] : memref<7x32xf32, #tpu.memory_space<smem>>
    %c0_286 = arith.constant 0 : index
    %c22 = arith.constant 22 : index
    %154 = memref.load %arg3[%c0_286, %c22] : memref<7x32xf32, #tpu.memory_space<smem>>
    %c1_287 = arith.constant 1 : index
    %c22_288 = arith.constant 22 : index
    %155 = memref.load %arg3[%c1_287, %c22_288] : memref<7x32xf32, #tpu.memory_space<smem>>
    %c2_289 = arith.constant 2 : index
    %c22_290 = arith.constant 22 : index
    %156 = memref.load %arg3[%c2_289, %c22_290] : memref<7x32xf32, #tpu.memory_space<smem>>
    %c3_291 = arith.constant 3 : index
    %c22_292 = arith.constant 22 : index
    %157 = memref.load %arg3[%c3_291, %c22_292] : memref<7x32xf32, #tpu.memory_space<smem>>
    %c4_293 = arith.constant 4 : index
    %c22_294 = arith.constant 22 : index
    %158 = memref.load %arg3[%c4_293, %c22_294] : memref<7x32xf32, #tpu.memory_space<smem>>
    %c5_295 = arith.constant 5 : index
    %c22_296 = arith.constant 22 : index
    %159 = memref.load %arg3[%c5_295, %c22_296] : memref<7x32xf32, #tpu.memory_space<smem>>
    %c6_297 = arith.constant 6 : index
    %c22_298 = arith.constant 22 : index
    %160 = memref.load %arg3[%c6_297, %c22_298] : memref<7x32xf32, #tpu.memory_space<smem>>
    %c0_299 = arith.constant 0 : index
    %c23 = arith.constant 23 : index
    %161 = memref.load %arg3[%c0_299, %c23] : memref<7x32xf32, #tpu.memory_space<smem>>
    %c1_300 = arith.constant 1 : index
    %c23_301 = arith.constant 23 : index
    %162 = memref.load %arg3[%c1_300, %c23_301] : memref<7x32xf32, #tpu.memory_space<smem>>
    %c2_302 = arith.constant 2 : index
    %c23_303 = arith.constant 23 : index
    %163 = memref.load %arg3[%c2_302, %c23_303] : memref<7x32xf32, #tpu.memory_space<smem>>
    %c3_304 = arith.constant 3 : index
    %c23_305 = arith.constant 23 : index
    %164 = memref.load %arg3[%c3_304, %c23_305] : memref<7x32xf32, #tpu.memory_space<smem>>
    %c4_306 = arith.constant 4 : index
    %c23_307 = arith.constant 23 : index
    %165 = memref.load %arg3[%c4_306, %c23_307] : memref<7x32xf32, #tpu.memory_space<smem>>
    %c5_308 = arith.constant 5 : index
    %c23_309 = arith.constant 23 : index
    %166 = memref.load %arg3[%c5_308, %c23_309] : memref<7x32xf32, #tpu.memory_space<smem>>
    %c6_310 = arith.constant 6 : index
    %c23_311 = arith.constant 23 : index
    %167 = memref.load %arg3[%c6_310, %c23_311] : memref<7x32xf32, #tpu.memory_space<smem>>
    %c0_312 = arith.constant 0 : index
    %c24 = arith.constant 24 : index
    %168 = memref.load %arg3[%c0_312, %c24] : memref<7x32xf32, #tpu.memory_space<smem>>
    %c1_313 = arith.constant 1 : index
    %c24_314 = arith.constant 24 : index
    %169 = memref.load %arg3[%c1_313, %c24_314] : memref<7x32xf32, #tpu.memory_space<smem>>
    %c2_315 = arith.constant 2 : index
    %c24_316 = arith.constant 24 : index
    %170 = memref.load %arg3[%c2_315, %c24_316] : memref<7x32xf32, #tpu.memory_space<smem>>
    %c3_317 = arith.constant 3 : index
    %c24_318 = arith.constant 24 : index
    %171 = memref.load %arg3[%c3_317, %c24_318] : memref<7x32xf32, #tpu.memory_space<smem>>
    %c4_319 = arith.constant 4 : index
    %c24_320 = arith.constant 24 : index
    %172 = memref.load %arg3[%c4_319, %c24_320] : memref<7x32xf32, #tpu.memory_space<smem>>
    %c5_321 = arith.constant 5 : index
    %c24_322 = arith.constant 24 : index
    %173 = memref.load %arg3[%c5_321, %c24_322] : memref<7x32xf32, #tpu.memory_space<smem>>
    %c6_323 = arith.constant 6 : index
    %c24_324 = arith.constant 24 : index
    %174 = memref.load %arg3[%c6_323, %c24_324] : memref<7x32xf32, #tpu.memory_space<smem>>
    %c0_325 = arith.constant 0 : index
    %c25 = arith.constant 25 : index
    %175 = memref.load %arg3[%c0_325, %c25] : memref<7x32xf32, #tpu.memory_space<smem>>
    %c1_326 = arith.constant 1 : index
    %c25_327 = arith.constant 25 : index
    %176 = memref.load %arg3[%c1_326, %c25_327] : memref<7x32xf32, #tpu.memory_space<smem>>
    %c2_328 = arith.constant 2 : index
    %c25_329 = arith.constant 25 : index
    %177 = memref.load %arg3[%c2_328, %c25_329] : memref<7x32xf32, #tpu.memory_space<smem>>
    %c3_330 = arith.constant 3 : index
    %c25_331 = arith.constant 25 : index
    %178 = memref.load %arg3[%c3_330, %c25_331] : memref<7x32xf32, #tpu.memory_space<smem>>
    %c4_332 = arith.constant 4 : index
    %c25_333 = arith.constant 25 : index
    %179 = memref.load %arg3[%c4_332, %c25_333] : memref<7x32xf32, #tpu.memory_space<smem>>
    %c5_334 = arith.constant 5 : index
    %c25_335 = arith.constant 25 : index
    %180 = memref.load %arg3[%c5_334, %c25_335] : memref<7x32xf32, #tpu.memory_space<smem>>
    %c6_336 = arith.constant 6 : index
    %c25_337 = arith.constant 25 : index
    %181 = memref.load %arg3[%c6_336, %c25_337] : memref<7x32xf32, #tpu.memory_space<smem>>
    %c0_338 = arith.constant 0 : index
    %c26 = arith.constant 26 : index
    %182 = memref.load %arg3[%c0_338, %c26] : memref<7x32xf32, #tpu.memory_space<smem>>
    %c1_339 = arith.constant 1 : index
    %c26_340 = arith.constant 26 : index
    %183 = memref.load %arg3[%c1_339, %c26_340] : memref<7x32xf32, #tpu.memory_space<smem>>
    %c2_341 = arith.constant 2 : index
    %c26_342 = arith.constant 26 : index
    %184 = memref.load %arg3[%c2_341, %c26_342] : memref<7x32xf32, #tpu.memory_space<smem>>
    %c3_343 = arith.constant 3 : index
    %c26_344 = arith.constant 26 : index
    %185 = memref.load %arg3[%c3_343, %c26_344] : memref<7x32xf32, #tpu.memory_space<smem>>
    %c4_345 = arith.constant 4 : index
    %c26_346 = arith.constant 26 : index
    %186 = memref.load %arg3[%c4_345, %c26_346] : memref<7x32xf32, #tpu.memory_space<smem>>
    %c5_347 = arith.constant 5 : index
    %c26_348 = arith.constant 26 : index
    %187 = memref.load %arg3[%c5_347, %c26_348] : memref<7x32xf32, #tpu.memory_space<smem>>
    %c6_349 = arith.constant 6 : index
    %c26_350 = arith.constant 26 : index
    %188 = memref.load %arg3[%c6_349, %c26_350] : memref<7x32xf32, #tpu.memory_space<smem>>
    %c0_351 = arith.constant 0 : index
    %c27 = arith.constant 27 : index
    %189 = memref.load %arg3[%c0_351, %c27] : memref<7x32xf32, #tpu.memory_space<smem>>
    %c1_352 = arith.constant 1 : index
    %c27_353 = arith.constant 27 : index
    %190 = memref.load %arg3[%c1_352, %c27_353] : memref<7x32xf32, #tpu.memory_space<smem>>
    %c2_354 = arith.constant 2 : index
    %c27_355 = arith.constant 27 : index
    %191 = memref.load %arg3[%c2_354, %c27_355] : memref<7x32xf32, #tpu.memory_space<smem>>
    %c3_356 = arith.constant 3 : index
    %c27_357 = arith.constant 27 : index
    %192 = memref.load %arg3[%c3_356, %c27_357] : memref<7x32xf32, #tpu.memory_space<smem>>
    %c4_358 = arith.constant 4 : index
    %c27_359 = arith.constant 27 : index
    %193 = memref.load %arg3[%c4_358, %c27_359] : memref<7x32xf32, #tpu.memory_space<smem>>
    %c5_360 = arith.constant 5 : index
    %c27_361 = arith.constant 27 : index
    %194 = memref.load %arg3[%c5_360, %c27_361] : memref<7x32xf32, #tpu.memory_space<smem>>
    %c6_362 = arith.constant 6 : index
    %c27_363 = arith.constant 27 : index
    %195 = memref.load %arg3[%c6_362, %c27_363] : memref<7x32xf32, #tpu.memory_space<smem>>
    %c0_364 = arith.constant 0 : index
    %c28 = arith.constant 28 : index
    %196 = memref.load %arg3[%c0_364, %c28] : memref<7x32xf32, #tpu.memory_space<smem>>
    %c1_365 = arith.constant 1 : index
    %c28_366 = arith.constant 28 : index
    %197 = memref.load %arg3[%c1_365, %c28_366] : memref<7x32xf32, #tpu.memory_space<smem>>
    %c2_367 = arith.constant 2 : index
    %c28_368 = arith.constant 28 : index
    %198 = memref.load %arg3[%c2_367, %c28_368] : memref<7x32xf32, #tpu.memory_space<smem>>
    %c3_369 = arith.constant 3 : index
    %c28_370 = arith.constant 28 : index
    %199 = memref.load %arg3[%c3_369, %c28_370] : memref<7x32xf32, #tpu.memory_space<smem>>
    %c4_371 = arith.constant 4 : index
    %c28_372 = arith.constant 28 : index
    %200 = memref.load %arg3[%c4_371, %c28_372] : memref<7x32xf32, #tpu.memory_space<smem>>
    %c5_373 = arith.constant 5 : index
    %c28_374 = arith.constant 28 : index
    %201 = memref.load %arg3[%c5_373, %c28_374] : memref<7x32xf32, #tpu.memory_space<smem>>
    %c6_375 = arith.constant 6 : index
    %c28_376 = arith.constant 28 : index
    %202 = memref.load %arg3[%c6_375, %c28_376] : memref<7x32xf32, #tpu.memory_space<smem>>
    %c0_377 = arith.constant 0 : index
    %c29 = arith.constant 29 : index
    %203 = memref.load %arg3[%c0_377, %c29] : memref<7x32xf32, #tpu.memory_space<smem>>
    %c1_378 = arith.constant 1 : index
    %c29_379 = arith.constant 29 : index
    %204 = memref.load %arg3[%c1_378, %c29_379] : memref<7x32xf32, #tpu.memory_space<smem>>
    %c2_380 = arith.constant 2 : index
    %c29_381 = arith.constant 29 : index
    %205 = memref.load %arg3[%c2_380, %c29_381] : memref<7x32xf32, #tpu.memory_space<smem>>
    %c3_382 = arith.constant 3 : index
    %c29_383 = arith.constant 29 : index
    %206 = memref.load %arg3[%c3_382, %c29_383] : memref<7x32xf32, #tpu.memory_space<smem>>
    %c4_384 = arith.constant 4 : index
    %c29_385 = arith.constant 29 : index
    %207 = memref.load %arg3[%c4_384, %c29_385] : memref<7x32xf32, #tpu.memory_space<smem>>
    %c5_386 = arith.constant 5 : index
    %c29_387 = arith.constant 29 : index
    %208 = memref.load %arg3[%c5_386, %c29_387] : memref<7x32xf32, #tpu.memory_space<smem>>
    %c6_388 = arith.constant 6 : index
    %c29_389 = arith.constant 29 : index
    %209 = memref.load %arg3[%c6_388, %c29_389] : memref<7x32xf32, #tpu.memory_space<smem>>
    %c0_390 = arith.constant 0 : index
    %c30 = arith.constant 30 : index
    %210 = memref.load %arg3[%c0_390, %c30] : memref<7x32xf32, #tpu.memory_space<smem>>
    %c1_391 = arith.constant 1 : index
    %c30_392 = arith.constant 30 : index
    %211 = memref.load %arg3[%c1_391, %c30_392] : memref<7x32xf32, #tpu.memory_space<smem>>
    %c2_393 = arith.constant 2 : index
    %c30_394 = arith.constant 30 : index
    %212 = memref.load %arg3[%c2_393, %c30_394] : memref<7x32xf32, #tpu.memory_space<smem>>
    %c3_395 = arith.constant 3 : index
    %c30_396 = arith.constant 30 : index
    %213 = memref.load %arg3[%c3_395, %c30_396] : memref<7x32xf32, #tpu.memory_space<smem>>
    %c4_397 = arith.constant 4 : index
    %c30_398 = arith.constant 30 : index
    %214 = memref.load %arg3[%c4_397, %c30_398] : memref<7x32xf32, #tpu.memory_space<smem>>
    %c5_399 = arith.constant 5 : index
    %c30_400 = arith.constant 30 : index
    %215 = memref.load %arg3[%c5_399, %c30_400] : memref<7x32xf32, #tpu.memory_space<smem>>
    %c6_401 = arith.constant 6 : index
    %c30_402 = arith.constant 30 : index
    %216 = memref.load %arg3[%c6_401, %c30_402] : memref<7x32xf32, #tpu.memory_space<smem>>
    %c0_403 = arith.constant 0 : index
    %c31 = arith.constant 31 : index
    %217 = memref.load %arg3[%c0_403, %c31] : memref<7x32xf32, #tpu.memory_space<smem>>
    %c1_404 = arith.constant 1 : index
    %c31_405 = arith.constant 31 : index
    %218 = memref.load %arg3[%c1_404, %c31_405] : memref<7x32xf32, #tpu.memory_space<smem>>
    %c2_406 = arith.constant 2 : index
    %c31_407 = arith.constant 31 : index
    %219 = memref.load %arg3[%c2_406, %c31_407] : memref<7x32xf32, #tpu.memory_space<smem>>
    %c3_408 = arith.constant 3 : index
    %c31_409 = arith.constant 31 : index
    %220 = memref.load %arg3[%c3_408, %c31_409] : memref<7x32xf32, #tpu.memory_space<smem>>
    %c4_410 = arith.constant 4 : index
    %c31_411 = arith.constant 31 : index
    %221 = memref.load %arg3[%c4_410, %c31_411] : memref<7x32xf32, #tpu.memory_space<smem>>
    %c5_412 = arith.constant 5 : index
    %c31_413 = arith.constant 31 : index
    %222 = memref.load %arg3[%c5_412, %c31_413] : memref<7x32xf32, #tpu.memory_space<smem>>
    %c6_414 = arith.constant 6 : index
    %c31_415 = arith.constant 31 : index
    %223 = memref.load %arg3[%c6_414, %c31_415] : memref<7x32xf32, #tpu.memory_space<smem>>
    %c0_416 = arith.constant 0 : index
    %224 = memref.load %arg4[%c0_416] : memref<32xf32, #tpu.memory_space<smem>>
    %c1_417 = arith.constant 1 : index
    %225 = memref.load %arg4[%c1_417] : memref<32xf32, #tpu.memory_space<smem>>
    %c2_418 = arith.constant 2 : index
    %226 = memref.load %arg4[%c2_418] : memref<32xf32, #tpu.memory_space<smem>>
    %c3_419 = arith.constant 3 : index
    %227 = memref.load %arg4[%c3_419] : memref<32xf32, #tpu.memory_space<smem>>
    %c4_420 = arith.constant 4 : index
    %228 = memref.load %arg4[%c4_420] : memref<32xf32, #tpu.memory_space<smem>>
    %c5_421 = arith.constant 5 : index
    %229 = memref.load %arg4[%c5_421] : memref<32xf32, #tpu.memory_space<smem>>
    %c6_422 = arith.constant 6 : index
    %230 = memref.load %arg4[%c6_422] : memref<32xf32, #tpu.memory_space<smem>>
    %c7_423 = arith.constant 7 : index
    %231 = memref.load %arg4[%c7_423] : memref<32xf32, #tpu.memory_space<smem>>
    %c8_424 = arith.constant 8 : index
    %232 = memref.load %arg4[%c8_424] : memref<32xf32, #tpu.memory_space<smem>>
    %c9_425 = arith.constant 9 : index
    %233 = memref.load %arg4[%c9_425] : memref<32xf32, #tpu.memory_space<smem>>
    %c10_426 = arith.constant 10 : index
    %234 = memref.load %arg4[%c10_426] : memref<32xf32, #tpu.memory_space<smem>>
    %c11_427 = arith.constant 11 : index
    %235 = memref.load %arg4[%c11_427] : memref<32xf32, #tpu.memory_space<smem>>
    %c12_428 = arith.constant 12 : index
    %236 = memref.load %arg4[%c12_428] : memref<32xf32, #tpu.memory_space<smem>>
    %c13_429 = arith.constant 13 : index
    %237 = memref.load %arg4[%c13_429] : memref<32xf32, #tpu.memory_space<smem>>
    %c14_430 = arith.constant 14 : index
    %238 = memref.load %arg4[%c14_430] : memref<32xf32, #tpu.memory_space<smem>>
    %c15_431 = arith.constant 15 : index
    %239 = memref.load %arg4[%c15_431] : memref<32xf32, #tpu.memory_space<smem>>
    %c16_432 = arith.constant 16 : index
    %240 = memref.load %arg4[%c16_432] : memref<32xf32, #tpu.memory_space<smem>>
    %c17_433 = arith.constant 17 : index
    %241 = memref.load %arg4[%c17_433] : memref<32xf32, #tpu.memory_space<smem>>
    %c18_434 = arith.constant 18 : index
    %242 = memref.load %arg4[%c18_434] : memref<32xf32, #tpu.memory_space<smem>>
    %c19_435 = arith.constant 19 : index
    %243 = memref.load %arg4[%c19_435] : memref<32xf32, #tpu.memory_space<smem>>
    %c20_436 = arith.constant 20 : index
    %244 = memref.load %arg4[%c20_436] : memref<32xf32, #tpu.memory_space<smem>>
    %c21_437 = arith.constant 21 : index
    %245 = memref.load %arg4[%c21_437] : memref<32xf32, #tpu.memory_space<smem>>
    %c22_438 = arith.constant 22 : index
    %246 = memref.load %arg4[%c22_438] : memref<32xf32, #tpu.memory_space<smem>>
    %c23_439 = arith.constant 23 : index
    %247 = memref.load %arg4[%c23_439] : memref<32xf32, #tpu.memory_space<smem>>
    %c24_440 = arith.constant 24 : index
    %248 = memref.load %arg4[%c24_440] : memref<32xf32, #tpu.memory_space<smem>>
    %c25_441 = arith.constant 25 : index
    %249 = memref.load %arg4[%c25_441] : memref<32xf32, #tpu.memory_space<smem>>
    %c26_442 = arith.constant 26 : index
    %250 = memref.load %arg4[%c26_442] : memref<32xf32, #tpu.memory_space<smem>>
    %c27_443 = arith.constant 27 : index
    %251 = memref.load %arg4[%c27_443] : memref<32xf32, #tpu.memory_space<smem>>
    %c28_444 = arith.constant 28 : index
    %252 = memref.load %arg4[%c28_444] : memref<32xf32, #tpu.memory_space<smem>>
    %c29_445 = arith.constant 29 : index
    %253 = memref.load %arg4[%c29_445] : memref<32xf32, #tpu.memory_space<smem>>
    %c30_446 = arith.constant 30 : index
    %254 = memref.load %arg4[%c30_446] : memref<32xf32, #tpu.memory_space<smem>>
    %c31_447 = arith.constant 31 : index
    %255 = memref.load %arg4[%c31_447] : memref<32xf32, #tpu.memory_space<smem>>
    %c0_448 = arith.constant 0 : index
    %256 = memref.load %arg5[%c0_448] : memref<32xf32, #tpu.memory_space<smem>>
    %c1_449 = arith.constant 1 : index
    %257 = memref.load %arg5[%c1_449] : memref<32xf32, #tpu.memory_space<smem>>
    %c2_450 = arith.constant 2 : index
    %258 = memref.load %arg5[%c2_450] : memref<32xf32, #tpu.memory_space<smem>>
    %c3_451 = arith.constant 3 : index
    %259 = memref.load %arg5[%c3_451] : memref<32xf32, #tpu.memory_space<smem>>
    %c4_452 = arith.constant 4 : index
    %260 = memref.load %arg5[%c4_452] : memref<32xf32, #tpu.memory_space<smem>>
    %c5_453 = arith.constant 5 : index
    %261 = memref.load %arg5[%c5_453] : memref<32xf32, #tpu.memory_space<smem>>
    %c6_454 = arith.constant 6 : index
    %262 = memref.load %arg5[%c6_454] : memref<32xf32, #tpu.memory_space<smem>>
    %c7_455 = arith.constant 7 : index
    %263 = memref.load %arg5[%c7_455] : memref<32xf32, #tpu.memory_space<smem>>
    %c8_456 = arith.constant 8 : index
    %264 = memref.load %arg5[%c8_456] : memref<32xf32, #tpu.memory_space<smem>>
    %c9_457 = arith.constant 9 : index
    %265 = memref.load %arg5[%c9_457] : memref<32xf32, #tpu.memory_space<smem>>
    %c10_458 = arith.constant 10 : index
    %266 = memref.load %arg5[%c10_458] : memref<32xf32, #tpu.memory_space<smem>>
    %c11_459 = arith.constant 11 : index
    %267 = memref.load %arg5[%c11_459] : memref<32xf32, #tpu.memory_space<smem>>
    %c12_460 = arith.constant 12 : index
    %268 = memref.load %arg5[%c12_460] : memref<32xf32, #tpu.memory_space<smem>>
    %c13_461 = arith.constant 13 : index
    %269 = memref.load %arg5[%c13_461] : memref<32xf32, #tpu.memory_space<smem>>
    %c14_462 = arith.constant 14 : index
    %270 = memref.load %arg5[%c14_462] : memref<32xf32, #tpu.memory_space<smem>>
    %c15_463 = arith.constant 15 : index
    %271 = memref.load %arg5[%c15_463] : memref<32xf32, #tpu.memory_space<smem>>
    %c16_464 = arith.constant 16 : index
    %272 = memref.load %arg5[%c16_464] : memref<32xf32, #tpu.memory_space<smem>>
    %c17_465 = arith.constant 17 : index
    %273 = memref.load %arg5[%c17_465] : memref<32xf32, #tpu.memory_space<smem>>
    %c18_466 = arith.constant 18 : index
    %274 = memref.load %arg5[%c18_466] : memref<32xf32, #tpu.memory_space<smem>>
    %c19_467 = arith.constant 19 : index
    %275 = memref.load %arg5[%c19_467] : memref<32xf32, #tpu.memory_space<smem>>
    %c20_468 = arith.constant 20 : index
    %276 = memref.load %arg5[%c20_468] : memref<32xf32, #tpu.memory_space<smem>>
    %c21_469 = arith.constant 21 : index
    %277 = memref.load %arg5[%c21_469] : memref<32xf32, #tpu.memory_space<smem>>
    %c22_470 = arith.constant 22 : index
    %278 = memref.load %arg5[%c22_470] : memref<32xf32, #tpu.memory_space<smem>>
    %c23_471 = arith.constant 23 : index
    %279 = memref.load %arg5[%c23_471] : memref<32xf32, #tpu.memory_space<smem>>
    %c24_472 = arith.constant 24 : index
    %280 = memref.load %arg5[%c24_472] : memref<32xf32, #tpu.memory_space<smem>>
    %c25_473 = arith.constant 25 : index
    %281 = memref.load %arg5[%c25_473] : memref<32xf32, #tpu.memory_space<smem>>
    %c26_474 = arith.constant 26 : index
    %282 = memref.load %arg5[%c26_474] : memref<32xf32, #tpu.memory_space<smem>>
    %c27_475 = arith.constant 27 : index
    %283 = memref.load %arg5[%c27_475] : memref<32xf32, #tpu.memory_space<smem>>
    %c28_476 = arith.constant 28 : index
    %284 = memref.load %arg5[%c28_476] : memref<32xf32, #tpu.memory_space<smem>>
    %c29_477 = arith.constant 29 : index
    %285 = memref.load %arg5[%c29_477] : memref<32xf32, #tpu.memory_space<smem>>
    %c30_478 = arith.constant 30 : index
    %286 = memref.load %arg5[%c30_478] : memref<32xf32, #tpu.memory_space<smem>>
    %c31_479 = arith.constant 31 : index
    %287 = memref.load %arg5[%c31_479] : memref<32xf32, #tpu.memory_space<smem>>
    %c0_480 = arith.constant 0 : index
    %288 = memref.load %arg6[%c0_480] : memref<1xf32, #tpu.memory_space<smem>>
    %c0_i32 = arith.constant 0 : i32
    %c8_i32 = arith.constant 8 : i32
    %289 = arith.muli %c0_i32, %c8_i32 : i32
    %290 = tpu.assume_multiple %289, 8 : i32
    %c0_481 = arith.constant 0 : index
    %291 = arith.index_cast %290 : i32 to index
    %c0_482 = arith.constant 0 : index
    %292 = vector.load %arg1[%c0_481, %291, %c0_482] : memref<2x8x128xf32, #tpu.memory_space<vmem>>, vector<1x8x128xf32>
    %293 = vector.shape_cast %292 : vector<1x8x128xf32> to vector<8x128xf32>
    %c1_483 = arith.constant 1 : index
    %294 = arith.index_cast %290 : i32 to index
    %c0_484 = arith.constant 0 : index
    %295 = vector.load %arg1[%c1_483, %294, %c0_484] : memref<2x8x128xf32, #tpu.memory_space<vmem>>, vector<1x8x128xf32>
    %296 = vector.shape_cast %295 : vector<1x8x128xf32> to vector<8x128xf32>
    %297 = math.absf %293 : vector<8x128xf32>
    %298 = math.absf %296 : vector<8x128xf32>
    %299 = arith.mulf %293, %296 : vector<8x128xf32>
    %300 = arith.mulf %293, %293 : vector<8x128xf32>
    %301 = arith.mulf %296, %296 : vector<8x128xf32>
    %302 = vector.broadcast %288 : f32 to vector<8x128xf32>
    %303 = vector.broadcast %0 : f32 to vector<8x128xf32>
    %304 = arith.mulf %293, %303 : vector<8x128xf32>
    %305 = vector.broadcast %1 : f32 to vector<8x128xf32>
    %306 = arith.mulf %296, %305 : vector<8x128xf32>
    %307 = arith.addf %304, %306 : vector<8x128xf32>
    %308 = vector.broadcast %2 : f32 to vector<8x128xf32>
    %309 = arith.mulf %297, %308 : vector<8x128xf32>
    %310 = arith.addf %307, %309 : vector<8x128xf32>
    %311 = vector.broadcast %3 : f32 to vector<8x128xf32>
    %312 = arith.mulf %298, %311 : vector<8x128xf32>
    %313 = arith.addf %310, %312 : vector<8x128xf32>
    %314 = vector.broadcast %4 : f32 to vector<8x128xf32>
    %315 = arith.mulf %299, %314 : vector<8x128xf32>
    %316 = arith.addf %313, %315 : vector<8x128xf32>
    %317 = vector.broadcast %5 : f32 to vector<8x128xf32>
    %318 = arith.mulf %300, %317 : vector<8x128xf32>
    %319 = arith.addf %316, %318 : vector<8x128xf32>
    %320 = vector.broadcast %6 : f32 to vector<8x128xf32>
    %321 = arith.mulf %301, %320 : vector<8x128xf32>
    %322 = arith.addf %319, %321 : vector<8x128xf32>
    %323 = vector.broadcast %224 : f32 to vector<8x128xf32>
    %324 = arith.addf %322, %323 : vector<8x128xf32>
    %cst = arith.constant 0.000000e+00 : f32
    %325 = vector.broadcast %cst : f32 to vector<8x128xf32>
    %326 = arith.maximumf %324, %325 : vector<8x128xf32>
    %327 = vector.broadcast %256 : f32 to vector<8x128xf32>
    %328 = arith.mulf %326, %327 : vector<8x128xf32>
    %329 = arith.addf %302, %328 : vector<8x128xf32>
    %330 = vector.broadcast %7 : f32 to vector<8x128xf32>
    %331 = arith.mulf %293, %330 : vector<8x128xf32>
    %332 = vector.broadcast %8 : f32 to vector<8x128xf32>
    %333 = arith.mulf %296, %332 : vector<8x128xf32>
    %334 = arith.addf %331, %333 : vector<8x128xf32>
    %335 = vector.broadcast %9 : f32 to vector<8x128xf32>
    %336 = arith.mulf %297, %335 : vector<8x128xf32>
    %337 = arith.addf %334, %336 : vector<8x128xf32>
    %338 = vector.broadcast %10 : f32 to vector<8x128xf32>
    %339 = arith.mulf %298, %338 : vector<8x128xf32>
    %340 = arith.addf %337, %339 : vector<8x128xf32>
    %341 = vector.broadcast %11 : f32 to vector<8x128xf32>
    %342 = arith.mulf %299, %341 : vector<8x128xf32>
    %343 = arith.addf %340, %342 : vector<8x128xf32>
    %344 = vector.broadcast %12 : f32 to vector<8x128xf32>
    %345 = arith.mulf %300, %344 : vector<8x128xf32>
    %346 = arith.addf %343, %345 : vector<8x128xf32>
    %347 = vector.broadcast %13 : f32 to vector<8x128xf32>
    %348 = arith.mulf %301, %347 : vector<8x128xf32>
    %349 = arith.addf %346, %348 : vector<8x128xf32>
    %350 = vector.broadcast %225 : f32 to vector<8x128xf32>
    %351 = arith.addf %349, %350 : vector<8x128xf32>
    %cst_485 = arith.constant 0.000000e+00 : f32
    %352 = vector.broadcast %cst_485 : f32 to vector<8x128xf32>
    %353 = arith.maximumf %351, %352 : vector<8x128xf32>
    %354 = vector.broadcast %257 : f32 to vector<8x128xf32>
    %355 = arith.mulf %353, %354 : vector<8x128xf32>
    %356 = arith.addf %329, %355 : vector<8x128xf32>
    %357 = vector.broadcast %14 : f32 to vector<8x128xf32>
    %358 = arith.mulf %293, %357 : vector<8x128xf32>
    %359 = vector.broadcast %15 : f32 to vector<8x128xf32>
    %360 = arith.mulf %296, %359 : vector<8x128xf32>
    %361 = arith.addf %358, %360 : vector<8x128xf32>
    %362 = vector.broadcast %16 : f32 to vector<8x128xf32>
    %363 = arith.mulf %297, %362 : vector<8x128xf32>
    %364 = arith.addf %361, %363 : vector<8x128xf32>
    %365 = vector.broadcast %17 : f32 to vector<8x128xf32>
    %366 = arith.mulf %298, %365 : vector<8x128xf32>
    %367 = arith.addf %364, %366 : vector<8x128xf32>
    %368 = vector.broadcast %18 : f32 to vector<8x128xf32>
    %369 = arith.mulf %299, %368 : vector<8x128xf32>
    %370 = arith.addf %367, %369 : vector<8x128xf32>
    %371 = vector.broadcast %19 : f32 to vector<8x128xf32>
    %372 = arith.mulf %300, %371 : vector<8x128xf32>
    %373 = arith.addf %370, %372 : vector<8x128xf32>
    %374 = vector.broadcast %20 : f32 to vector<8x128xf32>
    %375 = arith.mulf %301, %374 : vector<8x128xf32>
    %376 = arith.addf %373, %375 : vector<8x128xf32>
    %377 = vector.broadcast %226 : f32 to vector<8x128xf32>
    %378 = arith.addf %376, %377 : vector<8x128xf32>
    %cst_486 = arith.constant 0.000000e+00 : f32
    %379 = vector.broadcast %cst_486 : f32 to vector<8x128xf32>
    %380 = arith.maximumf %378, %379 : vector<8x128xf32>
    %381 = vector.broadcast %258 : f32 to vector<8x128xf32>
    %382 = arith.mulf %380, %381 : vector<8x128xf32>
    %383 = arith.addf %356, %382 : vector<8x128xf32>
    %384 = vector.broadcast %21 : f32 to vector<8x128xf32>
    %385 = arith.mulf %293, %384 : vector<8x128xf32>
    %386 = vector.broadcast %22 : f32 to vector<8x128xf32>
    %387 = arith.mulf %296, %386 : vector<8x128xf32>
    %388 = arith.addf %385, %387 : vector<8x128xf32>
    %389 = vector.broadcast %23 : f32 to vector<8x128xf32>
    %390 = arith.mulf %297, %389 : vector<8x128xf32>
    %391 = arith.addf %388, %390 : vector<8x128xf32>
    %392 = vector.broadcast %24 : f32 to vector<8x128xf32>
    %393 = arith.mulf %298, %392 : vector<8x128xf32>
    %394 = arith.addf %391, %393 : vector<8x128xf32>
    %395 = vector.broadcast %25 : f32 to vector<8x128xf32>
    %396 = arith.mulf %299, %395 : vector<8x128xf32>
    %397 = arith.addf %394, %396 : vector<8x128xf32>
    %398 = vector.broadcast %26 : f32 to vector<8x128xf32>
    %399 = arith.mulf %300, %398 : vector<8x128xf32>
    %400 = arith.addf %397, %399 : vector<8x128xf32>
    %401 = vector.broadcast %27 : f32 to vector<8x128xf32>
    %402 = arith.mulf %301, %401 : vector<8x128xf32>
    %403 = arith.addf %400, %402 : vector<8x128xf32>
    %404 = vector.broadcast %227 : f32 to vector<8x128xf32>
    %405 = arith.addf %403, %404 : vector<8x128xf32>
    %cst_487 = arith.constant 0.000000e+00 : f32
    %406 = vector.broadcast %cst_487 : f32 to vector<8x128xf32>
    %407 = arith.maximumf %405, %406 : vector<8x128xf32>
    %408 = vector.broadcast %259 : f32 to vector<8x128xf32>
    %409 = arith.mulf %407, %408 : vector<8x128xf32>
    %410 = arith.addf %383, %409 : vector<8x128xf32>
    %411 = vector.broadcast %28 : f32 to vector<8x128xf32>
    %412 = arith.mulf %293, %411 : vector<8x128xf32>
    %413 = vector.broadcast %29 : f32 to vector<8x128xf32>
    %414 = arith.mulf %296, %413 : vector<8x128xf32>
    %415 = arith.addf %412, %414 : vector<8x128xf32>
    %416 = vector.broadcast %30 : f32 to vector<8x128xf32>
    %417 = arith.mulf %297, %416 : vector<8x128xf32>
    %418 = arith.addf %415, %417 : vector<8x128xf32>
    %419 = vector.broadcast %31 : f32 to vector<8x128xf32>
    %420 = arith.mulf %298, %419 : vector<8x128xf32>
    %421 = arith.addf %418, %420 : vector<8x128xf32>
    %422 = vector.broadcast %32 : f32 to vector<8x128xf32>
    %423 = arith.mulf %299, %422 : vector<8x128xf32>
    %424 = arith.addf %421, %423 : vector<8x128xf32>
    %425 = vector.broadcast %33 : f32 to vector<8x128xf32>
    %426 = arith.mulf %300, %425 : vector<8x128xf32>
    %427 = arith.addf %424, %426 : vector<8x128xf32>
    %428 = vector.broadcast %34 : f32 to vector<8x128xf32>
    %429 = arith.mulf %301, %428 : vector<8x128xf32>
    %430 = arith.addf %427, %429 : vector<8x128xf32>
    %431 = vector.broadcast %228 : f32 to vector<8x128xf32>
    %432 = arith.addf %430, %431 : vector<8x128xf32>
    %cst_488 = arith.constant 0.000000e+00 : f32
    %433 = vector.broadcast %cst_488 : f32 to vector<8x128xf32>
    %434 = arith.maximumf %432, %433 : vector<8x128xf32>
    %435 = vector.broadcast %260 : f32 to vector<8x128xf32>
    %436 = arith.mulf %434, %435 : vector<8x128xf32>
    %437 = arith.addf %410, %436 : vector<8x128xf32>
    %438 = vector.broadcast %35 : f32 to vector<8x128xf32>
    %439 = arith.mulf %293, %438 : vector<8x128xf32>
    %440 = vector.broadcast %36 : f32 to vector<8x128xf32>
    %441 = arith.mulf %296, %440 : vector<8x128xf32>
    %442 = arith.addf %439, %441 : vector<8x128xf32>
    %443 = vector.broadcast %37 : f32 to vector<8x128xf32>
    %444 = arith.mulf %297, %443 : vector<8x128xf32>
    %445 = arith.addf %442, %444 : vector<8x128xf32>
    %446 = vector.broadcast %38 : f32 to vector<8x128xf32>
    %447 = arith.mulf %298, %446 : vector<8x128xf32>
    %448 = arith.addf %445, %447 : vector<8x128xf32>
    %449 = vector.broadcast %39 : f32 to vector<8x128xf32>
    %450 = arith.mulf %299, %449 : vector<8x128xf32>
    %451 = arith.addf %448, %450 : vector<8x128xf32>
    %452 = vector.broadcast %40 : f32 to vector<8x128xf32>
    %453 = arith.mulf %300, %452 : vector<8x128xf32>
    %454 = arith.addf %451, %453 : vector<8x128xf32>
    %455 = vector.broadcast %41 : f32 to vector<8x128xf32>
    %456 = arith.mulf %301, %455 : vector<8x128xf32>
    %457 = arith.addf %454, %456 : vector<8x128xf32>
    %458 = vector.broadcast %229 : f32 to vector<8x128xf32>
    %459 = arith.addf %457, %458 : vector<8x128xf32>
    %cst_489 = arith.constant 0.000000e+00 : f32
    %460 = vector.broadcast %cst_489 : f32 to vector<8x128xf32>
    %461 = arith.maximumf %459, %460 : vector<8x128xf32>
    %462 = vector.broadcast %261 : f32 to vector<8x128xf32>
    %463 = arith.mulf %461, %462 : vector<8x128xf32>
    %464 = arith.addf %437, %463 : vector<8x128xf32>
    %465 = vector.broadcast %42 : f32 to vector<8x128xf32>
    %466 = arith.mulf %293, %465 : vector<8x128xf32>
    %467 = vector.broadcast %43 : f32 to vector<8x128xf32>
    %468 = arith.mulf %296, %467 : vector<8x128xf32>
    %469 = arith.addf %466, %468 : vector<8x128xf32>
    %470 = vector.broadcast %44 : f32 to vector<8x128xf32>
    %471 = arith.mulf %297, %470 : vector<8x128xf32>
    %472 = arith.addf %469, %471 : vector<8x128xf32>
    %473 = vector.broadcast %45 : f32 to vector<8x128xf32>
    %474 = arith.mulf %298, %473 : vector<8x128xf32>
    %475 = arith.addf %472, %474 : vector<8x128xf32>
    %476 = vector.broadcast %46 : f32 to vector<8x128xf32>
    %477 = arith.mulf %299, %476 : vector<8x128xf32>
    %478 = arith.addf %475, %477 : vector<8x128xf32>
    %479 = vector.broadcast %47 : f32 to vector<8x128xf32>
    %480 = arith.mulf %300, %479 : vector<8x128xf32>
    %481 = arith.addf %478, %480 : vector<8x128xf32>
    %482 = vector.broadcast %48 : f32 to vector<8x128xf32>
    %483 = arith.mulf %301, %482 : vector<8x128xf32>
    %484 = arith.addf %481, %483 : vector<8x128xf32>
    %485 = vector.broadcast %230 : f32 to vector<8x128xf32>
    %486 = arith.addf %484, %485 : vector<8x128xf32>
    %cst_490 = arith.constant 0.000000e+00 : f32
    %487 = vector.broadcast %cst_490 : f32 to vector<8x128xf32>
    %488 = arith.maximumf %486, %487 : vector<8x128xf32>
    %489 = vector.broadcast %262 : f32 to vector<8x128xf32>
    %490 = arith.mulf %488, %489 : vector<8x128xf32>
    %491 = arith.addf %464, %490 : vector<8x128xf32>
    %492 = vector.broadcast %49 : f32 to vector<8x128xf32>
    %493 = arith.mulf %293, %492 : vector<8x128xf32>
    %494 = vector.broadcast %50 : f32 to vector<8x128xf32>
    %495 = arith.mulf %296, %494 : vector<8x128xf32>
    %496 = arith.addf %493, %495 : vector<8x128xf32>
    %497 = vector.broadcast %51 : f32 to vector<8x128xf32>
    %498 = arith.mulf %297, %497 : vector<8x128xf32>
    %499 = arith.addf %496, %498 : vector<8x128xf32>
    %500 = vector.broadcast %52 : f32 to vector<8x128xf32>
    %501 = arith.mulf %298, %500 : vector<8x128xf32>
    %502 = arith.addf %499, %501 : vector<8x128xf32>
    %503 = vector.broadcast %53 : f32 to vector<8x128xf32>
    %504 = arith.mulf %299, %503 : vector<8x128xf32>
    %505 = arith.addf %502, %504 : vector<8x128xf32>
    %506 = vector.broadcast %54 : f32 to vector<8x128xf32>
    %507 = arith.mulf %300, %506 : vector<8x128xf32>
    %508 = arith.addf %505, %507 : vector<8x128xf32>
    %509 = vector.broadcast %55 : f32 to vector<8x128xf32>
    %510 = arith.mulf %301, %509 : vector<8x128xf32>
    %511 = arith.addf %508, %510 : vector<8x128xf32>
    %512 = vector.broadcast %231 : f32 to vector<8x128xf32>
    %513 = arith.addf %511, %512 : vector<8x128xf32>
    %cst_491 = arith.constant 0.000000e+00 : f32
    %514 = vector.broadcast %cst_491 : f32 to vector<8x128xf32>
    %515 = arith.maximumf %513, %514 : vector<8x128xf32>
    %516 = vector.broadcast %263 : f32 to vector<8x128xf32>
    %517 = arith.mulf %515, %516 : vector<8x128xf32>
    %518 = arith.addf %491, %517 : vector<8x128xf32>
    %519 = vector.broadcast %56 : f32 to vector<8x128xf32>
    %520 = arith.mulf %293, %519 : vector<8x128xf32>
    %521 = vector.broadcast %57 : f32 to vector<8x128xf32>
    %522 = arith.mulf %296, %521 : vector<8x128xf32>
    %523 = arith.addf %520, %522 : vector<8x128xf32>
    %524 = vector.broadcast %58 : f32 to vector<8x128xf32>
    %525 = arith.mulf %297, %524 : vector<8x128xf32>
    %526 = arith.addf %523, %525 : vector<8x128xf32>
    %527 = vector.broadcast %59 : f32 to vector<8x128xf32>
    %528 = arith.mulf %298, %527 : vector<8x128xf32>
    %529 = arith.addf %526, %528 : vector<8x128xf32>
    %530 = vector.broadcast %60 : f32 to vector<8x128xf32>
    %531 = arith.mulf %299, %530 : vector<8x128xf32>
    %532 = arith.addf %529, %531 : vector<8x128xf32>
    %533 = vector.broadcast %61 : f32 to vector<8x128xf32>
    %534 = arith.mulf %300, %533 : vector<8x128xf32>
    %535 = arith.addf %532, %534 : vector<8x128xf32>
    %536 = vector.broadcast %62 : f32 to vector<8x128xf32>
    %537 = arith.mulf %301, %536 : vector<8x128xf32>
    %538 = arith.addf %535, %537 : vector<8x128xf32>
    %539 = vector.broadcast %232 : f32 to vector<8x128xf32>
    %540 = arith.addf %538, %539 : vector<8x128xf32>
    %cst_492 = arith.constant 0.000000e+00 : f32
    %541 = vector.broadcast %cst_492 : f32 to vector<8x128xf32>
    %542 = arith.maximumf %540, %541 : vector<8x128xf32>
    %543 = vector.broadcast %264 : f32 to vector<8x128xf32>
    %544 = arith.mulf %542, %543 : vector<8x128xf32>
    %545 = arith.addf %518, %544 : vector<8x128xf32>
    %546 = vector.broadcast %63 : f32 to vector<8x128xf32>
    %547 = arith.mulf %293, %546 : vector<8x128xf32>
    %548 = vector.broadcast %64 : f32 to vector<8x128xf32>
    %549 = arith.mulf %296, %548 : vector<8x128xf32>
    %550 = arith.addf %547, %549 : vector<8x128xf32>
    %551 = vector.broadcast %65 : f32 to vector<8x128xf32>
    %552 = arith.mulf %297, %551 : vector<8x128xf32>
    %553 = arith.addf %550, %552 : vector<8x128xf32>
    %554 = vector.broadcast %66 : f32 to vector<8x128xf32>
    %555 = arith.mulf %298, %554 : vector<8x128xf32>
    %556 = arith.addf %553, %555 : vector<8x128xf32>
    %557 = vector.broadcast %67 : f32 to vector<8x128xf32>
    %558 = arith.mulf %299, %557 : vector<8x128xf32>
    %559 = arith.addf %556, %558 : vector<8x128xf32>
    %560 = vector.broadcast %68 : f32 to vector<8x128xf32>
    %561 = arith.mulf %300, %560 : vector<8x128xf32>
    %562 = arith.addf %559, %561 : vector<8x128xf32>
    %563 = vector.broadcast %69 : f32 to vector<8x128xf32>
    %564 = arith.mulf %301, %563 : vector<8x128xf32>
    %565 = arith.addf %562, %564 : vector<8x128xf32>
    %566 = vector.broadcast %233 : f32 to vector<8x128xf32>
    %567 = arith.addf %565, %566 : vector<8x128xf32>
    %cst_493 = arith.constant 0.000000e+00 : f32
    %568 = vector.broadcast %cst_493 : f32 to vector<8x128xf32>
    %569 = arith.maximumf %567, %568 : vector<8x128xf32>
    %570 = vector.broadcast %265 : f32 to vector<8x128xf32>
    %571 = arith.mulf %569, %570 : vector<8x128xf32>
    %572 = arith.addf %545, %571 : vector<8x128xf32>
    %573 = vector.broadcast %70 : f32 to vector<8x128xf32>
    %574 = arith.mulf %293, %573 : vector<8x128xf32>
    %575 = vector.broadcast %71 : f32 to vector<8x128xf32>
    %576 = arith.mulf %296, %575 : vector<8x128xf32>
    %577 = arith.addf %574, %576 : vector<8x128xf32>
    %578 = vector.broadcast %72 : f32 to vector<8x128xf32>
    %579 = arith.mulf %297, %578 : vector<8x128xf32>
    %580 = arith.addf %577, %579 : vector<8x128xf32>
    %581 = vector.broadcast %73 : f32 to vector<8x128xf32>
    %582 = arith.mulf %298, %581 : vector<8x128xf32>
    %583 = arith.addf %580, %582 : vector<8x128xf32>
    %584 = vector.broadcast %74 : f32 to vector<8x128xf32>
    %585 = arith.mulf %299, %584 : vector<8x128xf32>
    %586 = arith.addf %583, %585 : vector<8x128xf32>
    %587 = vector.broadcast %75 : f32 to vector<8x128xf32>
    %588 = arith.mulf %300, %587 : vector<8x128xf32>
    %589 = arith.addf %586, %588 : vector<8x128xf32>
    %590 = vector.broadcast %76 : f32 to vector<8x128xf32>
    %591 = arith.mulf %301, %590 : vector<8x128xf32>
    %592 = arith.addf %589, %591 : vector<8x128xf32>
    %593 = vector.broadcast %234 : f32 to vector<8x128xf32>
    %594 = arith.addf %592, %593 : vector<8x128xf32>
    %cst_494 = arith.constant 0.000000e+00 : f32
    %595 = vector.broadcast %cst_494 : f32 to vector<8x128xf32>
    %596 = arith.maximumf %594, %595 : vector<8x128xf32>
    %597 = vector.broadcast %266 : f32 to vector<8x128xf32>
    %598 = arith.mulf %596, %597 : vector<8x128xf32>
    %599 = arith.addf %572, %598 : vector<8x128xf32>
    %600 = vector.broadcast %77 : f32 to vector<8x128xf32>
    %601 = arith.mulf %293, %600 : vector<8x128xf32>
    %602 = vector.broadcast %78 : f32 to vector<8x128xf32>
    %603 = arith.mulf %296, %602 : vector<8x128xf32>
    %604 = arith.addf %601, %603 : vector<8x128xf32>
    %605 = vector.broadcast %79 : f32 to vector<8x128xf32>
    %606 = arith.mulf %297, %605 : vector<8x128xf32>
    %607 = arith.addf %604, %606 : vector<8x128xf32>
    %608 = vector.broadcast %80 : f32 to vector<8x128xf32>
    %609 = arith.mulf %298, %608 : vector<8x128xf32>
    %610 = arith.addf %607, %609 : vector<8x128xf32>
    %611 = vector.broadcast %81 : f32 to vector<8x128xf32>
    %612 = arith.mulf %299, %611 : vector<8x128xf32>
    %613 = arith.addf %610, %612 : vector<8x128xf32>
    %614 = vector.broadcast %82 : f32 to vector<8x128xf32>
    %615 = arith.mulf %300, %614 : vector<8x128xf32>
    %616 = arith.addf %613, %615 : vector<8x128xf32>
    %617 = vector.broadcast %83 : f32 to vector<8x128xf32>
    %618 = arith.mulf %301, %617 : vector<8x128xf32>
    %619 = arith.addf %616, %618 : vector<8x128xf32>
    %620 = vector.broadcast %235 : f32 to vector<8x128xf32>
    %621 = arith.addf %619, %620 : vector<8x128xf32>
    %cst_495 = arith.constant 0.000000e+00 : f32
    %622 = vector.broadcast %cst_495 : f32 to vector<8x128xf32>
    %623 = arith.maximumf %621, %622 : vector<8x128xf32>
    %624 = vector.broadcast %267 : f32 to vector<8x128xf32>
    %625 = arith.mulf %623, %624 : vector<8x128xf32>
    %626 = arith.addf %599, %625 : vector<8x128xf32>
    %627 = vector.broadcast %84 : f32 to vector<8x128xf32>
    %628 = arith.mulf %293, %627 : vector<8x128xf32>
    %629 = vector.broadcast %85 : f32 to vector<8x128xf32>
    %630 = arith.mulf %296, %629 : vector<8x128xf32>
    %631 = arith.addf %628, %630 : vector<8x128xf32>
    %632 = vector.broadcast %86 : f32 to vector<8x128xf32>
    %633 = arith.mulf %297, %632 : vector<8x128xf32>
    %634 = arith.addf %631, %633 : vector<8x128xf32>
    %635 = vector.broadcast %87 : f32 to vector<8x128xf32>
    %636 = arith.mulf %298, %635 : vector<8x128xf32>
    %637 = arith.addf %634, %636 : vector<8x128xf32>
    %638 = vector.broadcast %88 : f32 to vector<8x128xf32>
    %639 = arith.mulf %299, %638 : vector<8x128xf32>
    %640 = arith.addf %637, %639 : vector<8x128xf32>
    %641 = vector.broadcast %89 : f32 to vector<8x128xf32>
    %642 = arith.mulf %300, %641 : vector<8x128xf32>
    %643 = arith.addf %640, %642 : vector<8x128xf32>
    %644 = vector.broadcast %90 : f32 to vector<8x128xf32>
    %645 = arith.mulf %301, %644 : vector<8x128xf32>
    %646 = arith.addf %643, %645 : vector<8x128xf32>
    %647 = vector.broadcast %236 : f32 to vector<8x128xf32>
    %648 = arith.addf %646, %647 : vector<8x128xf32>
    %cst_496 = arith.constant 0.000000e+00 : f32
    %649 = vector.broadcast %cst_496 : f32 to vector<8x128xf32>
    %650 = arith.maximumf %648, %649 : vector<8x128xf32>
    %651 = vector.broadcast %268 : f32 to vector<8x128xf32>
    %652 = arith.mulf %650, %651 : vector<8x128xf32>
    %653 = arith.addf %626, %652 : vector<8x128xf32>
    %654 = vector.broadcast %91 : f32 to vector<8x128xf32>
    %655 = arith.mulf %293, %654 : vector<8x128xf32>
    %656 = vector.broadcast %92 : f32 to vector<8x128xf32>
    %657 = arith.mulf %296, %656 : vector<8x128xf32>
    %658 = arith.addf %655, %657 : vector<8x128xf32>
    %659 = vector.broadcast %93 : f32 to vector<8x128xf32>
    %660 = arith.mulf %297, %659 : vector<8x128xf32>
    %661 = arith.addf %658, %660 : vector<8x128xf32>
    %662 = vector.broadcast %94 : f32 to vector<8x128xf32>
    %663 = arith.mulf %298, %662 : vector<8x128xf32>
    %664 = arith.addf %661, %663 : vector<8x128xf32>
    %665 = vector.broadcast %95 : f32 to vector<8x128xf32>
    %666 = arith.mulf %299, %665 : vector<8x128xf32>
    %667 = arith.addf %664, %666 : vector<8x128xf32>
    %668 = vector.broadcast %96 : f32 to vector<8x128xf32>
    %669 = arith.mulf %300, %668 : vector<8x128xf32>
    %670 = arith.addf %667, %669 : vector<8x128xf32>
    %671 = vector.broadcast %97 : f32 to vector<8x128xf32>
    %672 = arith.mulf %301, %671 : vector<8x128xf32>
    %673 = arith.addf %670, %672 : vector<8x128xf32>
    %674 = vector.broadcast %237 : f32 to vector<8x128xf32>
    %675 = arith.addf %673, %674 : vector<8x128xf32>
    %cst_497 = arith.constant 0.000000e+00 : f32
    %676 = vector.broadcast %cst_497 : f32 to vector<8x128xf32>
    %677 = arith.maximumf %675, %676 : vector<8x128xf32>
    %678 = vector.broadcast %269 : f32 to vector<8x128xf32>
    %679 = arith.mulf %677, %678 : vector<8x128xf32>
    %680 = arith.addf %653, %679 : vector<8x128xf32>
    %681 = vector.broadcast %98 : f32 to vector<8x128xf32>
    %682 = arith.mulf %293, %681 : vector<8x128xf32>
    %683 = vector.broadcast %99 : f32 to vector<8x128xf32>
    %684 = arith.mulf %296, %683 : vector<8x128xf32>
    %685 = arith.addf %682, %684 : vector<8x128xf32>
    %686 = vector.broadcast %100 : f32 to vector<8x128xf32>
    %687 = arith.mulf %297, %686 : vector<8x128xf32>
    %688 = arith.addf %685, %687 : vector<8x128xf32>
    %689 = vector.broadcast %101 : f32 to vector<8x128xf32>
    %690 = arith.mulf %298, %689 : vector<8x128xf32>
    %691 = arith.addf %688, %690 : vector<8x128xf32>
    %692 = vector.broadcast %102 : f32 to vector<8x128xf32>
    %693 = arith.mulf %299, %692 : vector<8x128xf32>
    %694 = arith.addf %691, %693 : vector<8x128xf32>
    %695 = vector.broadcast %103 : f32 to vector<8x128xf32>
    %696 = arith.mulf %300, %695 : vector<8x128xf32>
    %697 = arith.addf %694, %696 : vector<8x128xf32>
    %698 = vector.broadcast %104 : f32 to vector<8x128xf32>
    %699 = arith.mulf %301, %698 : vector<8x128xf32>
    %700 = arith.addf %697, %699 : vector<8x128xf32>
    %701 = vector.broadcast %238 : f32 to vector<8x128xf32>
    %702 = arith.addf %700, %701 : vector<8x128xf32>
    %cst_498 = arith.constant 0.000000e+00 : f32
    %703 = vector.broadcast %cst_498 : f32 to vector<8x128xf32>
    %704 = arith.maximumf %702, %703 : vector<8x128xf32>
    %705 = vector.broadcast %270 : f32 to vector<8x128xf32>
    %706 = arith.mulf %704, %705 : vector<8x128xf32>
    %707 = arith.addf %680, %706 : vector<8x128xf32>
    %708 = vector.broadcast %105 : f32 to vector<8x128xf32>
    %709 = arith.mulf %293, %708 : vector<8x128xf32>
    %710 = vector.broadcast %106 : f32 to vector<8x128xf32>
    %711 = arith.mulf %296, %710 : vector<8x128xf32>
    %712 = arith.addf %709, %711 : vector<8x128xf32>
    %713 = vector.broadcast %107 : f32 to vector<8x128xf32>
    %714 = arith.mulf %297, %713 : vector<8x128xf32>
    %715 = arith.addf %712, %714 : vector<8x128xf32>
    %716 = vector.broadcast %108 : f32 to vector<8x128xf32>
    %717 = arith.mulf %298, %716 : vector<8x128xf32>
    %718 = arith.addf %715, %717 : vector<8x128xf32>
    %719 = vector.broadcast %109 : f32 to vector<8x128xf32>
    %720 = arith.mulf %299, %719 : vector<8x128xf32>
    %721 = arith.addf %718, %720 : vector<8x128xf32>
    %722 = vector.broadcast %110 : f32 to vector<8x128xf32>
    %723 = arith.mulf %300, %722 : vector<8x128xf32>
    %724 = arith.addf %721, %723 : vector<8x128xf32>
    %725 = vector.broadcast %111 : f32 to vector<8x128xf32>
    %726 = arith.mulf %301, %725 : vector<8x128xf32>
    %727 = arith.addf %724, %726 : vector<8x128xf32>
    %728 = vector.broadcast %239 : f32 to vector<8x128xf32>
    %729 = arith.addf %727, %728 : vector<8x128xf32>
    %cst_499 = arith.constant 0.000000e+00 : f32
    %730 = vector.broadcast %cst_499 : f32 to vector<8x128xf32>
    %731 = arith.maximumf %729, %730 : vector<8x128xf32>
    %732 = vector.broadcast %271 : f32 to vector<8x128xf32>
    %733 = arith.mulf %731, %732 : vector<8x128xf32>
    %734 = arith.addf %707, %733 : vector<8x128xf32>
    %735 = vector.broadcast %112 : f32 to vector<8x128xf32>
    %736 = arith.mulf %293, %735 : vector<8x128xf32>
    %737 = vector.broadcast %113 : f32 to vector<8x128xf32>
    %738 = arith.mulf %296, %737 : vector<8x128xf32>
    %739 = arith.addf %736, %738 : vector<8x128xf32>
    %740 = vector.broadcast %114 : f32 to vector<8x128xf32>
    %741 = arith.mulf %297, %740 : vector<8x128xf32>
    %742 = arith.addf %739, %741 : vector<8x128xf32>
    %743 = vector.broadcast %115 : f32 to vector<8x128xf32>
    %744 = arith.mulf %298, %743 : vector<8x128xf32>
    %745 = arith.addf %742, %744 : vector<8x128xf32>
    %746 = vector.broadcast %116 : f32 to vector<8x128xf32>
    %747 = arith.mulf %299, %746 : vector<8x128xf32>
    %748 = arith.addf %745, %747 : vector<8x128xf32>
    %749 = vector.broadcast %117 : f32 to vector<8x128xf32>
    %750 = arith.mulf %300, %749 : vector<8x128xf32>
    %751 = arith.addf %748, %750 : vector<8x128xf32>
    %752 = vector.broadcast %118 : f32 to vector<8x128xf32>
    %753 = arith.mulf %301, %752 : vector<8x128xf32>
    %754 = arith.addf %751, %753 : vector<8x128xf32>
    %755 = vector.broadcast %240 : f32 to vector<8x128xf32>
    %756 = arith.addf %754, %755 : vector<8x128xf32>
    %cst_500 = arith.constant 0.000000e+00 : f32
    %757 = vector.broadcast %cst_500 : f32 to vector<8x128xf32>
    %758 = arith.maximumf %756, %757 : vector<8x128xf32>
    %759 = vector.broadcast %272 : f32 to vector<8x128xf32>
    %760 = arith.mulf %758, %759 : vector<8x128xf32>
    %761 = arith.addf %734, %760 : vector<8x128xf32>
    %762 = vector.broadcast %119 : f32 to vector<8x128xf32>
    %763 = arith.mulf %293, %762 : vector<8x128xf32>
    %764 = vector.broadcast %120 : f32 to vector<8x128xf32>
    %765 = arith.mulf %296, %764 : vector<8x128xf32>
    %766 = arith.addf %763, %765 : vector<8x128xf32>
    %767 = vector.broadcast %121 : f32 to vector<8x128xf32>
    %768 = arith.mulf %297, %767 : vector<8x128xf32>
    %769 = arith.addf %766, %768 : vector<8x128xf32>
    %770 = vector.broadcast %122 : f32 to vector<8x128xf32>
    %771 = arith.mulf %298, %770 : vector<8x128xf32>
    %772 = arith.addf %769, %771 : vector<8x128xf32>
    %773 = vector.broadcast %123 : f32 to vector<8x128xf32>
    %774 = arith.mulf %299, %773 : vector<8x128xf32>
    %775 = arith.addf %772, %774 : vector<8x128xf32>
    %776 = vector.broadcast %124 : f32 to vector<8x128xf32>
    %777 = arith.mulf %300, %776 : vector<8x128xf32>
    %778 = arith.addf %775, %777 : vector<8x128xf32>
    %779 = vector.broadcast %125 : f32 to vector<8x128xf32>
    %780 = arith.mulf %301, %779 : vector<8x128xf32>
    %781 = arith.addf %778, %780 : vector<8x128xf32>
    %782 = vector.broadcast %241 : f32 to vector<8x128xf32>
    %783 = arith.addf %781, %782 : vector<8x128xf32>
    %cst_501 = arith.constant 0.000000e+00 : f32
    %784 = vector.broadcast %cst_501 : f32 to vector<8x128xf32>
    %785 = arith.maximumf %783, %784 : vector<8x128xf32>
    %786 = vector.broadcast %273 : f32 to vector<8x128xf32>
    %787 = arith.mulf %785, %786 : vector<8x128xf32>
    %788 = arith.addf %761, %787 : vector<8x128xf32>
    %789 = vector.broadcast %126 : f32 to vector<8x128xf32>
    %790 = arith.mulf %293, %789 : vector<8x128xf32>
    %791 = vector.broadcast %127 : f32 to vector<8x128xf32>
    %792 = arith.mulf %296, %791 : vector<8x128xf32>
    %793 = arith.addf %790, %792 : vector<8x128xf32>
    %794 = vector.broadcast %128 : f32 to vector<8x128xf32>
    %795 = arith.mulf %297, %794 : vector<8x128xf32>
    %796 = arith.addf %793, %795 : vector<8x128xf32>
    %797 = vector.broadcast %129 : f32 to vector<8x128xf32>
    %798 = arith.mulf %298, %797 : vector<8x128xf32>
    %799 = arith.addf %796, %798 : vector<8x128xf32>
    %800 = vector.broadcast %130 : f32 to vector<8x128xf32>
    %801 = arith.mulf %299, %800 : vector<8x128xf32>
    %802 = arith.addf %799, %801 : vector<8x128xf32>
    %803 = vector.broadcast %131 : f32 to vector<8x128xf32>
    %804 = arith.mulf %300, %803 : vector<8x128xf32>
    %805 = arith.addf %802, %804 : vector<8x128xf32>
    %806 = vector.broadcast %132 : f32 to vector<8x128xf32>
    %807 = arith.mulf %301, %806 : vector<8x128xf32>
    %808 = arith.addf %805, %807 : vector<8x128xf32>
    %809 = vector.broadcast %242 : f32 to vector<8x128xf32>
    %810 = arith.addf %808, %809 : vector<8x128xf32>
    %cst_502 = arith.constant 0.000000e+00 : f32
    %811 = vector.broadcast %cst_502 : f32 to vector<8x128xf32>
    %812 = arith.maximumf %810, %811 : vector<8x128xf32>
    %813 = vector.broadcast %274 : f32 to vector<8x128xf32>
    %814 = arith.mulf %812, %813 : vector<8x128xf32>
    %815 = arith.addf %788, %814 : vector<8x128xf32>
    %816 = vector.broadcast %133 : f32 to vector<8x128xf32>
    %817 = arith.mulf %293, %816 : vector<8x128xf32>
    %818 = vector.broadcast %134 : f32 to vector<8x128xf32>
    %819 = arith.mulf %296, %818 : vector<8x128xf32>
    %820 = arith.addf %817, %819 : vector<8x128xf32>
    %821 = vector.broadcast %135 : f32 to vector<8x128xf32>
    %822 = arith.mulf %297, %821 : vector<8x128xf32>
    %823 = arith.addf %820, %822 : vector<8x128xf32>
    %824 = vector.broadcast %136 : f32 to vector<8x128xf32>
    %825 = arith.mulf %298, %824 : vector<8x128xf32>
    %826 = arith.addf %823, %825 : vector<8x128xf32>
    %827 = vector.broadcast %137 : f32 to vector<8x128xf32>
    %828 = arith.mulf %299, %827 : vector<8x128xf32>
    %829 = arith.addf %826, %828 : vector<8x128xf32>
    %830 = vector.broadcast %138 : f32 to vector<8x128xf32>
    %831 = arith.mulf %300, %830 : vector<8x128xf32>
    %832 = arith.addf %829, %831 : vector<8x128xf32>
    %833 = vector.broadcast %139 : f32 to vector<8x128xf32>
    %834 = arith.mulf %301, %833 : vector<8x128xf32>
    %835 = arith.addf %832, %834 : vector<8x128xf32>
    %836 = vector.broadcast %243 : f32 to vector<8x128xf32>
    %837 = arith.addf %835, %836 : vector<8x128xf32>
    %cst_503 = arith.constant 0.000000e+00 : f32
    %838 = vector.broadcast %cst_503 : f32 to vector<8x128xf32>
    %839 = arith.maximumf %837, %838 : vector<8x128xf32>
    %840 = vector.broadcast %275 : f32 to vector<8x128xf32>
    %841 = arith.mulf %839, %840 : vector<8x128xf32>
    %842 = arith.addf %815, %841 : vector<8x128xf32>
    %843 = vector.broadcast %140 : f32 to vector<8x128xf32>
    %844 = arith.mulf %293, %843 : vector<8x128xf32>
    %845 = vector.broadcast %141 : f32 to vector<8x128xf32>
    %846 = arith.mulf %296, %845 : vector<8x128xf32>
    %847 = arith.addf %844, %846 : vector<8x128xf32>
    %848 = vector.broadcast %142 : f32 to vector<8x128xf32>
    %849 = arith.mulf %297, %848 : vector<8x128xf32>
    %850 = arith.addf %847, %849 : vector<8x128xf32>
    %851 = vector.broadcast %143 : f32 to vector<8x128xf32>
    %852 = arith.mulf %298, %851 : vector<8x128xf32>
    %853 = arith.addf %850, %852 : vector<8x128xf32>
    %854 = vector.broadcast %144 : f32 to vector<8x128xf32>
    %855 = arith.mulf %299, %854 : vector<8x128xf32>
    %856 = arith.addf %853, %855 : vector<8x128xf32>
    %857 = vector.broadcast %145 : f32 to vector<8x128xf32>
    %858 = arith.mulf %300, %857 : vector<8x128xf32>
    %859 = arith.addf %856, %858 : vector<8x128xf32>
    %860 = vector.broadcast %146 : f32 to vector<8x128xf32>
    %861 = arith.mulf %301, %860 : vector<8x128xf32>
    %862 = arith.addf %859, %861 : vector<8x128xf32>
    %863 = vector.broadcast %244 : f32 to vector<8x128xf32>
    %864 = arith.addf %862, %863 : vector<8x128xf32>
    %cst_504 = arith.constant 0.000000e+00 : f32
    %865 = vector.broadcast %cst_504 : f32 to vector<8x128xf32>
    %866 = arith.maximumf %864, %865 : vector<8x128xf32>
    %867 = vector.broadcast %276 : f32 to vector<8x128xf32>
    %868 = arith.mulf %866, %867 : vector<8x128xf32>
    %869 = arith.addf %842, %868 : vector<8x128xf32>
    %870 = vector.broadcast %147 : f32 to vector<8x128xf32>
    %871 = arith.mulf %293, %870 : vector<8x128xf32>
    %872 = vector.broadcast %148 : f32 to vector<8x128xf32>
    %873 = arith.mulf %296, %872 : vector<8x128xf32>
    %874 = arith.addf %871, %873 : vector<8x128xf32>
    %875 = vector.broadcast %149 : f32 to vector<8x128xf32>
    %876 = arith.mulf %297, %875 : vector<8x128xf32>
    %877 = arith.addf %874, %876 : vector<8x128xf32>
    %878 = vector.broadcast %150 : f32 to vector<8x128xf32>
    %879 = arith.mulf %298, %878 : vector<8x128xf32>
    %880 = arith.addf %877, %879 : vector<8x128xf32>
    %881 = vector.broadcast %151 : f32 to vector<8x128xf32>
    %882 = arith.mulf %299, %881 : vector<8x128xf32>
    %883 = arith.addf %880, %882 : vector<8x128xf32>
    %884 = vector.broadcast %152 : f32 to vector<8x128xf32>
    %885 = arith.mulf %300, %884 : vector<8x128xf32>
    %886 = arith.addf %883, %885 : vector<8x128xf32>
    %887 = vector.broadcast %153 : f32 to vector<8x128xf32>
    %888 = arith.mulf %301, %887 : vector<8x128xf32>
    %889 = arith.addf %886, %888 : vector<8x128xf32>
    %890 = vector.broadcast %245 : f32 to vector<8x128xf32>
    %891 = arith.addf %889, %890 : vector<8x128xf32>
    %cst_505 = arith.constant 0.000000e+00 : f32
    %892 = vector.broadcast %cst_505 : f32 to vector<8x128xf32>
    %893 = arith.maximumf %891, %892 : vector<8x128xf32>
    %894 = vector.broadcast %277 : f32 to vector<8x128xf32>
    %895 = arith.mulf %893, %894 : vector<8x128xf32>
    %896 = arith.addf %869, %895 : vector<8x128xf32>
    %897 = vector.broadcast %154 : f32 to vector<8x128xf32>
    %898 = arith.mulf %293, %897 : vector<8x128xf32>
    %899 = vector.broadcast %155 : f32 to vector<8x128xf32>
    %900 = arith.mulf %296, %899 : vector<8x128xf32>
    %901 = arith.addf %898, %900 : vector<8x128xf32>
    %902 = vector.broadcast %156 : f32 to vector<8x128xf32>
    %903 = arith.mulf %297, %902 : vector<8x128xf32>
    %904 = arith.addf %901, %903 : vector<8x128xf32>
    %905 = vector.broadcast %157 : f32 to vector<8x128xf32>
    %906 = arith.mulf %298, %905 : vector<8x128xf32>
    %907 = arith.addf %904, %906 : vector<8x128xf32>
    %908 = vector.broadcast %158 : f32 to vector<8x128xf32>
    %909 = arith.mulf %299, %908 : vector<8x128xf32>
    %910 = arith.addf %907, %909 : vector<8x128xf32>
    %911 = vector.broadcast %159 : f32 to vector<8x128xf32>
    %912 = arith.mulf %300, %911 : vector<8x128xf32>
    %913 = arith.addf %910, %912 : vector<8x128xf32>
    %914 = vector.broadcast %160 : f32 to vector<8x128xf32>
    %915 = arith.mulf %301, %914 : vector<8x128xf32>
    %916 = arith.addf %913, %915 : vector<8x128xf32>
    %917 = vector.broadcast %246 : f32 to vector<8x128xf32>
    %918 = arith.addf %916, %917 : vector<8x128xf32>
    %cst_506 = arith.constant 0.000000e+00 : f32
    %919 = vector.broadcast %cst_506 : f32 to vector<8x128xf32>
    %920 = arith.maximumf %918, %919 : vector<8x128xf32>
    %921 = vector.broadcast %278 : f32 to vector<8x128xf32>
    %922 = arith.mulf %920, %921 : vector<8x128xf32>
    %923 = arith.addf %896, %922 : vector<8x128xf32>
    %924 = vector.broadcast %161 : f32 to vector<8x128xf32>
    %925 = arith.mulf %293, %924 : vector<8x128xf32>
    %926 = vector.broadcast %162 : f32 to vector<8x128xf32>
    %927 = arith.mulf %296, %926 : vector<8x128xf32>
    %928 = arith.addf %925, %927 : vector<8x128xf32>
    %929 = vector.broadcast %163 : f32 to vector<8x128xf32>
    %930 = arith.mulf %297, %929 : vector<8x128xf32>
    %931 = arith.addf %928, %930 : vector<8x128xf32>
    %932 = vector.broadcast %164 : f32 to vector<8x128xf32>
    %933 = arith.mulf %298, %932 : vector<8x128xf32>
    %934 = arith.addf %931, %933 : vector<8x128xf32>
    %935 = vector.broadcast %165 : f32 to vector<8x128xf32>
    %936 = arith.mulf %299, %935 : vector<8x128xf32>
    %937 = arith.addf %934, %936 : vector<8x128xf32>
    %938 = vector.broadcast %166 : f32 to vector<8x128xf32>
    %939 = arith.mulf %300, %938 : vector<8x128xf32>
    %940 = arith.addf %937, %939 : vector<8x128xf32>
    %941 = vector.broadcast %167 : f32 to vector<8x128xf32>
    %942 = arith.mulf %301, %941 : vector<8x128xf32>
    %943 = arith.addf %940, %942 : vector<8x128xf32>
    %944 = vector.broadcast %247 : f32 to vector<8x128xf32>
    %945 = arith.addf %943, %944 : vector<8x128xf32>
    %cst_507 = arith.constant 0.000000e+00 : f32
    %946 = vector.broadcast %cst_507 : f32 to vector<8x128xf32>
    %947 = arith.maximumf %945, %946 : vector<8x128xf32>
    %948 = vector.broadcast %279 : f32 to vector<8x128xf32>
    %949 = arith.mulf %947, %948 : vector<8x128xf32>
    %950 = arith.addf %923, %949 : vector<8x128xf32>
    %951 = vector.broadcast %168 : f32 to vector<8x128xf32>
    %952 = arith.mulf %293, %951 : vector<8x128xf32>
    %953 = vector.broadcast %169 : f32 to vector<8x128xf32>
    %954 = arith.mulf %296, %953 : vector<8x128xf32>
    %955 = arith.addf %952, %954 : vector<8x128xf32>
    %956 = vector.broadcast %170 : f32 to vector<8x128xf32>
    %957 = arith.mulf %297, %956 : vector<8x128xf32>
    %958 = arith.addf %955, %957 : vector<8x128xf32>
    %959 = vector.broadcast %171 : f32 to vector<8x128xf32>
    %960 = arith.mulf %298, %959 : vector<8x128xf32>
    %961 = arith.addf %958, %960 : vector<8x128xf32>
    %962 = vector.broadcast %172 : f32 to vector<8x128xf32>
    %963 = arith.mulf %299, %962 : vector<8x128xf32>
    %964 = arith.addf %961, %963 : vector<8x128xf32>
    %965 = vector.broadcast %173 : f32 to vector<8x128xf32>
    %966 = arith.mulf %300, %965 : vector<8x128xf32>
    %967 = arith.addf %964, %966 : vector<8x128xf32>
    %968 = vector.broadcast %174 : f32 to vector<8x128xf32>
    %969 = arith.mulf %301, %968 : vector<8x128xf32>
    %970 = arith.addf %967, %969 : vector<8x128xf32>
    %971 = vector.broadcast %248 : f32 to vector<8x128xf32>
    %972 = arith.addf %970, %971 : vector<8x128xf32>
    %cst_508 = arith.constant 0.000000e+00 : f32
    %973 = vector.broadcast %cst_508 : f32 to vector<8x128xf32>
    %974 = arith.maximumf %972, %973 : vector<8x128xf32>
    %975 = vector.broadcast %280 : f32 to vector<8x128xf32>
    %976 = arith.mulf %974, %975 : vector<8x128xf32>
    %977 = arith.addf %950, %976 : vector<8x128xf32>
    %978 = vector.broadcast %175 : f32 to vector<8x128xf32>
    %979 = arith.mulf %293, %978 : vector<8x128xf32>
    %980 = vector.broadcast %176 : f32 to vector<8x128xf32>
    %981 = arith.mulf %296, %980 : vector<8x128xf32>
    %982 = arith.addf %979, %981 : vector<8x128xf32>
    %983 = vector.broadcast %177 : f32 to vector<8x128xf32>
    %984 = arith.mulf %297, %983 : vector<8x128xf32>
    %985 = arith.addf %982, %984 : vector<8x128xf32>
    %986 = vector.broadcast %178 : f32 to vector<8x128xf32>
    %987 = arith.mulf %298, %986 : vector<8x128xf32>
    %988 = arith.addf %985, %987 : vector<8x128xf32>
    %989 = vector.broadcast %179 : f32 to vector<8x128xf32>
    %990 = arith.mulf %299, %989 : vector<8x128xf32>
    %991 = arith.addf %988, %990 : vector<8x128xf32>
    %992 = vector.broadcast %180 : f32 to vector<8x128xf32>
    %993 = arith.mulf %300, %992 : vector<8x128xf32>
    %994 = arith.addf %991, %993 : vector<8x128xf32>
    %995 = vector.broadcast %181 : f32 to vector<8x128xf32>
    %996 = arith.mulf %301, %995 : vector<8x128xf32>
    %997 = arith.addf %994, %996 : vector<8x128xf32>
    %998 = vector.broadcast %249 : f32 to vector<8x128xf32>
    %999 = arith.addf %997, %998 : vector<8x128xf32>
    %cst_509 = arith.constant 0.000000e+00 : f32
    %1000 = vector.broadcast %cst_509 : f32 to vector<8x128xf32>
    %1001 = arith.maximumf %999, %1000 : vector<8x128xf32>
    %1002 = vector.broadcast %281 : f32 to vector<8x128xf32>
    %1003 = arith.mulf %1001, %1002 : vector<8x128xf32>
    %1004 = arith.addf %977, %1003 : vector<8x128xf32>
    %1005 = vector.broadcast %182 : f32 to vector<8x128xf32>
    %1006 = arith.mulf %293, %1005 : vector<8x128xf32>
    %1007 = vector.broadcast %183 : f32 to vector<8x128xf32>
    %1008 = arith.mulf %296, %1007 : vector<8x128xf32>
    %1009 = arith.addf %1006, %1008 : vector<8x128xf32>
    %1010 = vector.broadcast %184 : f32 to vector<8x128xf32>
    %1011 = arith.mulf %297, %1010 : vector<8x128xf32>
    %1012 = arith.addf %1009, %1011 : vector<8x128xf32>
    %1013 = vector.broadcast %185 : f32 to vector<8x128xf32>
    %1014 = arith.mulf %298, %1013 : vector<8x128xf32>
    %1015 = arith.addf %1012, %1014 : vector<8x128xf32>
    %1016 = vector.broadcast %186 : f32 to vector<8x128xf32>
    %1017 = arith.mulf %299, %1016 : vector<8x128xf32>
    %1018 = arith.addf %1015, %1017 : vector<8x128xf32>
    %1019 = vector.broadcast %187 : f32 to vector<8x128xf32>
    %1020 = arith.mulf %300, %1019 : vector<8x128xf32>
    %1021 = arith.addf %1018, %1020 : vector<8x128xf32>
    %1022 = vector.broadcast %188 : f32 to vector<8x128xf32>
    %1023 = arith.mulf %301, %1022 : vector<8x128xf32>
    %1024 = arith.addf %1021, %1023 : vector<8x128xf32>
    %1025 = vector.broadcast %250 : f32 to vector<8x128xf32>
    %1026 = arith.addf %1024, %1025 : vector<8x128xf32>
    %cst_510 = arith.constant 0.000000e+00 : f32
    %1027 = vector.broadcast %cst_510 : f32 to vector<8x128xf32>
    %1028 = arith.maximumf %1026, %1027 : vector<8x128xf32>
    %1029 = vector.broadcast %282 : f32 to vector<8x128xf32>
    %1030 = arith.mulf %1028, %1029 : vector<8x128xf32>
    %1031 = arith.addf %1004, %1030 : vector<8x128xf32>
    %1032 = vector.broadcast %189 : f32 to vector<8x128xf32>
    %1033 = arith.mulf %293, %1032 : vector<8x128xf32>
    %1034 = vector.broadcast %190 : f32 to vector<8x128xf32>
    %1035 = arith.mulf %296, %1034 : vector<8x128xf32>
    %1036 = arith.addf %1033, %1035 : vector<8x128xf32>
    %1037 = vector.broadcast %191 : f32 to vector<8x128xf32>
    %1038 = arith.mulf %297, %1037 : vector<8x128xf32>
    %1039 = arith.addf %1036, %1038 : vector<8x128xf32>
    %1040 = vector.broadcast %192 : f32 to vector<8x128xf32>
    %1041 = arith.mulf %298, %1040 : vector<8x128xf32>
    %1042 = arith.addf %1039, %1041 : vector<8x128xf32>
    %1043 = vector.broadcast %193 : f32 to vector<8x128xf32>
    %1044 = arith.mulf %299, %1043 : vector<8x128xf32>
    %1045 = arith.addf %1042, %1044 : vector<8x128xf32>
    %1046 = vector.broadcast %194 : f32 to vector<8x128xf32>
    %1047 = arith.mulf %300, %1046 : vector<8x128xf32>
    %1048 = arith.addf %1045, %1047 : vector<8x128xf32>
    %1049 = vector.broadcast %195 : f32 to vector<8x128xf32>
    %1050 = arith.mulf %301, %1049 : vector<8x128xf32>
    %1051 = arith.addf %1048, %1050 : vector<8x128xf32>
    %1052 = vector.broadcast %251 : f32 to vector<8x128xf32>
    %1053 = arith.addf %1051, %1052 : vector<8x128xf32>
    %cst_511 = arith.constant 0.000000e+00 : f32
    %1054 = vector.broadcast %cst_511 : f32 to vector<8x128xf32>
    %1055 = arith.maximumf %1053, %1054 : vector<8x128xf32>
    %1056 = vector.broadcast %283 : f32 to vector<8x128xf32>
    %1057 = arith.mulf %1055, %1056 : vector<8x128xf32>
    %1058 = arith.addf %1031, %1057 : vector<8x128xf32>
    %1059 = vector.broadcast %196 : f32 to vector<8x128xf32>
    %1060 = arith.mulf %293, %1059 : vector<8x128xf32>
    %1061 = vector.broadcast %197 : f32 to vector<8x128xf32>
    %1062 = arith.mulf %296, %1061 : vector<8x128xf32>
    %1063 = arith.addf %1060, %1062 : vector<8x128xf32>
    %1064 = vector.broadcast %198 : f32 to vector<8x128xf32>
    %1065 = arith.mulf %297, %1064 : vector<8x128xf32>
    %1066 = arith.addf %1063, %1065 : vector<8x128xf32>
    %1067 = vector.broadcast %199 : f32 to vector<8x128xf32>
    %1068 = arith.mulf %298, %1067 : vector<8x128xf32>
    %1069 = arith.addf %1066, %1068 : vector<8x128xf32>
    %1070 = vector.broadcast %200 : f32 to vector<8x128xf32>
    %1071 = arith.mulf %299, %1070 : vector<8x128xf32>
    %1072 = arith.addf %1069, %1071 : vector<8x128xf32>
    %1073 = vector.broadcast %201 : f32 to vector<8x128xf32>
    %1074 = arith.mulf %300, %1073 : vector<8x128xf32>
    %1075 = arith.addf %1072, %1074 : vector<8x128xf32>
    %1076 = vector.broadcast %202 : f32 to vector<8x128xf32>
    %1077 = arith.mulf %301, %1076 : vector<8x128xf32>
    %1078 = arith.addf %1075, %1077 : vector<8x128xf32>
    %1079 = vector.broadcast %252 : f32 to vector<8x128xf32>
    %1080 = arith.addf %1078, %1079 : vector<8x128xf32>
    %cst_512 = arith.constant 0.000000e+00 : f32
    %1081 = vector.broadcast %cst_512 : f32 to vector<8x128xf32>
    %1082 = arith.maximumf %1080, %1081 : vector<8x128xf32>
    %1083 = vector.broadcast %284 : f32 to vector<8x128xf32>
    %1084 = arith.mulf %1082, %1083 : vector<8x128xf32>
    %1085 = arith.addf %1058, %1084 : vector<8x128xf32>
    %1086 = vector.broadcast %203 : f32 to vector<8x128xf32>
    %1087 = arith.mulf %293, %1086 : vector<8x128xf32>
    %1088 = vector.broadcast %204 : f32 to vector<8x128xf32>
    %1089 = arith.mulf %296, %1088 : vector<8x128xf32>
    %1090 = arith.addf %1087, %1089 : vector<8x128xf32>
    %1091 = vector.broadcast %205 : f32 to vector<8x128xf32>
    %1092 = arith.mulf %297, %1091 : vector<8x128xf32>
    %1093 = arith.addf %1090, %1092 : vector<8x128xf32>
    %1094 = vector.broadcast %206 : f32 to vector<8x128xf32>
    %1095 = arith.mulf %298, %1094 : vector<8x128xf32>
    %1096 = arith.addf %1093, %1095 : vector<8x128xf32>
    %1097 = vector.broadcast %207 : f32 to vector<8x128xf32>
    %1098 = arith.mulf %299, %1097 : vector<8x128xf32>
    %1099 = arith.addf %1096, %1098 : vector<8x128xf32>
    %1100 = vector.broadcast %208 : f32 to vector<8x128xf32>
    %1101 = arith.mulf %300, %1100 : vector<8x128xf32>
    %1102 = arith.addf %1099, %1101 : vector<8x128xf32>
    %1103 = vector.broadcast %209 : f32 to vector<8x128xf32>
    %1104 = arith.mulf %301, %1103 : vector<8x128xf32>
    %1105 = arith.addf %1102, %1104 : vector<8x128xf32>
    %1106 = vector.broadcast %253 : f32 to vector<8x128xf32>
    %1107 = arith.addf %1105, %1106 : vector<8x128xf32>
    %cst_513 = arith.constant 0.000000e+00 : f32
    %1108 = vector.broadcast %cst_513 : f32 to vector<8x128xf32>
    %1109 = arith.maximumf %1107, %1108 : vector<8x128xf32>
    %1110 = vector.broadcast %285 : f32 to vector<8x128xf32>
    %1111 = arith.mulf %1109, %1110 : vector<8x128xf32>
    %1112 = arith.addf %1085, %1111 : vector<8x128xf32>
    %1113 = vector.broadcast %210 : f32 to vector<8x128xf32>
    %1114 = arith.mulf %293, %1113 : vector<8x128xf32>
    %1115 = vector.broadcast %211 : f32 to vector<8x128xf32>
    %1116 = arith.mulf %296, %1115 : vector<8x128xf32>
    %1117 = arith.addf %1114, %1116 : vector<8x128xf32>
    %1118 = vector.broadcast %212 : f32 to vector<8x128xf32>
    %1119 = arith.mulf %297, %1118 : vector<8x128xf32>
    %1120 = arith.addf %1117, %1119 : vector<8x128xf32>
    %1121 = vector.broadcast %213 : f32 to vector<8x128xf32>
    %1122 = arith.mulf %298, %1121 : vector<8x128xf32>
    %1123 = arith.addf %1120, %1122 : vector<8x128xf32>
    %1124 = vector.broadcast %214 : f32 to vector<8x128xf32>
    %1125 = arith.mulf %299, %1124 : vector<8x128xf32>
    %1126 = arith.addf %1123, %1125 : vector<8x128xf32>
    %1127 = vector.broadcast %215 : f32 to vector<8x128xf32>
    %1128 = arith.mulf %300, %1127 : vector<8x128xf32>
    %1129 = arith.addf %1126, %1128 : vector<8x128xf32>
    %1130 = vector.broadcast %216 : f32 to vector<8x128xf32>
    %1131 = arith.mulf %301, %1130 : vector<8x128xf32>
    %1132 = arith.addf %1129, %1131 : vector<8x128xf32>
    %1133 = vector.broadcast %254 : f32 to vector<8x128xf32>
    %1134 = arith.addf %1132, %1133 : vector<8x128xf32>
    %cst_514 = arith.constant 0.000000e+00 : f32
    %1135 = vector.broadcast %cst_514 : f32 to vector<8x128xf32>
    %1136 = arith.maximumf %1134, %1135 : vector<8x128xf32>
    %1137 = vector.broadcast %286 : f32 to vector<8x128xf32>
    %1138 = arith.mulf %1136, %1137 : vector<8x128xf32>
    %1139 = arith.addf %1112, %1138 : vector<8x128xf32>
    %1140 = vector.broadcast %217 : f32 to vector<8x128xf32>
    %1141 = arith.mulf %293, %1140 : vector<8x128xf32>
    %1142 = vector.broadcast %218 : f32 to vector<8x128xf32>
    %1143 = arith.mulf %296, %1142 : vector<8x128xf32>
    %1144 = arith.addf %1141, %1143 : vector<8x128xf32>
    %1145 = vector.broadcast %219 : f32 to vector<8x128xf32>
    %1146 = arith.mulf %297, %1145 : vector<8x128xf32>
    %1147 = arith.addf %1144, %1146 : vector<8x128xf32>
    %1148 = vector.broadcast %220 : f32 to vector<8x128xf32>
    %1149 = arith.mulf %298, %1148 : vector<8x128xf32>
    %1150 = arith.addf %1147, %1149 : vector<8x128xf32>
    %1151 = vector.broadcast %221 : f32 to vector<8x128xf32>
    %1152 = arith.mulf %299, %1151 : vector<8x128xf32>
    %1153 = arith.addf %1150, %1152 : vector<8x128xf32>
    %1154 = vector.broadcast %222 : f32 to vector<8x128xf32>
    %1155 = arith.mulf %300, %1154 : vector<8x128xf32>
    %1156 = arith.addf %1153, %1155 : vector<8x128xf32>
    %1157 = vector.broadcast %223 : f32 to vector<8x128xf32>
    %1158 = arith.mulf %301, %1157 : vector<8x128xf32>
    %1159 = arith.addf %1156, %1158 : vector<8x128xf32>
    %1160 = vector.broadcast %255 : f32 to vector<8x128xf32>
    %1161 = arith.addf %1159, %1160 : vector<8x128xf32>
    %cst_515 = arith.constant 0.000000e+00 : f32
    %1162 = vector.broadcast %cst_515 : f32 to vector<8x128xf32>
    %1163 = arith.maximumf %1161, %1162 : vector<8x128xf32>
    %1164 = vector.broadcast %287 : f32 to vector<8x128xf32>
    %1165 = arith.mulf %1163, %1164 : vector<8x128xf32>
    %1166 = arith.addf %1139, %1165 : vector<8x128xf32>
    %1167 = arith.index_cast %290 : i32 to index
    %c0_516 = arith.constant 0 : index
    %1168 = vector.load %arg2[%1167, %c0_516] : memref<8x128xi32, #tpu.memory_space<vmem>>, vector<8x128xi32>
    %c0_i32_517 = arith.constant 0 : i32
    %1169 = vector.broadcast %c0_i32_517 : i32 to vector<8x128xi32>
    %1170 = arith.cmpi ne, %1168, %1169 : vector<8x128xi32>
    %cst_518 = arith.constant 0.000000e+00 : f32
    %1171 = vector.broadcast %cst_518 : f32 to vector<8x128xf32>
    %1172 = arith.select %1170, %1171, %1166 : vector<8x128xi1>, vector<8x128xf32>
    %1173 = arith.index_cast %290 : i32 to index
    %c0_519 = arith.constant 0 : index
    %1174 = vector.load %arg7[%1173, %c0_519] : memref<8x128xf32, #tpu.memory_space<vmem>>, vector<8x128xf32>
    tpu.vector_store %arg7[%1173, %c0_519], %1172 {strides = array<i32>} : memref<8x128xf32, #tpu.memory_space<vmem>>, vector<8x128xf32>,
    %c1_i32 = arith.constant 1 : i32
    return
  }
  func.func @transform_0(%arg0: i32) -> (i32, i32, i32) {
    %c0_i32 = arith.constant 0 : i32
    %c0_i32_0 = arith.constant 0 : i32
    %c0_i32_1 = arith.constant 0 : i32
    return %c0_i32, %arg0, %c0_i32_0 : i32, i32, i32
  }
  func.func @transform_1(%arg0: i32) -> (i32, i32) {
    %c0_i32 = arith.constant 0 : i32
    %c0_i32_0 = arith.constant 0 : i32
    return %arg0, %c0_i32 : i32, i32
  }
  func.func @transform_2(%arg0: i32) -> (i32, i32) {
    %c0_i32 = arith.constant 0 : i32
    %c0_i32_0 = arith.constant 0 : i32
    %c0_i32_1 = arith.constant 0 : i32
    return %c0_i32, %c0_i32_0 : i32, i32
  }
  func.func @transform_3(%arg0: i32) -> i32 {
    %c0_i32 = arith.constant 0 : i32
    %c0_i32_0 = arith.constant 0 : i32
    return %c0_i32 : i32
  }
  func.func @transform_4(%arg0: i32) -> i32 {
    %c0_i32 = arith.constant 0 : i32
    %c0_i32_0 = arith.constant 0 : i32
    return %c0_i32 : i32
  }
  func.func @transform_5(%arg0: i32) -> i32 {
    %c0_i32 = arith.constant 0 : i32
    %c0_i32_0 = arith.constant 0 : i32
    return %c0_i32 : i32
  }
  func.func @transform_6(%arg0: i32) -> (i32, i32) {
    %c0_i32 = arith.constant 0 : i32
    %c0_i32_0 = arith.constant 0 : i32
    return %arg0, %c0_i32 : i32, i32
  }
}

</mosaic_0001>

<bundles_post_ra>
// kernel: tpu_custom_call.1
= control target key start
LH: loop header
LB: loop body
LE: loop exit
PB: predicated region body
PF: predicated region fallthrough
CT: control target
= control target key end

     0   :  { %s3884_s0 = inlined_call_operand.hbm [shape: f32[2,16,128], index: 0, kind: input, shape index: {}]   ;;  %s3885_s1 = inlined_call_operand.hbm [shape: s32[16,128], index: 1, kind: input, shape index: {}]   ;;  %s3886_s2 = inlined_call_operand.vmem [shape: f32[7,32], index: 2, kind: input, shape index: {}]   ;;  %s3887_s3 = inlined_call_operand.vmem [shape: f32[32], index: 3, kind: input, shape index: {}]   ;;  %s3888_s4 = inlined_call_operand.vmem [shape: f32[32], index: 4, kind: input, shape index: {}]   ;;  %s3889_s5 = inlined_call_operand.<no memory space> [shape: f32[1], index: 5, kind: input, shape index: {}]   ;;  %s3890_s6 = inlined_call_operand.hbm [shape: f32[16,128], index: 6, kind: output, shape index: {}]  }
   0x1   :  { %3897 = sst [smem:[#allocation19_spill]] %s3884_s0 }
   0x2   :  { %3898 = sst [smem:[#allocation20_spill]] %s3885_s1 }
   0x3   :  { %3899 = sst [smem:[#allocation21_spill]] %s3886_s2 }
   0x4   :  { %3900 = sst [smem:[#allocation22_spill]] %s3887_s3 }
   0x5   :  { %3901 = sst [smem:[#allocation23_spill]] %s3888_s4 }
   0x6   :  { %11 = sst [smem:[#allocation2]] %s3889_s5 }
   0x7   :  { %12 = vsyncpa [#allocation4], 0 }
   0x8   :  { %14 = vsyncpa [#allocation4 + $0x1], 0 }
   0x9   :  { %15 = vsyncpa [#allocation8], 0 }
   0xa   :  { %17 = vsyncpa [#allocation8 + $0x1], 0 }
   0xb   :  { %18 = vsyncpa [#allocation6], 0 }
   0xc   :  { %19 = vsyncpa [#allocation11], 0 }
   0xd   :  { %20 = vsyncpa [#allocation5], 0 }
   0xe   :  { %22 = vsyncpa [#allocation5 + $0x1], 0  ;;  %s2248_s23 = smov 0   ;;  %s2250_s24 = smov 0  }
   0xf   :  { %s2252_s25 = smov 0   ;;  %s2254_s26 = smov 0  }
  0x10 LB: > { %s2269_s5 = sadd.s32 4294967295, %s2199_s26   ;;  %s1620_s27 = sadd.s32 4294967294, %s2199_s26   ;;  %s2199_s26 = sphi %s2254_s26, %s3928_s26   ;;  %s2195_s25 = sphi %s2252_s25, %s3927_s25   ;;  %s2191_s24 = sphi %s2250_s24, %s3926_s24   ;;  %s2187_s23 = sphi %s2248_s23, %s3925_s23  }
  0x11   : > { %s2273_s28 = sadd.s32 1, %s2199_s26   ;;  %s35_s29 = sadd.s32 1, %s2195_s25 }
  0x12   : > { %s32_s30 = ssub.s32 %s2199_s26, %s2273_s28  ;;  %p42_p0 = scmp.ne.s32.totalorder %s2195_s25, %s2191_s24 }
  0x13   : > { %p33_p1 = scmp.eq.s32.totalorder %s32_s30, 0  ;;  %p43_p2 = scmp.eq.s32.totalorder %s2199_s26, 0 }
  0x14   : > { %p48_p3 = scmp.ne.s32.totalorder %s2191_s24, %s2187_s23  ;;  %p3891_p4 = scmp.eq.s32.totalorder %s2269_s5, 0 }
  0x15   : > { %s2285_s7 = scalar_select %p33_p1, %s2195_s25, %s35_s29  }
  0x16   : > { %p2287_p5 = por %p43_p2, %p42_p0  ;;  %p2293_p6 = por %p3891_p4, %p48_p3 }
  0x17   : > { %p182_p7 = scmp.eq.s32.totalorder %s2269_s5, 1  ;;  %p188_p8 = scmp.eq.s32.totalorder %s1620_s27, 1 }
  0x18   : > { %s3903_s9 = scalar_select %p2293_p6, 1, 0 }
  0x19   : > { %p1621_p9 = scmp.ge.s32.totalorder %s2199_s26, 1  ;;  %p195_p10 = scmp.lt.s32.totalorder %s2199_s26, 3 }
  0x1a   : > { %p2300_p11 = por %p182_p7, %p42_p0  ;;  %p2304_p12 = por %p188_p8, %p48_p3 }
  0x1b   : > { %p2308_p13 = pnand %p1621_p9, %p195_p10  ;;  %s3907_s3 = sld [smem:[#allocation22_spill]] }
  0x1c   : > { %s3904_s10 = scalar_select %p2300_p11, 1, 0 }
  0x1d   : > { %s3905_s11 = scalar_select %p2304_p12, 1, 0 }
  0x1e   : > { %s3906_s12 = scalar_select %p2308_p13, 1, 0 }
  0x1f   : > { %p1945_p1 = pneg %p2308_p13  ;;  %p1969_p2 = scmp.lt.s32.totalorder %s2199_s26, 2 }
  0x20   : > { %s3909_s2 = sld [smem:[#allocation21_spill]] }
  0x21   : > { %s219_s15 = sshll.u32 %s3907_s3, 4  ;;  %p2321_p7 = pnand %p1945_p1, %p3891_p4  ;;  %s220_s15 = int_to_ptr.vmem [resolvable:$true] %s219_s15 }
  0x22   : > { %p2330_p3 = pnand %p1969_p2, %p2287_p5  ;;  %s2016_s21 = scalar_lea.vmem %s220_s15, 16 }
  0x23   : > { %p2017_p8 = scmp.ne.s32.totalorder %s220_s15, %s2016_s21  ;;  %p2018_p9 = pneg %p2321_p7 }
  0x24   : > { %s3910_s20 = scalar_select %p2330_p3, 1, 0 }
  0x25   : > { %p2019_p10 = pnand %p2018_p9, %p2017_p8  ;;  %p2024_p0 = scmp.lt.s32.totalorder %s220_s15, %s220_s15 }
  0x26   : > { %s208_s19 = sshll.u32 %s3909_s2, 4  ;;  %p2025_p4 = scmp.lt.s32.totalorder %s2016_s21, %s2016_s21  ;;  %s209_s19 = int_to_ptr.vmem [resolvable:$true] %s208_s19 }
  0x27   : > { %p2020_p1 = pneg %p2019_p10 }
  0x28   : > { %p2026_p12 = por %p2025_p4, %p2024_p0 }
  0x2a   : > { %p2027_p11 = pnand %p2026_p12, %p2020_p1 }
  0x2c   : > { %2030 = shalt.err (!%p2027_p11)
}
  0x2d   : > { %s2201_s22 = smov [#allocation10]   ;;  %s3911_s4 = sld [smem:[#allocation23_spill]] }
  0x2e   : > { %1951 = dma.vmem_to_smem (!%p2321_p7), %s220_s15, 16, %s2201_s22, [#allocation11]  }
  0x2f   : > { %s2031_s8 = scalar_lea.vmem %s209_s19, 128  ;;  %p2039_p10 = scmp.lt.s32.totalorder %s209_s19, %s209_s19 }
  0x30   : > { %p2032_p5 = scmp.ne.s32.totalorder %s209_s19, %s2031_s8  ;;  %p2040_p6 = scmp.lt.s32.totalorder %s2031_s8, %s2031_s8 }
  0x32   : > { %p2034_p2 = pnand %p2032_p5, %p2018_p9  ;;  %p2041_p4 = por %p2040_p6, %p2039_p10 }
  0x33   : > { %s230_s30 = sshll.u32 %s3911_s4, 4  ;;  %s231_s30 = int_to_ptr.vmem [resolvable:$true] %s230_s30 }
  0x34   : > { %p2035_p8 = pneg %p2034_p2 }
  0x36   : > { %p2042_p12 = pnand %p2041_p4, %p2035_p8 }
  0x38   : > { %2045 = shalt.err (!%p2042_p12)
}
  0x39   : > { %s2202_s13 = smov [#allocation9]   ;;  %s2046_s14 = scalar_lea.vmem %s231_s30, 16 }
  0x3a   : > { %1948 = dma.vmem_to_smem (!%p2321_p7), %s209_s19, 128, %s2202_s13, [#allocation6]  }
  0x3b   : > { %p2047_p11 = scmp.ne.s32.totalorder %s231_s30, %s2046_s14  ;;  %p2054_p13 = scmp.lt.s32.totalorder %s231_s30, %s231_s30 }
  0x3c   : > { %p2055_p5 = scmp.lt.s32.totalorder %s2046_s14, %s2046_s14 }
  0x3d   : > { %p2049_p0 = pnand %p2047_p11, %p2018_p9 }
  0x3e   : > { %p2056_p2 = por %p2055_p5, %p2054_p13 }
  0x3f   : > { %p2050_p1 = pneg %p2049_p0 }
  0x41   : > { %p2057_p3 = pnand %p2056_p2, %p2050_p1 }
  0x43   : > { %2060 = shalt.err (!%p2057_p3)
}
  0x44   : > { %s2203_s15 = smov [#allocation12]   ;;  %s2355_s17 = sand.u32 1, %s2195_s25  }
  0x45   : > { %1954 = dma.vmem_to_smem (!%p2321_p7), %s231_s30, 16, %s2203_s15, [#allocation11]  }
  0x46   : > { %s1627_s18 = sshll.u32 %s2199_s26, 7  ;;  %s1626_s19 = sshll.u32 %s2355_s17, 4 }
  0x47   : > { %s3912_s0 = sld [smem:[#allocation19_spill]]  ;;  %s248_s16 = scalar_lea.vmem [#allocation3], %s1626_s19 }
  0x48   : > { %s254_s29 = sshll.u32 %s248_s16, 4  ;;  %s245_s30 = scalar_lea.sflag [#allocation4], %s2355_s17  ;;  %s2366_s29 = int_to_ptr.vmem [resolvable:$true] %s254_s29 }
  0x49   : > { %p3913_p13 = scmp.ne.s32.totalorder %s3910_s20, 0 }
  0x4b   : > { %p2063_p7 = pneg %p3913_p13 }
  0x4d   : > { %s2364_s27 = scalar_lea.hbm %s3912_s0, %s1627_s18  ;;  %s2066_s15 = scalar_lea.hbm %s3912_s0, 512 }
  0x4e   : > { %s2061_s8 = scalar_lea.hbm %s2364_s27, 256  ;;  %p2067_p8 = scmp.lt.u32.totalorder %s2364_s27, %s3912_s0 }
  0x4f   : > { %p2062_p6 = scmp.ne.s32.totalorder %s2364_s27, %s2061_s8  ;;  %p2068_p10 = scmp.lt.u32.totalorder %s2066_s15, %s2061_s8 }
  0x50   : > { %p2070_p12 = scmp.lt.u32.totalorder %s2061_s8, %s2364_s27 }
  0x51   : > { %p2064_p3 = pnand %p2063_p7, %p2062_p6  ;;  %p2069_p4 = por %p2068_p10, %p2067_p8 }
  0x53   : > { %p2065_p9 = pneg %p2064_p3  ;;  %p2071_p11 = por %p2070_p12, %p2069_p4 }
  0x55   : > { %p2072_p0 = pnand %p2071_p11, %p2065_p9 }
  0x57   : > { %2075 = shalt.err (!%p2072_p0)
}
  0x58   : > { %s2076_s19 = scalar_lea.vmem %s2366_s29, 256  ;;  %s2204_s16 = smov [#allocation3]  }
  0x59   : > { %p2077_p1 = scmp.ne.s32.totalorder %s2366_s29, %s2076_s19  ;;  %s2081_s13 = sshll.u32 %s2204_s16, 4  ;;  %s2082_s13 = int_to_ptr.vmem [resolvable:$false] %s2081_s13 }
  0x5a   : > { %s2083_s14 = scalar_lea.vmem %s2082_s13, 512  ;;  %p2084_p6 = scmp.lt.s32.totalorder %s2366_s29, %s2082_s13 }
  0x5b   : > { %p2079_p5 = pnand %p2077_p1, %p2063_p7  ;;  %p2085_p3 = scmp.lt.s32.totalorder %s2083_s14, %s2076_s19 }
  0x5d   : > { %p2080_p2 = pneg %p2079_p5  ;;  %p2086_p8 = por %p2085_p3, %p2084_p6 }
  0x5f   : > { %p2087_p10 = pnand %p2086_p8, %p2080_p2 }
  0x61   : > { %2090 = shalt.err (!%p2087_p10)
}
  0x62   : > { %s2205_s8 = smov 256   ;;  %s2206_s15 = smov 128  }
  0x63   : > { %s2207_s21 = smov 8   ;;  %s1628_s22 = sshll.u32 %s2355_s17, 3 }
  0x64   : > { %1958 = dma.hbm_to_vmem [thread:$0]  (!%p3913_p13), %s2364_s27, 256, %s2366_s29, %s245_s30, %s2205_s8, %s2206_s15, %s2207_s21  }
  0x65   : > { %s3914_s1 = sld [smem:[#allocation20_spill]]  ;;  %s268_s14 = scalar_lea.vmem [#allocation7], %s1628_s22 }
  0x66   : > { %s275_s0 = sshll.u32 %s268_s14, 4  ;;  %s265_s2 = scalar_lea.sflag [#allocation8], %s2355_s17  ;;  %s276_s0 = int_to_ptr.vmem [resolvable:$true] %s275_s0 }
  0x6b   : > { %s2402_s13 = scalar_lea.hbm %s3914_s1, %s1627_s18  ;;  %s2096_s30 = scalar_lea.hbm %s3914_s1, 256 }
  0x6c   : > { %s2091_s3 = scalar_lea.hbm %s2402_s13, 128  ;;  %p2097_p11 = scmp.lt.u32.totalorder %s2402_s13, %s3914_s1 }
  0x6d   : > { %p2092_p9 = scmp.ne.s32.totalorder %s2402_s13, %s2091_s3  ;;  %p2098_p0 = scmp.lt.u32.totalorder %s2096_s30, %s2091_s3 }
  0x6e   : > { %p2100_p5 = scmp.lt.u32.totalorder %s2091_s3, %s2402_s13 }
  0x6f   : > { %p2094_p4 = pnand %p2092_p9, %p2063_p7  ;;  %p2099_p1 = por %p2098_p0, %p2097_p11 }
  0x71   : > { %p2095_p12 = pneg %p2094_p4  ;;  %p2101_p2 = por %p2100_p5, %p2099_p1 }
  0x73   : > { %p2102_p6 = pnand %p2101_p2, %p2095_p12 }
  0x75   : > { %2105 = shalt.err (!%p2102_p6)
}
  0x76   : > { %s2106_s17 = scalar_lea.vmem %s276_s0, 128  ;;  %s2208_s15 = smov [#allocation7]  }
  0x77   : > { %p2107_p3 = scmp.ne.s32.totalorder %s276_s0, %s2106_s17  ;;  %s2111_s21 = sshll.u32 %s2208_s15, 4  ;;  %s2112_s21 = int_to_ptr.vmem [resolvable:$false] %s2111_s21 }
  0x78   : > { %s2113_s22 = scalar_lea.vmem %s2112_s21, 256  ;;  %p2114_p9 = scmp.lt.s32.totalorder %s276_s0, %s2112_s21 }
  0x79   : > { %p2109_p8 = pnand %p2107_p3, %p2063_p7  ;;  %p2115_p4 = scmp.lt.s32.totalorder %s2113_s22, %s2106_s17 }
  0x7b   : > { %p2110_p10 = pneg %p2109_p8  ;;  %p2116_p0 = por %p2115_p4, %p2114_p9 }
  0x7d   : > { %p2117_p11 = pnand %p2116_p0, %p2110_p10 }
  0x7f   : > { %2120 = shalt.err (!%p2117_p11)
}
  0x80   : > { %1961 = dma.hbm_to_vmem [thread:$0]  (!%p3913_p13), %s2402_s13, 128, %s276_s0, %s265_s2  }
  0x81   : > { %p3915_p12 = scmp.ne.s32.totalorder %s3906_s12, 0 }
  0x82   : > { %s2427_s3 = sand.u32 (!%p3915_p12), 1, %s2191_s24   ;;  %p3916_p7 = scmp.ne.s32.totalorder (!%p3915_p12), %s3903_s9, 0 }
  0x83   : > { %284 = sbr.rel (%p3915_p12) target bundleno = 392 (0x188), region = 44  ;;  %s1631_s19 = sshll.u32 (!%p3915_p12), %s2427_s3, 4 }
  0x84   : > { %s287_s16 = scalar_lea.sflag (!%p3915_p12), [#allocation4], %s2427_s3  ;;  %s2431_s14 = scalar_lea.vmem (!%p3915_p12), [#allocation3], %s1631_s19 }
  0x8a   : > { %2166 = dma.done.wait (%p3916_p7), %s287_s16, 256  }
  0x8b   : > { %2168 = vsyncadd (%p3916_p7), %s287_s16, 4294967040  ;;  %s3896_s0 = sshll.u32 %s2427_s3, 3  ;;  %s296_s2 = scalar_lea.sflag [#allocation8], %s2427_s3 }
  0x8c   : > { %s2441_s12 = scalar_lea.vmem [#allocation7], %s3896_s0 }
  0x8d   : > { %2170 = dma.done.wait (%p3916_p7), %s296_s2, 128  }
  0x8e   : > { %2172 = vsyncadd (%p3916_p7), %s296_s2, 4294967168  ;;  %p3917_p13 = scmp.eq.s32.totalorder %s2269_s5, 0 }
  0x90   : > { %2174 = dma.done.wait (%p3917_p13), [#allocation6], 128   ;;  %p3918_p1 = pmov %p3917_p13 }
  0x92   : > { %2176 = vsyncadd (%p3918_p1), [#allocation6], 4294967168  ;;  %p3919_p5 = pmov %p3918_p1 }
  0x93   : > { %p3920_p2 = pmov %p3918_p1 }
  0x94   : > { %2178 = dma.done.wait (%p3919_p5), [#allocation11], 32  }
  0x95   : > { %2180 = vsyncadd (%p3920_p2), [#allocation11], 4294967264 }
  0x96   : > { %316 = sfence }
  0x97   : > { %s346_s20 = sld [smem:[#allocation9]]  ;;  %v2458_v0 = vld [vmem:[%s2431_s14] sm:$0xff]  ;;  %s2462_s18 = sld [smem:[#allocation9 + $0x1]]  ;;  %v2474_v2 = vld [vmem:[%s2431_s14 + $0x8] sm:$0xff] }
  0x98   : > { %s1637_s13 = sld [smem:[#allocation9 + $0x80]]  ;;  %s2464_s8 = sld [smem:[#allocation9 + $0x81]]  ;;  %v2467_v1 = vand.u32 2147483647, %v2458_v0  ;;  %v2481_v3 = vand.u32 2147483647, %v2474_v2  ;;  %v2494_v8 = vmul.f32 %v2474_v2, %v2458_v0  ;;  %v2500_v12 = vmul.f32 %v2458_v0, %v2458_v0 }
  0x99   : > { %s1638_s27 = sld [smem:[#allocation9 + $0x100]]  ;;  %s2469_s17 = sld [smem:[#allocation9 + $0x101]]  ;;  %v2536_v28 = vmul.f32 %v2474_v2, %v2474_v2 }
  0x9a   : > { %s1639_s9 = sld [smem:[#allocation9 + $0x180]]  ;;  %s2471_s15 = sld [smem:[#allocation9 + $0x181]] }
  0x9b   : > { %s2455_s29 = sld [smem:[#allocation9 + $0x200]]  ;;  %s2478_s22 = sld [smem:[#allocation9 + $0x201]] }
  0x9c   : > { %s2460_s30 = sld [smem:[#allocation9 + $0x280]]  ;;  %s2483_s19 = sld [smem:[#allocation9 + $0x281]] }
  0x9d   : > { %s2476_s21 = sld [smem:[#allocation9 + $0x300]]  ;;  %v645_v4 = vstv %s346_s20  ;;  %s2485_s16 = sld [smem:[#allocation9 + $0x2]]  ;;  %v671_v16 = vstv %s2462_s18 }
  0x9e   : > { %v646_v5 = vmul.f32 %v645_v4, %v2458_v0  ;;  %v647_v6 = vstv %s1637_s13  ;;  %s2488_s2 = sld [smem:[#allocation9 + $0x82]]  ;;  %v673_v17 = vstv %s2464_s8  ;;  %v672_v19 = vmul.f32 %v671_v16, %v2458_v0  ;;  %s2524_s18 = sld [smem:[#allocation9 + $0x83]] }
  0x9f   : > { %v650_v7 = vstv %s1638_s27  ;;  %s2490_s0 = sld [smem:[#allocation9 + $0x102]]  ;;  %v648_v9 = vmul.f32 %v2474_v2, %v647_v6  ;;  %s2510_s27 = sld [smem:[#allocation9 + $0x301]]  ;;  %v674_v20 = vmul.f32 %v2474_v2, %v673_v17  ;;  %v676_v23 = vstv %s2469_s17 }
  0xa0   : > { %v651_v10 = vmul.f32 %v650_v7, %v2467_v1  ;;  %v653_v11 = vstv %s1639_s9  ;;  %s2503_s20 = sld [smem:[#allocation9 + $0x182]]  ;;  %v679_v24 = vstv %s2471_s15  ;;  %v677_v26 = vmul.f32 %v676_v23, %v2467_v1  ;;  %s2530_s8 = sld [smem:[#allocation9 + $0x183]] }
  0xa1   : > { %v656_v13 = vstv %s2455_s29  ;;  %s2505_s13 = sld [smem:[#allocation9 + $0x202]]  ;;  %v649_v14 = vadd.f32 %v648_v9, %v646_v5  ;;  %v654_v15 = vmul.f32 %v653_v11, %v2481_v3  ;;  %s2519_s29 = sld [smem:[#allocation9 + $0x3]]  ;;  %v675_v25 = vadd.f32 %v674_v20, %v672_v19 }
  0xa2   : > { %s2512_s1 = sld [smem:[#allocation9 + $0x282]]  ;;  %v659_v18 = vstv %s2460_s30  ;;  %v657_v22 = vmul.f32 %v656_v13, %v2494_v8  ;;  %s2526_s30 = sld [smem:[#allocation9 + $0x103]]  ;;  %v680_v27 = vmul.f32 %v679_v24, %v2481_v3  ;;  %v682_v31 = vstv %s2478_s22 }
  0xa3   : > { %s2517_s9 = sld [smem:[#allocation9 + $0x302]]  ;;  %v652_v21 = vadd.f32 %v651_v10, %v649_v14  ;;  %s2532_s4 = sld [smem:[#allocation9 + $0x203]]  ;;  %v660_v30 = vmul.f32 %v659_v18, %v2500_v12  ;;  %v662_v32 = vstv %s2476_s21  ;;  %v678_v33 = vadd.f32 %v677_v26, %v675_v25 }
  0xa4   : > { %v683_v34 = vmul.f32 %v682_v31, %v2494_v8  ;;  %v685_v35 = vstv %s2483_s19  ;;  %v697_v37 = vstv %s2485_s16  ;;  %v699_v38 = vstv %s2488_s2  ;;  %s2546_s17 = sld [smem:[#allocation9 + $0x4]]  ;;  %s2565_s19 = sld [smem:[#allocation9 + $0x303]] }
  0xa5   : > { %v655_v29 = vadd.f32 %v654_v15, %v652_v21  ;;  %v702_v39 = vstv %s2490_s0  ;;  %s2548_s15 = sld [smem:[#allocation9 + $0x84]]  ;;  %v681_v40 = vadd.f32 %v680_v27, %v678_v33  ;;  %v698_v41 = vmul.f32 %v697_v37, %v2458_v0  ;;  %s2560_s0 = sld [smem:[#allocation9 + $0x283]] }
  0xa6   : > { %v700_v42 = vmul.f32 %v2474_v2, %v699_v38  ;;  %v703_v43 = vmul.f32 %v702_v39, %v2467_v1  ;;  %s2553_s21 = sld [smem:[#allocation9 + $0x104]]  ;;  %v663_v44 = vmul.f32 %v662_v32, %v2536_v28  ;;  %v705_v45 = vstv %s2503_s20  ;;  %s2576_s20 = sld [smem:[#allocation9 + $0x5]] }
  0xa7   : > { %v658_v36 = vadd.f32 %v657_v22, %v655_v29  ;;  %s2555_s22 = sld [smem:[#allocation9 + $0x184]]  ;;  %v708_v46 = vstv %s2505_s13  ;;  %v686_v47 = vmul.f32 %v685_v35, %v2500_v12  ;;  %v688_v48 = vstv %s2510_s27  ;;  %s2578_s13 = sld [smem:[#allocation9 + $0x85]] }
  0xa8   : > { %v701_v49 = vadd.f32 %v700_v42, %v698_v41  ;;  %v706_v50 = vmul.f32 %v705_v45, %v2481_v3  ;;  %s2567_s16 = sld [smem:[#allocation9 + $0x204]]  ;;  %v684_v52 = vadd.f32 %v683_v34, %v681_v40  ;;  %v711_v53 = vstv %s2512_s1  ;;  %s2584_s27 = sld [smem:[#allocation9 + $0x105]] }
  0xa9   : > { %v661_v51 = vadd.f32 %v660_v30, %v658_v36  ;;  %v723_v54 = vstv %s2519_s29  ;;  %s2571_s2 = sld [smem:[#allocation9 + $0x284]]  ;;  %v709_v56 = vmul.f32 %v708_v46, %v2494_v8  ;;  %v714_v57 = vstv %s2517_s9  ;;  %s2589_s1 = sld [smem:[#allocation9 + $0x185]] }
  0xaa   : > { %v704_v55 = vadd.f32 %v703_v43, %v701_v49  ;;  %v724_v58 = vmul.f32 %v723_v54, %v2458_v0  ;;  %v725_v59 = vstv %s2524_s18  ;;  %v728_v60 = vstv %s2526_s30  ;;  %s2591_s9 = sld [smem:[#allocation9 + $0x205]]  ;;  %s2607_s18 = sld [smem:[#allocation9 + $0x6]] }
  0xab   : > { %v731_v61 = vstv %s2530_s8  ;;  %v734_v62 = vstv %s2532_s4  ;;  %v689_v63 = vmul.f32 %v688_v48, %v2536_v28  ;;  %v726_v5 = vmul.f32 %v2474_v2, %v725_v59  ;;  %s2599_s4 = sld [smem:[#allocation9 + $0x304]]  ;;  %s2605_s29 = sld [smem:[#allocation9 + $0x285]] }
  0xac   : > { %v707_v4 = vadd.f32 %v706_v50, %v704_v55  ;;  %v729_v6 = vmul.f32 %v728_v60, %v2467_v1  ;;  %v2593_v7 = vadd.f32 %v663_v44, %v661_v51  ;;  %v687_v9 = vadd.f32 %v686_v47, %v684_v52  ;;  %s2612_s30 = sld [smem:[#allocation9 + $0x86]]  ;;  %p3922_p3 = scmp.ne.s32.totalorder %s3904_s10, 0 }
  0xad   : > { %v712_v10 = vmul.f32 %v711_v53, %v2500_v12  ;;  %v715_v11 = vmul.f32 %v714_v57, %v2536_v28  ;;  %v727_v14 = vadd.f32 %v726_v5, %v724_v58  ;;  %v732_v15 = vmul.f32 %v731_v61, %v2481_v3  ;;  %s2614_s8 = sld [smem:[#allocation9 + $0x106]] }
  0xae   : > { %v710_v13 = vadd.f32 %v709_v56, %v707_v4  ;;  %v735_v16 = vmul.f32 %v734_v62, %v2494_v8  ;;  %v749_v17 = vstv %s2546_s17  ;;  %v751_v18 = vstv %s2548_s15  ;;  %s2621_s17 = sld [smem:[#allocation9 + $0x305]]  ;;  %s2624_s15 = sld [smem:[#allocation9 + $0x186]] }
  0xaf   : > { %v754_v19 = vstv %s2553_s21  ;;  %v757_v20 = vstv %s2555_s22  ;;  %v730_v21 = vadd.f32 %v729_v6, %v727_v14  ;;  %v737_v22 = vstv %s2560_s0  ;;  %s2630_s21 = sld [smem:[#allocation9 + $0x206]]  ;;  %s2634_s22 = sld [smem:[#allocation9 + $0x7]] }
  0xb0   : > { %v750_v23 = vmul.f32 %v749_v17, %v2458_v0  ;;  %v752_v24 = vmul.f32 %v2474_v2, %v751_v18  ;;  %v2616_v25 = vadd.f32 %v689_v63, %v687_v9  ;;  %v740_v26 = vstv %s2565_s19  ;;  %s2640_s0 = sld [smem:[#allocation9 + $0x286]]  ;;  %s2642_s19 = sld [smem:[#allocation9 + $0x87]] }
  0xb1   : > { %v755_v27 = vmul.f32 %v754_v19, %v2467_v1  ;;  %v760_v29 = vstv %s2567_s16  ;;  %v713_v30 = vadd.f32 %v712_v10, %v710_v13  ;;  %v733_v31 = vadd.f32 %v732_v15, %v730_v21  ;;  %s2648_s16 = sld [smem:[#allocation9 + $0x107]] }
  0xb2   : > { %v753_v32 = vadd.f32 %v752_v24, %v750_v23  ;;  %v758_v33 = vmul.f32 %v757_v20, %v2481_v3  ;;  %v738_v34 = vmul.f32 %v737_v22, %v2500_v12  ;;  %v763_v35 = vstv %s2571_s2  ;;  %s2650_s2 = sld [smem:[#allocation9 + $0x187]] }
  0xb3   : > { %v775_v36 = vstv %s2576_s20  ;;  %v777_v37 = vstv %s2578_s13  ;;  %v736_v38 = vadd.f32 %v735_v16, %v733_v31  ;;  %v761_v40 = vmul.f32 %v760_v29, %v2494_v8  ;;  %s2654_s20 = sld [smem:[#allocation9 + $0x207]]  ;;  %s2659_s13 = sld [smem:[#allocation9 + $0x306]] }
  0xb4   : > { %v756_v39 = vadd.f32 %v755_v27, %v753_v32  ;;  %v776_v41 = vmul.f32 %v775_v36, %v2458_v0  ;;  %v778_v42 = vmul.f32 %v2474_v2, %v777_v37  ;;  %v780_v43 = vstv %s2584_s27  ;;  %s2664_s27 = sld [smem:[#allocation9 + $0x287]] }
  0xb5   : > { %v783_v44 = vstv %s2589_s1  ;;  %v786_v45 = vstv %s2591_s9  ;;  %v2644_v46 = vadd.f32 %v715_v11, %v713_v30  ;;  %v741_v47 = vmul.f32 %v740_v26, %v2536_v28  ;;  %s2666_s1 = sld [smem:[#allocation9 + $0x8]] }
  0xb6   : > { %v759_v48 = vadd.f32 %v758_v33, %v756_v39  ;;  %v781_v49 = vmul.f32 %v780_v43, %v2467_v1  ;;  %v739_v50 = vadd.f32 %v738_v34, %v736_v38  ;;  %v764_v51 = vmul.f32 %v763_v35, %v2500_v12  ;;  %s2672_s9 = sld [smem:[#allocation9 + $0x88]] }
  0xb7   : > { %v779_v52 = vadd.f32 %v778_v42, %v776_v41  ;;  %v784_v53 = vmul.f32 %v783_v44, %v2481_v3  ;;  %v766_v55 = vstv %s2599_s4  ;;  %v787_v56 = vmul.f32 %v786_v45, %v2494_v8  ;;  %s2678_s4 = sld [smem:[#allocation9 + $0x108]] }
  0xb8   : > { %v762_v54 = vadd.f32 %v761_v40, %v759_v48  ;;  %v789_v57 = vstv %s2605_s29  ;;  %v801_v59 = vstv %s2607_s18  ;;  %v803_v60 = vstv %s2612_s30  ;;  %s2680_s29 = sld [smem:[#allocation9 + $0x188]]  ;;  %s2689_s30 = sld [smem:[#allocation9 + $0x307]] }
  0xb9   : > { %v782_v58 = vadd.f32 %v781_v49, %v779_v52  ;;  %v806_v61 = vstv %s2614_s8  ;;  %v792_v62 = vstv %s2621_s17  ;;  %v802_v63 = vmul.f32 %v801_v59, %v2458_v0  ;;  %s2684_s18 = sld [smem:[#allocation9 + $0x208]]  ;;  %s2696_s17 = sld [smem:[#allocation9 + $0x9]] }
  0xba   : > { %v804_v4 = vmul.f32 %v2474_v2, %v803_v60  ;;  %v807_v5 = vmul.f32 %v806_v61, %v2467_v1  ;;  %v2674_v6 = vadd.f32 %v741_v47, %v739_v50  ;;  %v767_v9 = vmul.f32 %v766_v55, %v2536_v28  ;;  %s2694_s8 = sld [smem:[#allocation9 + $0x288]] }
  0xbb   : > { %v785_v10 = vadd.f32 %v784_v53, %v782_v58  ;;  %v809_v11 = vstv %s2624_s15  ;;  %v765_v13 = vadd.f32 %v764_v51, %v762_v54  ;;  %v812_v16 = vstv %s2630_s21  ;;  %s2702_s15 = sld [smem:[#allocation9 + $0x308]]  ;;  %s2704_s21 = sld [smem:[#allocation9 + $0x89]] }
  0xbc   : > { %v805_v14 = vadd.f32 %v804_v4, %v802_v63  ;;  %v810_v15 = vmul.f32 %v809_v11, %v2481_v3  ;;  %v790_v18 = vmul.f32 %v789_v57, %v2500_v12  ;;  %v793_v19 = vmul.f32 %v792_v62, %v2536_v28 }
  0xbd   : > { %v788_v17 = vadd.f32 %v787_v56, %v785_v10  ;;  %v827_v20 = vstv %s2634_s22  ;;  %v815_v22 = vstv %s2640_s0  ;;  %v829_v24 = vstv %s2642_s19  ;;  %s2710_s22 = sld [smem:[#allocation9 + $0x109]] }
  0xbe   : > { %v808_v21 = vadd.f32 %v807_v5, %v805_v14  ;;  %v828_v23 = vmul.f32 %v827_v20, %v2458_v0  ;;  %v813_v26 = vmul.f32 %v812_v16, %v2494_v8  ;;  %v830_v27 = vmul.f32 %v2474_v2, %v829_v24  ;;  %s2712_s0 = sld [smem:[#allocation9 + $0x189]] }
  0xbf   : > { %v832_v29 = vstv %s2648_s16  ;;  %v835_v30 = vstv %s2650_s2  ;;  %v2706_v31 = vadd.f32 %v767_v9, %v765_v13  ;;  %v838_v34 = vstv %s2654_s20  ;;  %s2716_s19 = sld [smem:[#allocation9 + $0x209]]  ;;  %s2724_s16 = sld [smem:[#allocation9 + $0xa]] }
  0xc0   : > { %v811_v32 = vadd.f32 %v810_v15, %v808_v21  ;;  %v833_v33 = vmul.f32 %v832_v29, %v2467_v1  ;;  %v791_v35 = vadd.f32 %v790_v18, %v788_v17  ;;  %v818_v36 = vstv %s2659_s13  ;;  %s2730_s2 = sld [smem:[#allocation9 + $0x289]]  ;;  %s2732_s20 = sld [smem:[#allocation9 + $0x8a]] }
  0xc1   : > { %v831_v37 = vadd.f32 %v830_v27, %v828_v23  ;;  %v836_v38 = vmul.f32 %v835_v30, %v2481_v3  ;;  %v816_v39 = vmul.f32 %v815_v22, %v2500_v12  ;;  %v839_v40 = vmul.f32 %v838_v34, %v2494_v8  ;;  %s2738_s13 = sld [smem:[#allocation9 + $0x10a]] }
  0xc2   : > { %v841_v41 = vstv %s2664_s27  ;;  %v853_v42 = vstv %s2666_s1  ;;  %v814_v43 = vadd.f32 %v813_v26, %v811_v32  ;;  %v855_v47 = vstv %s2672_s9  ;;  %s2740_s27 = sld [smem:[#allocation9 + $0x18a]]  ;;  %s2749_s9 = sld [smem:[#allocation9 + $0x309]] }
  0xc3   : > { %v834_v44 = vadd.f32 %v833_v33, %v831_v37  ;;  %v854_v45 = vmul.f32 %v853_v42, %v2458_v0  ;;  %v819_v48 = vmul.f32 %v818_v36, %v2536_v28  ;;  %v856_v49 = vmul.f32 %v2474_v2, %v855_v47  ;;  %s2745_s1 = sld [smem:[#allocation9 + $0x20a]] }
  0xc4   : > { %v858_v50 = vstv %s2678_s4  ;;  %v861_v51 = vstv %s2680_s29  ;;  %v2734_v52 = vadd.f32 %v793_v19, %v791_v35  ;;  %v864_v55 = vstv %s2684_s18  ;;  %s2754_s4 = sld [smem:[#allocation9 + $0x28a]]  ;;  %s2756_s29 = sld [smem:[#allocation9 + $0xb]] }
  0xc5   : > { %v837_v53 = vadd.f32 %v836_v38, %v834_v44  ;;  %v859_v54 = vmul.f32 %v858_v50, %v2467_v1  ;;  %v842_v56 = vmul.f32 %v841_v41, %v2500_v12  ;;  %v844_v57 = vstv %s2689_s30  ;;  %s2762_s18 = sld [smem:[#allocation9 + $0x8b]] }
  0xc6   : > { %v857_v58 = vadd.f32 %v856_v49, %v854_v45  ;;  %v862_v59 = vmul.f32 %v861_v51, %v2481_v3  ;;  %v817_v60 = vadd.f32 %v816_v39, %v814_v43  ;;  %v865_v62 = vmul.f32 %v864_v55, %v2494_v8  ;;  %s2767_s30 = sld [smem:[#allocation9 + $0x10b]] }
  0xc7   : > { %v840_v61 = vadd.f32 %v839_v40, %v837_v53  ;;  %v879_v63 = vstv %s2696_s17  ;;  %v867_v5 = vstv %s2694_s8  ;;  %v881_v10 = vstv %s2704_s21  ;;  %s2769_s8 = sld [smem:[#allocation9 + $0x18b]] }
  0xc8   : > { %v860_v4 = vadd.f32 %v859_v54, %v857_v58  ;;  %v880_v9 = vmul.f32 %v879_v63, %v2458_v0  ;;  %v870_v11 = vstv %s2702_s15  ;;  %v882_v13 = vmul.f32 %v2474_v2, %v881_v10  ;;  %s2774_s17 = sld [smem:[#allocation9 + $0x20b]]  ;;  %s2779_s15 = sld [smem:[#allocation9 + $0x30a]] }
  0xc9   : > { %v884_v14 = vstv %s2710_s22  ;;  %v887_v15 = vstv %s2712_s0  ;;  %v845_v16 = vmul.f32 %v844_v57, %v2536_v28  ;;  %v890_v19 = vstv %s2716_s19  ;;  %s2784_s21 = sld [smem:[#allocation9 + $0x28b]]  ;;  %s2786_s22 = sld [smem:[#allocation9 + $0xc]] }
  0xca   : > { %v863_v17 = vadd.f32 %v862_v59, %v860_v4  ;;  %v885_v18 = vmul.f32 %v884_v14, %v2467_v1  ;;  %v2771_v20 = vadd.f32 %v819_v48, %v817_v60  ;;  %v843_v21 = vadd.f32 %v842_v56, %v840_v61  ;;  %s2792_s0 = sld [smem:[#allocation9 + $0x30b]]  ;;  %s2794_s19 = sld [smem:[#allocation9 + $0x8c]] }
  0xcb   : > { %v883_v22 = vadd.f32 %v882_v13, %v880_v9  ;;  %v888_v23 = vmul.f32 %v887_v15, %v2481_v3  ;;  %v868_v26 = vmul.f32 %v867_v5, %v2500_v12  ;;  %v871_v27 = vmul.f32 %v870_v11, %v2536_v28 }
  0xcc   : > { %v866_v24 = vadd.f32 %v865_v62, %v863_v17  ;;  %v905_v29 = vstv %s2724_s16  ;;  %v891_v32 = vmul.f32 %v890_v19, %v2494_v8  ;;  %v907_v34 = vstv %s2732_s20  ;;  %s2800_s16 = sld [smem:[#allocation9 + $0x10c]] }
  0xcd   : > { %v886_v30 = vadd.f32 %v885_v18, %v883_v22  ;;  %v906_v33 = vmul.f32 %v905_v29, %v2458_v0  ;;  %v893_v35 = vstv %s2730_s2  ;;  %v908_v36 = vmul.f32 %v2474_v2, %v907_v34  ;;  %s2802_s2 = sld [smem:[#allocation9 + $0x18c]] }
  0xce   : > { %v910_v37 = vstv %s2738_s13  ;;  %v913_v38 = vstv %s2740_s27  ;;  %v2796_v39 = vadd.f32 %v845_v16, %v843_v21  ;;  %v916_v42 = vstv %s2745_s1  ;;  %s2806_s20 = sld [smem:[#allocation9 + $0x20c]]  ;;  %s2814_s13 = sld [smem:[#allocation9 + $0xd]] }
  0xcf   : > { %v889_v40 = vadd.f32 %v888_v23, %v886_v30  ;;  %v911_v41 = vmul.f32 %v910_v37, %v2467_v1  ;;  %v869_v43 = vadd.f32 %v868_v26, %v866_v24  ;;  %v896_v44 = vstv %s2749_s9  ;;  %s2820_s27 = sld [smem:[#allocation9 + $0x28c]]  ;;  %s2822_s1 = sld [smem:[#allocation9 + $0x8d]] }
  0xd0   : > { %v909_v45 = vadd.f32 %v908_v36, %v906_v33  ;;  %v914_v47 = vmul.f32 %v913_v38, %v2481_v3  ;;  %v894_v48 = vmul.f32 %v893_v35, %v2500_v12  ;;  %v917_v49 = vmul.f32 %v916_v42, %v2494_v8  ;;  %s2828_s9 = sld [smem:[#allocation9 + $0x10d]] }
  0xd1   : > { %v919_v50 = vstv %s2754_s4  ;;  %v931_v51 = vstv %s2756_s29  ;;  %v892_v53 = vadd.f32 %v891_v32, %v889_v40  ;;  %v933_v56 = vstv %s2762_s18  ;;  %s2830_s4 = sld [smem:[#allocation9 + $0x18d]]  ;;  %s2839_s18 = sld [smem:[#allocation9 + $0x30c]] }
  0xd2   : > { %v912_v54 = vadd.f32 %v911_v41, %v909_v45  ;;  %v932_v55 = vmul.f32 %v931_v51, %v2458_v0  ;;  %v897_v57 = vmul.f32 %v896_v44, %v2536_v28  ;;  %v934_v58 = vmul.f32 %v2474_v2, %v933_v56  ;;  %s2835_s29 = sld [smem:[#allocation9 + $0x20d]] }
  0xd3   : > { %v936_v59 = vstv %s2767_s30  ;;  %v939_v60 = vstv %s2769_s8  ;;  %v2824_v61 = vadd.f32 %v871_v27, %v869_v43  ;;  %v942_v4 = vstv %s2774_s17  ;;  %s2844_s30 = sld [smem:[#allocation9 + $0x28d]]  ;;  %s2846_s8 = sld [smem:[#allocation9 + $0xe]] }
  0xd4   : > { %v915_v62 = vadd.f32 %v914_v47, %v912_v54  ;;  %v937_v63 = vmul.f32 %v936_v59, %v2467_v1  ;;  %v920_v5 = vmul.f32 %v919_v50, %v2500_v12  ;;  %v922_v9 = vstv %s2779_s15  ;;  %s2852_s17 = sld [smem:[#allocation9 + $0x8e]] }
  0xd5   : > { %v935_v10 = vadd.f32 %v934_v58, %v932_v55  ;;  %v940_v11 = vmul.f32 %v939_v60, %v2481_v3  ;;  %v895_v13 = vadd.f32 %v894_v48, %v892_v53  ;;  %v943_v15 = vmul.f32 %v942_v4, %v2494_v8  ;;  %s2857_s15 = sld [smem:[#allocation9 + $0x10e]] }
  0xd6   : > { %v918_v14 = vadd.f32 %v917_v49, %v915_v62  ;;  %v957_v16 = vstv %s2786_s22  ;;  %v945_v18 = vstv %s2784_s21  ;;  %v959_v21 = vstv %s2794_s19  ;;  %s2859_s21 = sld [smem:[#allocation9 + $0x18e]] }
  0xd7   : > { %v938_v17 = vadd.f32 %v937_v63, %v935_v10  ;;  %v958_v19 = vmul.f32 %v957_v16, %v2458_v0  ;;  %v948_v22 = vstv %s2792_s0  ;;  %v960_v23 = vmul.f32 %v2474_v2, %v959_v21  ;;  %s2864_s22 = sld [smem:[#allocation9 + $0x20e]]  ;;  %s2869_s0 = sld [smem:[#allocation9 + $0x30d]] }
  0xd8   : > { %v962_v24 = vstv %s2800_s16  ;;  %v965_v26 = vstv %s2802_s2  ;;  %v923_v27 = vmul.f32 %v922_v9, %v2536_v28  ;;  %v968_v32 = vstv %s2806_s20  ;;  %s2874_s19 = sld [smem:[#allocation9 + $0x28e]]  ;;  %s2876_s16 = sld [smem:[#allocation9 + $0xf]] }
  0xd9   : > { %v941_v29 = vadd.f32 %v940_v11, %v938_v17  ;;  %v963_v30 = vmul.f32 %v962_v24, %v2467_v1  ;;  %v2861_v33 = vadd.f32 %v897_v57, %v895_v13  ;;  %v921_v34 = vadd.f32 %v920_v5, %v918_v14  ;;  %s2882_s2 = sld [smem:[#allocation9 + $0x30e]]  ;;  %s2884_s20 = sld [smem:[#allocation9 + $0x8f]] }
  0xda   : > { %v961_v35 = vadd.f32 %v960_v23, %v958_v19  ;;  %v966_v36 = vmul.f32 %v965_v26, %v2481_v3  ;;  %v946_v38 = vmul.f32 %v945_v18, %v2500_v12  ;;  %v949_v40 = vmul.f32 %v948_v22, %v2536_v28 }
  0xdb   : > { %v944_v37 = vadd.f32 %v943_v15, %v941_v29  ;;  %v983_v41 = vstv %s2814_s13  ;;  %v969_v43 = vmul.f32 %v968_v32, %v2494_v8  ;;  %v985_v45 = vstv %s2822_s1  ;;  %s2890_s13 = sld [smem:[#allocation9 + $0x10f]] }
  0xdc   : > { %v964_v42 = vadd.f32 %v963_v30, %v961_v35  ;;  %v984_v44 = vmul.f32 %v983_v41, %v2458_v0  ;;  %v971_v47 = vstv %s2820_s27  ;;  %v986_v48 = vmul.f32 %v2474_v2, %v985_v45  ;;  %s2892_s27 = sld [smem:[#allocation9 + $0x18f]] }
  0xdd   : > { %v988_v49 = vstv %s2828_s9  ;;  %v991_v50 = vstv %s2830_s4  ;;  %v2886_v51 = vadd.f32 %v923_v27, %v921_v34  ;;  %v994_v55 = vstv %s2835_s29  ;;  %s2896_s1 = sld [smem:[#allocation9 + $0x20f]]  ;;  %s2904_s9 = sld [smem:[#allocation9 + $0x10]] }
  0xde   : > { %v967_v53 = vadd.f32 %v966_v36, %v964_v42  ;;  %v989_v54 = vmul.f32 %v988_v49, %v2467_v1  ;;  %v947_v56 = vadd.f32 %v946_v38, %v944_v37  ;;  %v974_v57 = vstv %s2839_s18  ;;  %s2910_s4 = sld [smem:[#allocation9 + $0x28f]]  ;;  %s2912_s29 = sld [smem:[#allocation9 + $0x90]] }
  0xdf   : > { %v987_v58 = vadd.f32 %v986_v48, %v984_v44  ;;  %v992_v59 = vmul.f32 %v991_v50, %v2481_v3  ;;  %v972_v60 = vmul.f32 %v971_v47, %v2500_v12  ;;  %v995_v62 = vmul.f32 %v994_v55, %v2494_v8  ;;  %s2918_s18 = sld [smem:[#allocation9 + $0x110]] }
  0xe0   : > { %v997_v63 = vstv %s2844_s30  ;;  %v1009_v4 = vstv %s2846_s8  ;;  %v970_v5 = vadd.f32 %v969_v43, %v967_v53  ;;  %v1011_v11 = vstv %s2852_s17  ;;  %s2920_s30 = sld [smem:[#allocation9 + $0x190]]  ;;  %s2929_s17 = sld [smem:[#allocation9 + $0x30f]] }
  0xe1   : > { %v990_v9 = vadd.f32 %v989_v54, %v987_v58  ;;  %v1010_v10 = vmul.f32 %v1009_v4, %v2458_v0  ;;  %v975_v13 = vmul.f32 %v974_v57, %v2536_v28  ;;  %v1012_v14 = vmul.f32 %v2474_v2, %v1011_v11  ;;  %s2925_s8 = sld [smem:[#allocation9 + $0x210]] }
  0xe2   : > { %v1014_v15 = vstv %s2857_s15  ;;  %v1017_v16 = vstv %s2859_s21  ;;  %v2914_v17 = vadd.f32 %v949_v40, %v947_v56  ;;  %v1020_v21 = vstv %s2864_s22  ;;  %s2934_s15 = sld [smem:[#allocation9 + $0x11]]  ;;  %s2940_s21 = sld [smem:[#allocation9 + $0x290]] }
  0xe3   : > { %v993_v18 = vadd.f32 %v992_v59, %v990_v9  ;;  %v1015_v19 = vmul.f32 %v1014_v15, %v2467_v1  ;;  %v998_v22 = vmul.f32 %v997_v63, %v2500_v12  ;;  %v1000_v23 = vstv %s2869_s0  ;;  %s2942_s22 = sld [smem:[#allocation9 + $0x91]] }
  0xe4   : > { %v1013_v24 = vadd.f32 %v1012_v14, %v1010_v10  ;;  %v1018_v26 = vmul.f32 %v1017_v16, %v2481_v3  ;;  %v973_v27 = vadd.f32 %v972_v60, %v970_v5  ;;  %v1021_v30 = vmul.f32 %v1020_v21, %v2494_v8  ;;  %s2947_s0 = sld [smem:[#allocation9 + $0x111]] }
  0xe5   : > { %v996_v29 = vadd.f32 %v995_v62, %v993_v18  ;;  %v1035_v32 = vstv %s2876_s16  ;;  %v1023_v35 = vstv %s2874_s19  ;;  %v1037_v37 = vstv %s2884_s20  ;;  %s2949_s19 = sld [smem:[#allocation9 + $0x191]] }
  0xe6   : > { %v1016_v34 = vadd.f32 %v1015_v19, %v1013_v24  ;;  %v1036_v36 = vmul.f32 %v1035_v32, %v2458_v0  ;;  %v1026_v38 = vstv %s2882_s2  ;;  %v1038_v40 = vmul.f32 %v2474_v2, %v1037_v37  ;;  %s2954_s16 = sld [smem:[#allocation9 + $0x211]]  ;;  %s2959_s2 = sld [smem:[#allocation9 + $0x310]] }
  0xe7   : > { %v1040_v41 = vstv %s2890_s13  ;;  %v1043_v42 = vstv %s2892_s27  ;;  %v1001_v43 = vmul.f32 %v1000_v23, %v2536_v28  ;;  %v1046_v47 = vstv %s2896_s1  ;;  %s2964_s20 = sld [smem:[#allocation9 + $0x291]]  ;;  %s2966_s13 = sld [smem:[#allocation9 + $0x12]] }
  0xe8   : > { %v1019_v44 = vadd.f32 %v1018_v26, %v1016_v34  ;;  %v1041_v45 = vmul.f32 %v1040_v41, %v2467_v1  ;;  %v2951_v48 = vadd.f32 %v975_v13, %v973_v27  ;;  %v999_v49 = vadd.f32 %v998_v22, %v996_v29  ;;  %s2972_s27 = sld [smem:[#allocation9 + $0x311]]  ;;  %s2974_s1 = sld [smem:[#allocation9 + $0x92]] }
  0xe9   : > { %v1039_v50 = vadd.f32 %v1038_v40, %v1036_v36  ;;  %v1044_v53 = vmul.f32 %v1043_v42, %v2481_v3  ;;  %v1024_v55 = vmul.f32 %v1023_v35, %v2500_v12  ;;  %v1027_v56 = vmul.f32 %v1026_v38, %v2536_v28 }
  0xea   : > { %v1022_v54 = vadd.f32 %v1021_v30, %v1019_v44  ;;  %v1061_v57 = vstv %s2904_s9  ;;  %v1047_v59 = vmul.f32 %v1046_v47, %v2494_v8  ;;  %v1063_v62 = vstv %s2912_s29  ;;  %s2980_s9 = sld [smem:[#allocation9 + $0x112]] }
  0xeb   : > { %v1042_v58 = vadd.f32 %v1041_v45, %v1039_v50  ;;  %v1062_v60 = vmul.f32 %v1061_v57, %v2458_v0  ;;  %v1049_v63 = vstv %s2910_s4  ;;  %v1064_v4 = vmul.f32 %v2474_v2, %v1063_v62  ;;  %s2982_s4 = sld [smem:[#allocation9 + $0x192]] }
  0xec   : > { %v1066_v5 = vstv %s2918_s18  ;;  %v1069_v9 = vstv %s2920_s30  ;;  %v2976_v10 = vadd.f32 %v1001_v43, %v999_v49  ;;  %v1072_v14 = vstv %s2925_s8  ;;  %s2989_s29 = sld [smem:[#allocation9 + $0x212]]  ;;  %s2996_s30 = sld [smem:[#allocation9 + $0x13]] }
  0xed   : > { %v1045_v11 = vadd.f32 %v1044_v53, %v1042_v58  ;;  %v1067_v13 = vmul.f32 %v1066_v5, %v2467_v1  ;;  %v1025_v15 = vadd.f32 %v1024_v55, %v1022_v54  ;;  %v1052_v16 = vstv %s2929_s17  ;;  %s2994_s18 = sld [smem:[#allocation9 + $0x292]]  ;;  %s3002_s8 = sld [smem:[#allocation9 + $0x93]] }
  0xee   : > { %v1065_v18 = vadd.f32 %v1064_v4, %v1062_v60  ;;  %v1070_v19 = vmul.f32 %v1069_v9, %v2481_v3  ;;  %v1050_v22 = vmul.f32 %v1049_v63, %v2500_v12  ;;  %v1073_v23 = vmul.f32 %v1072_v14, %v2494_v8  ;;  %s3008_s17 = sld [smem:[#allocation9 + $0x113]] }
  0xef   : > { %v1048_v21 = vadd.f32 %v1047_v59, %v1045_v11  ;;  %v1087_v24 = vstv %s2934_s15  ;;  %v1075_v27 = vstv %s2940_s21  ;;  %v1089_v30 = vstv %s2942_s22  ;;  %s3010_s15 = sld [smem:[#allocation9 + $0x193]]  ;;  %s3019_s22 = sld [smem:[#allocation9 + $0x312]] }
  0xf0   : > { %v1068_v26 = vadd.f32 %v1067_v13, %v1065_v18  ;;  %v1088_v29 = vmul.f32 %v1087_v24, %v2458_v0  ;;  %v1053_v32 = vmul.f32 %v1052_v16, %v2536_v28  ;;  %v1090_v34 = vmul.f32 %v2474_v2, %v1089_v30  ;;  %s3014_s21 = sld [smem:[#allocation9 + $0x213]] }
  0xf1   : > { %v1092_v35 = vstv %s2947_s0  ;;  %v1095_v36 = vstv %s2949_s19  ;;  %v3004_v37 = vadd.f32 %v1027_v56, %v1025_v15  ;;  %v1098_v41 = vstv %s2954_s16  ;;  %s3024_s0 = sld [smem:[#allocation9 + $0x293]]  ;;  %s3026_s19 = sld [smem:[#allocation9 + $0x14]] }
  0xf2   : > { %v1071_v38 = vadd.f32 %v1070_v19, %v1068_v26  ;;  %v1093_v40 = vmul.f32 %v1092_v35, %v2467_v1  ;;  %v1051_v42 = vadd.f32 %v1050_v22, %v1048_v21  ;;  %v1076_v43 = vmul.f32 %v1075_v27, %v2500_v12  ;;  %s3032_s16 = sld [smem:[#allocation9 + $0x94]]  ;;  %v3053_v22 = vld [vmem:[%s2431_s14] sm:$0xff]  ;;  %v3061_v27 = vld [vmem:[%s2431_s14 + $0x8] sm:$0xff] }
  0xf3   : > { %v1091_v44 = vadd.f32 %v1090_v34, %v1088_v29  ;;  %v1096_v45 = vmul.f32 %v1095_v36, %v2481_v3  ;;  %v1078_v49 = vstv %s2959_s2  ;;  %v1099_v50 = vmul.f32 %v1098_v41, %v2494_v8  ;;  %s3038_s2 = sld [smem:[#allocation9 + $0x114]] }
  0xf4   : > { %v1074_v47 = vadd.f32 %v1073_v23, %v1071_v38  ;;  %v1113_v53 = vstv %s2966_s13  ;;  %v1101_v55 = vstv %s2964_s20  ;;  %v1115_v57 = vstv %s2974_s1  ;;  %s3040_s20 = sld [smem:[#allocation9 + $0x194]]  ;;  %s3057_s1 = sld [smem:[#allocation9 + $0x15]] }
  0xf5   : > { %v1094_v54 = vadd.f32 %v1093_v40, %v1091_v44  ;;  %v1114_v56 = vmul.f32 %v1113_v53, %v2458_v0  ;;  %v1104_v58 = vstv %s2972_s27  ;;  %v1116_v59 = vmul.f32 %v2474_v2, %v1115_v57  ;;  %s3044_s13 = sld [smem:[#allocation9 + $0x214]]  ;;  %s3050_s27 = sld [smem:[#allocation9 + $0x313]] }
  0xf6   : > { %v1118_v60 = vstv %s2980_s9  ;;  %v1121_v62 = vstv %s2982_s4  ;;  %v3034_v63 = vadd.f32 %v1053_v32, %v1051_v42  ;;  %v1079_v4 = vmul.f32 %v1078_v49, %v2536_v28  ;;  %s3066_s9 = sld [smem:[#allocation9 + $0x294]]  ;;  %s3068_s4 = sld [smem:[#allocation9 + $0x95]] }
  0xf7   : > { %v1097_v0 = vadd.f32 %v1096_v45, %v1094_v54  ;;  %v1119_v5 = vmul.f32 %v1118_v60, %v2467_v1  ;;  %v1077_v2 = vadd.f32 %v1076_v43, %v1074_v47  ;;  %v1117_v9 = vadd.f32 %v1116_v59, %v1114_v56 }
  0xf8   : > { %v1122_v11 = vmul.f32 %v1121_v62, %v2481_v3  ;;  %v1124_v13 = vstv %s2989_s29  ;;  %v1102_v14 = vmul.f32 %v1101_v55, %v2500_v12  ;;  %v1105_v15 = vmul.f32 %v1104_v58, %v2536_v28  ;;  %s3074_s29 = sld [smem:[#allocation9 + $0x115]] }
  0xf9   : > { %v1127_v16 = vstv %s2994_s18  ;;  %v1139_v18 = vstv %s2996_s30  ;;  %v1100_v19 = vadd.f32 %v1099_v50, %v1097_v0  ;;  %v1120_v21 = vadd.f32 %v1119_v5, %v1117_v9  ;;  %s3079_s18 = sld [smem:[#allocation9 + $0x314]]  ;;  %s3081_s30 = sld [smem:[#allocation9 + $0x195]] }
  0xfa   : > { %v1140_v23 = vmul.f32 %v3053_v22, %v1139_v18  ;;  %v1141_v24 = vstv %s3002_s8  ;;  %v1125_v26 = vmul.f32 %v1124_v13, %v2494_v8  ;;  %v1144_v30 = vstv %s3008_s17  ;;  %s3086_s8 = sld [smem:[#allocation9 + $0x215]] }
  0xfb   : > { %v1142_v29 = vmul.f32 %v3061_v27, %v1141_v24  ;;  %v1147_v32 = vstv %s3010_s15  ;;  %v3070_v34 = vadd.f32 %v1079_v4, %v1077_v2  ;;  %v1123_v35 = vadd.f32 %v1122_v11, %v1120_v21  ;;  %s3088_s17 = sld [smem:[#allocation9 + $0x295]] }
  0xfc   : > { %v1145_v36 = vmul.f32 %v1144_v30, %v2467_v1  ;;  %v1150_v38 = vstv %s3014_s21  ;;  %v1128_v40 = vmul.f32 %v1127_v16, %v2500_v12  ;;  %v1130_v41 = vstv %s3019_s22  ;;  %s3092_s15 = sld [smem:[#allocation9 + $0x315]]  ;;  %s3094_s21 = sld [smem:[#allocation9 + $0x16]] }
  0xfd   : > { %v1143_v42 = vadd.f32 %v1142_v29, %v1140_v23  ;;  %v1148_v43 = vmul.f32 %v1147_v32, %v2481_v3  ;;  %v1103_v44 = vadd.f32 %v1102_v14, %v1100_v19  ;;  %v1151_v45 = vmul.f32 %v1150_v38, %v2494_v8  ;;  %s3100_s22 = sld [smem:[#allocation9 + $0x96]] }
  0xfe   : > { %v1153_v47 = vstv %s3024_s0  ;;  %v1165_v49 = vstv %s3026_s19  ;;  %v1126_v50 = vadd.f32 %v1125_v26, %v1123_v35  ;;  %v1167_v55 = vstv %s3032_s16  ;;  %s3111_s0 = sld [smem:[#allocation9 + $0x116]]  ;;  %s3118_s16 = sld [smem:[#allocation10]] }
  0xff   : > { %v1146_v53 = vadd.f32 %v1145_v36, %v1143_v42  ;;  %v1166_v54 = vmul.f32 %v3053_v22, %v1165_v49  ;;  %v1131_v56 = vmul.f32 %v1130_v41, %v2536_v28  ;;  %v1168_v57 = vmul.f32 %v3061_v27, %v1167_v55  ;;  %s3116_s19 = sld [smem:[#allocation9 + $0x196]] }
 0x100   : > { %v1170_v58 = vstv %s3038_s2  ;;  %v1173_v59 = vstv %s3040_s20  ;;  %v1154_v62 = vmul.f32 %v1153_v47, %v2500_v12  ;;  %v1176_v0 = vstv %s3044_s13  ;;  %s3123_s2 = sld [smem:[#allocation10 + $0x1]]  ;;  %s3125_s20 = sld [smem:[#allocation10 + $0x2]] }
 0x101   : > { %v1149_v60 = vadd.f32 %v1148_v43, %v1146_v53  ;;  %v1171_v4 = vmul.f32 %v1170_v58, %v2467_v1  ;;  %v3105_v5 = vadd.f32 %v1105_v15, %v1103_v44  ;;  %v1156_v2 = vstv %s3050_s27  ;;  %s3130_s13 = sld [smem:[#allocation10 + $0x3]]  ;;  %s3132_s27 = sld [smem:[#allocation10 + $0x4]] }
 0x102   : > { %v1169_v9 = vadd.f32 %v1168_v57, %v1166_v54  ;;  %v1174_v11 = vmul.f32 %v1173_v59, %v2481_v3  ;;  %v1129_v13 = vadd.f32 %v1128_v40, %v1126_v50  ;;  %v1177_v16 = vmul.f32 %v1176_v0, %v2494_v8 }
 0x103   : > { %v1152_v14 = vadd.f32 %v1151_v45, %v1149_v60  ;;  %v1191_v18 = vstv %s3057_s1  ;;  %v1179_v21 = vstv %s3066_s9  ;;  %v1193_v15 = vstv %s3068_s4  ;;  %s3137_s1 = sld [smem:[#allocation10 + $0x5]]  ;;  %s3139_s9 = sld [smem:[#allocation10 + $0x6]] }
 0x104   : > { %v1172_v19 = vadd.f32 %v1171_v4, %v1169_v9  ;;  %v1192_v23 = vmul.f32 %v3053_v22, %v1191_v18  ;;  %v1157_v26 = vmul.f32 %v1156_v2, %v2536_v28  ;;  %v1194_v29 = vmul.f32 %v3061_v27, %v1193_v15  ;;  %s3145_s4 = sld [smem:[#allocation10 + $0x7]] }
 0x105   : > { %v1155_v24 = vadd.f32 %v1154_v62, %v1152_v14  ;;  %v1196_v30 = vstv %s3074_s29  ;;  %v1182_v35 = vstv %s3079_s18  ;;  %v1199_v38 = vstv %s3081_s30  ;;  %s3147_s29 = sld [smem:[#allocation10 + $0x8]]  ;;  %s3154_s18 = sld [smem:[#allocation10 + $0x9]] }
 0x106   : > { %v1175_v32 = vadd.f32 %v1174_v11, %v1172_v19  ;;  %v1197_v36 = vmul.f32 %v1196_v30, %v2467_v1  ;;  %v1180_v40 = vmul.f32 %v1179_v21, %v2500_v12  ;;  %v1195_v41 = vadd.f32 %v1194_v29, %v1192_v23  ;;  %s3156_s30 = sld [smem:[#allocation10 + $0xa]] }
 0x107   : > { %v1202_v42 = vstv %s3086_s8  ;;  %v1205_v43 = vstv %s3088_s17  ;;  %v3141_v44 = vadd.f32 %v1131_v56, %v1129_v13  ;;  %v1208_v47 = vstv %s3092_s15  ;;  %s3167_s8 = sld [smem:[#allocation10 + $0xb]]  ;;  %s3169_s17 = sld [smem:[#allocation10 + $0xc]] }
 0x108   : > { %v1178_v45 = vadd.f32 %v1177_v16, %v1175_v32  ;;  %v1217_v49 = vstv %s3094_s21  ;;  %v3149_v50 = vadd.f32 %v1157_v26, %v1155_v24  ;;  %v1183_v53 = vmul.f32 %v1182_v35, %v2536_v28  ;;  %s3178_s15 = sld [smem:[#allocation10 + $0xd]]  ;;  %s3186_s21 = sld [smem:[#allocation10 + $0xe]] }
 0x109   : > { %v1200_v54 = vmul.f32 %v1199_v38, %v2481_v3  ;;  %v1219_v55 = vstv %s3100_s22  ;;  %v1198_v56 = vadd.f32 %v1197_v36, %v1195_v41  ;;  %v3159_v57 = vmul.f32 %v1202_v42, %v2494_v8  ;;  %s3188_s22 = sld [smem:[#allocation10 + $0xf]] }
 0x10a   : > { %v3162_v58 = vmul.f32 %v1205_v43, %v2500_v12  ;;  %v3165_v59 = vmul.f32 %v1208_v47, %v2536_v28  ;;  %v665_v60 = vstv %s3118_s16  ;;  %v1181_v62 = vadd.f32 %v1180_v40, %v1178_v45  ;;  %s3198_s16 = sld [smem:[#allocation10 + $0x10]] }
 0x10b   : > { %v3173_v4 = vmul.f32 %v3053_v22, %v1217_v49  ;;  %v3176_v0 = vmul.f32 %v3061_v27, %v1219_v55  ;;  %v3181_v2 = vadd.f32 %v665_v60, %v2593_v7  ;;  %v691_v9 = vstv %s3123_s2  ;;  %s3207_s2 = sld [smem:[#allocation10 + $0x11]] }
 0x10c   : > { %v717_v11 = vstv %s3125_s20  ;;  %v1222_v13 = vstv %s3111_s0  ;;  %v3191_v14 = vadd.f32 %v691_v9, %v2616_v25  ;;  %v743_v18 = vstv %s3130_s13  ;;  %s3209_s20 = sld [smem:[#allocation10 + $0x12]]  ;;  %s3226_s13 = sld [smem:[#allocation10 + $0x13]] }
 0x10d   : > { %v3194_v16 = vadd.f32 %v717_v11, %v2644_v46  ;;  %v769_v19 = vstv %s3132_s27  ;;  %v3201_v7 = vadd.f32 %v743_v18, %v2674_v6  ;;  %v795_v21 = vstv %s3137_s1  ;;  %s3228_s27 = sld [smem:[#allocation10 + $0x14]]  ;;  %s3248_s1 = sld [smem:[#allocation9 + $0x216]] }
 0x10e   : > { %v3204_v23 = vadd.f32 %v1200_v54, %v1198_v56  ;;  %v1225_v15 = vstv %s3116_s19  ;;  %v3212_v25 = vadd.f32 %v769_v19, %v2706_v31  ;;  %v3215_v46 = vadd.f32 %v795_v21, %v2734_v52  ;;  %s3338_s0 = sld [smem:[#allocation12 + $0xd]]  ;;  %s3340_s19 = sld [smem:[#allocation12 + $0xe]] }
 0x10f   : > { %v821_v24 = vstv %s3139_s9  ;;  %v3218_v6 = vadd.f32 %v1183_v53, %v1181_v62  ;;  %v667_v26 = vmax.f32 %v3181_v2, 0.0  ;;  %v693_v29 = vmax.f32 %v3191_v14, 0.0  ;;  %s3258_s9 = sld [smem:[#allocation10 + $0x15]] }
 0x110   : > { %v3223_v30 = vadd.f32 %v821_v24, %v2771_v20  ;;  %v847_v32 = vstv %s3145_s4  ;;  %v719_v31 = vmax.f32 %v3194_v16, 0.0  ;;  %v873_v35 = vstv %s3147_s29  ;;  %s3260_s4 = sld [smem:[#allocation12]]  ;;  %s3268_s29 = sld [smem:[#allocation12 + $0x1]] }
 0x111   : > { %v3232_v52 = vadd.f32 %v847_v32, %v2796_v39  ;;  %v899_v36 = vstv %s3154_s18  ;;  %v745_v38 = vmax.f32 %v3201_v7, 0.0  ;;  %v3238_v40 = vadd.f32 %v873_v35, %v2824_v61  ;;  %s3270_s18 = sld [smem:[#allocation12 + $0x2]] }
 0x112   : > { %v3241_v20 = vadd.f32 %v899_v36, %v2861_v33  ;;  %v925_v41 = vstv %s3156_s30  ;;  %v771_v42 = vmax.f32 %v3212_v25, 0.0  ;;  %v797_v43 = vmax.f32 %v3215_v46, 0.0  ;;  %s3280_s30 = sld [smem:[#allocation12 + $0x3]] }
 0x113   : > { %v951_v39 = vstv %s3167_s8  ;;  %v977_v45 = vstv %s3169_s17  ;;  %v823_v47 = vmax.f32 %v3223_v30, 0.0  ;;  %v849_v49 = vmax.f32 %v3232_v52, 0.0  ;;  %s3282_s8 = sld [smem:[#allocation12 + $0x4]]  ;;  %s3290_s17 = sld [smem:[#allocation12 + $0x5]] }
 0x114   : > { %v3253_v61 = vadd.f32 %v925_v41, %v2886_v51  ;;  %v3256_v33 = vadd.f32 %v951_v39, %v2914_v17  ;;  %v3263_v53 = vadd.f32 %v977_v45, %v2951_v48  ;;  %v1003_v54 = vstv %s3178_s15  ;;  %s3292_s15 = sld [smem:[#allocation12 + $0x6]] }
 0x115   : > { %v1029_v55 = vstv %s3186_s21  ;;  %v1055_v56 = vstv %s3188_s22  ;;  %v875_v51 = vmax.f32 %v3238_v40, 0.0  ;;  %v901_v17 = vmax.f32 %v3241_v20, 0.0  ;;  %s3302_s21 = sld [smem:[#allocation12 + $0x7]]  ;;  %s3304_s22 = sld [smem:[#allocation12 + $0x8]] }
 0x116   : > { %v3275_v60 = vadd.f32 %v1003_v54, %v2976_v10  ;;  %v3278_v62 = vadd.f32 %v1029_v55, %v3004_v37  ;;  %v3285_v48 = vadd.f32 %v1055_v56, %v3034_v63  ;;  %v1081_v9 = vstv %s3198_s16  ;;  %s3312_s16 = sld [smem:[#allocation12 + $0x9]] }
 0x117   : > { %v1107_v11 = vstv %s3207_s2  ;;  %v1133_v18 = vstv %s3209_s20  ;;  %v927_v10 = vmax.f32 %v3253_v61, 0.0  ;;  %v953_v37 = vmax.f32 %v3256_v33, 0.0  ;;  %s3314_s2 = sld [smem:[#allocation12 + $0xa]]  ;;  %s3328_s20 = sld [smem:[#allocation12 + $0xb]] }
 0x118   : > { %v3297_v19 = vadd.f32 %v1081_v9, %v3070_v34  ;;  %v3300_v63 = vadd.f32 %v1107_v11, %v3105_v5  ;;  %v979_v21 = vmax.f32 %v3263_v53, 0.0  ;;  %v3308_v24 = vadd.f32 %v1133_v18, %v3141_v44 }
 0x119   : > { %v1159_v32 = vstv %s3226_s13  ;;  %v1185_v35 = vstv %s3228_s27  ;;  %v1005_v34 = vmax.f32 %v3275_v60, 0.0  ;;  %v1031_v5 = vmax.f32 %v3278_v62, 0.0  ;;  %s3330_s13 = sld [smem:[#allocation12 + $0xc]]  ;;  %s3348_s27 = sld [smem:[#allocation12 + $0xf]] }
 0x11a   : > { %v3321_v36 = vmul.f32 %v1222_v13, %v2467_v1  ;;  %v3326_v44 = vmul.f32 %v1225_v15, %v2481_v3  ;;  %v668_v41 = vstv %s3260_s4  ;;  %v1057_v39 = vmax.f32 %v3285_v48, 0.0  ;;  %s3350_s4 = sld [smem:[#allocation12 + $0x10]] }
 0x11b   : > { %v1083_v45 = vmax.f32 %v3297_v19, 0.0  ;;  %v3336_v54 = vadd.f32 %v1159_v32, %v3149_v50  ;;  %v694_v13 = vstv %s3268_s29  ;;  %v720_v15 = vstv %s3270_s18  ;;  %s3357_s29 = sld [smem:[#allocation12 + $0x11]]  ;;  %s3359_s18 = sld [smem:[#allocation12 + $0x12]] }
 0x11c   : > { %v1109_v55 = vmax.f32 %v3300_v63, 0.0  ;;  %v3346_v56 = vadd.f32 %v1185_v35, %v3218_v6  ;;  %v746_v50 = vstv %s3280_s30  ;;  %v772_v48 = vstv %s3282_s8  ;;  %s3368_s30 = sld [smem:[#allocation9 + $0x296]]  ;;  %s3370_s8 = sld [smem:[#allocation12 + $0x13]] }
 0x11d   : > { %v1135_v9 = vmax.f32 %v3308_v24, 0.0  ;;  %v1204_v11 = vadd.f32 %v3159_v57, %v3204_v23  ;;  %v3363_v6 = vmul.f32 %v668_v41, %v667_v26  ;;  %v798_v18 = vstv %s3290_s17  ;;  %s3382_s17 = sld [smem:[#allocation9 + $0x316]] }
 0x11e   : > { %v824_v19 = vstv %s3292_s15  ;;  %v1211_v63 = vstv %s3258_s9  ;;  %v3374_v57 = vmul.f32 %v694_v13, %v693_v29  ;;  %v3378_v23 = vmul.f32 %v720_v15, %v719_v31  ;;  %s3394_s15 = sld [smem:[#allocation9 + $0x17]] }
 0x11f   : > { %v850_v2 = vstv %s3302_s21  ;;  %v1161_v26 = vmax.f32 %v3336_v54, 0.0  ;;  %v3386_v24 = vmul.f32 %v746_v50, %v745_v38  ;;  %v3390_v14 = vmul.f32 %v772_v48, %v771_v42  ;;  %s3396_s21 = sld [smem:[#allocation12 + $0x14]]  ;;  %s3523_s9 = sld [smem:[#allocation10 + $0x17]] }
 0x120   : > { %v876_v29 = vstv %s3304_s22  ;;  %v902_v16 = vstv %s3312_s16  ;;  %v3400_v31 = vmul.f32 %v798_v18, %v797_v43  ;;  %v3404_v7 = vmul.f32 %v824_v19, %v823_v47  ;;  %s3408_s22 = sld [smem:[#allocation9 + $0x97]] }
 0x121   : > { %v928_v38 = vstv %s3314_s2  ;;  %v954_v25 = vstv %s3328_s20  ;;  %s3410_s16 = sld [smem:[#allocation9 + $0x117]]  ;;  %v3414_v42 = vmul.f32 %v850_v2, %v849_v49  ;;  %v980_v32 = vstv %s3330_s13 }
 0x122   : > { %v1006_v46 = vstv %s3338_s0  ;;  %v1032_v43 = vstv %s3340_s19  ;;  %v3421_v30 = vmul.f32 %v876_v29, %v875_v51  ;;  %v3425_v47 = vmul.f32 %v902_v16, %v901_v17  ;;  %s3429_s2 = sld [smem:[#allocation9 + $0x197]]  ;;  %s3445_s0 = sld [smem:[#allocation2]] }
 0x123   : > { %v1058_v35 = vstv %s3348_s27  ;;  %v1084_v41 = vstv %s3350_s4  ;;  %s3431_s20 = sld [smem:[#allocation9 + $0x217]]  ;;  %v3435_v52 = vmul.f32 %v928_v38, %v927_v10  ;;  %v3439_v40 = vmul.f32 %v954_v25, %v953_v37  ;;  %s3460_s19 = sld [smem:[#allocation10 + $0x16]] }
 0x124   : > { %v1110_v49 = vstv %s3357_s29  ;;  %v1136_v51 = vstv %s3359_s18  ;;  %s3443_s13 = sld [smem:[#allocation9 + $0x297]]  ;;  %v3449_v20 = vmul.f32 %v980_v32, %v979_v21  ;;  %v3453_v61 = vmul.f32 %v1006_v46, %v1005_v34  ;;  %s3462_s27 = sld [smem:[#allocation12 + $0x15]] }
 0x125   : > { %v3457_v33 = vmul.f32 %v1032_v43, %v1031_v5  ;;  %v1162_v17 = vstv %s3370_s8  ;;  %v3464_v10 = vmul.f32 %v1058_v35, %v1057_v39  ;;  %v3466_v53 = vmul.f32 %v1084_v41, %v1083_v45  ;;  %s3471_s4 = sld [smem:[#allocation9 + $0x317]]  ;;  %s3484_s29 = sld [smem:[#allocation9 + $0x18]] }
 0x126   : > { %v3468_v37 = vmul.f32 %v1110_v49, %v1109_v55  ;;  %v1207_v60 = vadd.f32 %v3162_v58, %v1204_v11  ;;  %v3473_v62 = vmul.f32 %v1136_v51, %v1135_v9  ;;  %v1221_v21 = vadd.f32 %v3176_v0, %v3173_v4  ;;  %s3486_s18 = sld [smem:[#allocation9 + $0x98]] }
 0x127   : > { %v1228_v34 = vstv %s3248_s1  ;;  %v1231_v5 = vstv %s3368_s30  ;;  %v3479_v39 = vmul.f32 %v1162_v17, %v1161_v26  ;;  %v1187_v45 = vmax.f32 %v3346_v56, 0.0  ;;  %s3492_s1 = sld [smem:[#allocation9 + $0x118]] }
 0x128   : > { %v1210_v54 = vadd.f32 %v3165_v59, %v1207_v60  ;;  %v1234_v58 = vstv %s3382_s17  ;;  %v1188_v13 = vstv %s3396_s21  ;;  %v1224_v4 = vadd.f32 %v3321_v36, %v1221_v21  ;;  %s3498_s30 = sld [smem:[#allocation9 + $0x198]]  ;;  %s3577_s21 = sld [smem:[#allocation9 + $0x319]] }
 0x129   : > { %v1229_v0 = vmul.f32 %v1228_v34, %v2494_v8  ;;  %v1232_v15 = vmul.f32 %v1231_v5, %v2500_v12  ;;  %v1235_v55 = vmul.f32 %v1234_v58, %v2536_v28  ;;  %v1243_v50 = vstv %s3394_s15  ;;  %s3504_s8 = sld [smem:[#allocation9 + $0x218]]  ;;  %s3513_s15 = sld [smem:[#allocation12 + $0x16]] }
 0x12a   : > { %v1245_v59 = vstv %s3408_s22  ;;  %v1248_v48 = vstv %s3410_s16  ;;  %v644_v9 = vstv %s3445_s0  ;;  %v1227_v11 = vadd.f32 %v3326_v44, %v1224_v4  ;;  %s3511_s17 = sld [smem:[#allocation9 + $0x298]]  ;;  %s3527_s16 = sld [smem:[#allocation9 + $0x19]] }
 0x12b   : > { %v1244_v36 = vmul.f32 %v3053_v22, %v1243_v50  ;;  %v1246_v18 = vmul.f32 %v3061_v27, %v1245_v59  ;;  %v670_v19 = vadd.f32 %v3363_v6, %v644_v9  ;;  %v1212_v2 = vadd.f32 %v1211_v63, %v1210_v54  ;;  %s3517_s22 = sld [smem:[#allocation9 + $0x318]]  ;;  %s3544_s0 = sld [smem:[#allocation9 + $0x219]] }
 0x12c   : > { %v1249_v26 = vmul.f32 %v1248_v48, %v2467_v1  ;;  %v1251_v29 = vstv %s3429_s2  ;;  %v1230_v44 = vadd.f32 %v1229_v0, %v1227_v11  ;;  %v1254_v25 = vstv %s3431_s20  ;;  %s3532_s2 = sld [smem:[#allocation9 + $0x99]] }
 0x12d   : > { %v1247_v16 = vadd.f32 %v1246_v18, %v1244_v36  ;;  %v1252_v38 = vmul.f32 %v1251_v29, %v2481_v3  ;;  %v696_v32 = vadd.f32 %v3374_v57, %v670_v19  ;;  %v1214_v6 = vstv %s3462_s27  ;;  %s3534_s20 = sld [smem:[#allocation9 + $0x119]]  ;;  %s3550_s27 = sld [smem:[#allocation10 + $0x18]] }
 0x12e   : > { %v1237_v46 = vstv %s3460_s19  ;;  %v1257_v63 = vstv %s3443_s13  ;;  %v1233_v43 = vadd.f32 %v1232_v15, %v1230_v44  ;;  %v1255_v41 = vmul.f32 %v1254_v25, %v2494_v8  ;;  %s3538_s13 = sld [smem:[#allocation9 + $0x199]] }
 0x12f   : > { %v1250_v35 = vadd.f32 %v1249_v26, %v1247_v16  ;;  %v1260_v49 = vstv %s3471_s4  ;;  %v722_v51 = vadd.f32 %v3378_v23, %v696_v32  ;;  %v1213_v17 = vmax.f32 %v1212_v2, 0.0  ;;  %s3546_s19 = sld [smem:[#allocation9 + $0x299]]  ;;  %s3555_s4 = sld [smem:[#allocation12 + $0x17]] }
 0x130   : > { %v1258_v57 = vmul.f32 %v1257_v63, %v2500_v12  ;;  %v1261_v60 = vmul.f32 %v1260_v49, %v2536_v28  ;;  %v1236_v21 = vadd.f32 %v1235_v55, %v1233_v43  ;;  %v1269_v5 = vstv %s3484_s29  ;;  %s3557_s29 = sld [smem:[#allocation12 + $0x18]] }
 0x131   : > { %v1253_v34 = vadd.f32 %v1252_v38, %v1250_v35  ;;  %v1271_v54 = vstv %s3486_s18  ;;  %v748_v58 = vadd.f32 %v3386_v24, %v722_v51  ;;  %v1270_v23 = vmul.f32 %v3053_v22, %v1269_v5  ;;  %s3570_s18 = sld [smem:[#allocation9 + $0x1a]] }
 0x132   : > { %v1272_v4 = vmul.f32 %v3061_v27, %v1271_v54  ;;  %v1274_v0 = vstv %s3492_s1  ;;  %v1238_v15 = vadd.f32 %v1237_v46, %v1236_v21  ;;  %v1277_v59 = vstv %s3498_s30  ;;  %s3572_s1 = sld [smem:[#allocation9 + $0x9a]] }
 0x133   : > { %v1256_v55 = vadd.f32 %v1255_v41, %v1253_v34  ;;  %v1275_v50 = vmul.f32 %v1274_v0, %v2467_v1  ;;  %v774_v24 = vadd.f32 %v3390_v14, %v748_v58  ;;  %v1278_v9 = vmul.f32 %v1277_v59, %v2481_v3  ;;  %s3582_s30 = sld [smem:[#allocation9 + $0x11a]] }
 0x134   : > { %v1273_v48 = vadd.f32 %v1272_v4, %v1270_v23  ;;  %v1280_v11 = vstv %s3504_s8  ;;  %v3563_v36 = vmul.f32 %v1188_v13, %v1187_v45  ;;  %v1240_v18 = vstv %s3513_s15  ;;  %s3584_s8 = sld [smem:[#allocation9 + $0x19a]] }
 0x135   : > { %v1259_v19 = vadd.f32 %v1258_v57, %v1256_v55  ;;  %v1283_v2 = vstv %s3511_s17  ;;  %v800_v14 = vadd.f32 %v3400_v31, %v774_v24  ;;  %v1281_v29 = vmul.f32 %v1280_v11, %v2494_v8  ;;  %s3590_s17 = sld [smem:[#allocation9 + $0x21a]] }
 0x136   : > { %v1276_v26 = vadd.f32 %v1275_v50, %v1273_v48  ;;  %v1286_v44 = vstv %s3517_s22  ;;  %v3574_v56 = vmul.f32 %v1214_v6, %v1213_v17  ;;  %v1239_v45 = vmax.f32 %v1238_v15, 0.0  ;;  %s3595_s15 = sld [smem:[#allocation9 + $0x29a]]  ;;  %s3600_s22 = sld [smem:[#allocation10 + $0x19]] }
 0x137   : > { %v1262_v13 = vadd.f32 %v1261_v60, %v1259_v19  ;;  %v1263_v16 = vstv %s3523_s9  ;;  %v826_v38 = vadd.f32 %v3404_v7, %v800_v14  ;;  %v1284_v25 = vmul.f32 %v1283_v2, %v2500_v12  ;;  %s3604_s9 = sld [smem:[#allocation12 + $0x19]] }
 0x138   : > { %v1279_v31 = vadd.f32 %v1278_v9, %v1276_v26  ;;  %v1295_v32 = vstv %s3527_s16  ;;  %v1287_v6 = vmul.f32 %v1286_v44, %v2536_v28  ;;  %v1297_v63 = vstv %s3532_s2  ;;  %s3611_s16 = sld [smem:[#allocation9 + $0x31a]]  ;;  %s3613_s2 = sld [smem:[#allocation9 + $0x1b]] }
 0x139   : > { %v1296_v46 = vmul.f32 %v3053_v22, %v1295_v32  ;;  %v1300_v43 = vstv %s3534_s20  ;;  %v852_v7 = vadd.f32 %v3414_v42, %v826_v38  ;;  %v1298_v41 = vmul.f32 %v3061_v27, %v1297_v63  ;;  %s3617_s20 = sld [smem:[#allocation9 + $0x9b]] }
 0x13a   : > { %v1282_v35 = vadd.f32 %v1281_v29, %v1279_v31  ;;  %v1301_v49 = vmul.f32 %v1300_v43, %v2467_v1  ;;  %v1264_v51 = vadd.f32 %v1263_v16, %v1262_v13  ;;  %v1303_v17 = vstv %s3538_s13  ;;  %s3619_s13 = sld [smem:[#allocation9 + $0x11b]] }
 0x13b   : > { %v1306_v57 = vstv %s3544_s0  ;;  %v1309_v60 = vstv %s3546_s19  ;;  %v878_v21 = vadd.f32 %v3421_v30, %v852_v7  ;;  %v1299_v42 = vadd.f32 %v1298_v41, %v1296_v46  ;;  %s3627_s0 = sld [smem:[#allocation9 + $0x19b]] }
 0x13c   : > { %v1285_v34 = vadd.f32 %v1284_v25, %v1282_v35  ;;  %v1304_v5 = vmul.f32 %v1303_v17, %v2481_v3  ;;  %v3606_v54 = vmul.f32 %v1240_v18, %v1239_v45  ;;  %v1266_v58 = vstv %s3555_s4  ;;  %s3629_s19 = sld [smem:[#allocation9 + $0x21b]]  ;;  %s3639_s4 = sld [smem:[#allocation10 + $0x1a]] }
 0x13d   : > { %v1289_v23 = vstv %s3550_s27  ;;  %v1292_v4 = vstv %s3557_s29  ;;  %v904_v30 = vadd.f32 %v3425_v47, %v878_v21  ;;  %v1302_v15 = vadd.f32 %v1301_v49, %v1299_v42  ;;  %s3634_s27 = sld [smem:[#allocation9 + $0x29b]]  ;;  %s3700_s29 = sld [smem:[#allocation9 + $0x11d]] }
 0x13e   : > { %v1288_v0 = vadd.f32 %v1287_v6, %v1285_v34  ;;  %v1307_v55 = vmul.f32 %v1306_v57, %v2494_v8  ;;  %v1265_v50 = vmax.f32 %v1264_v51, 0.0  ;;  %v1310_v59 = vmul.f32 %v1309_v60, %v2500_v12 }
 0x13f   : > { %v1321_v24 = vstv %s3570_s18  ;;  %v1323_v48 = vstv %s3572_s1  ;;  %v930_v9 = vadd.f32 %v3435_v52, %v904_v30  ;;  %v1305_v11 = vadd.f32 %v1304_v5, %v1302_v15  ;;  %s3641_s18 = sld [smem:[#allocation12 + $0x1a]]  ;;  %s3650_s1 = sld [smem:[#allocation9 + $0x31b]] }
 0x140   : > { %v1312_v47 = vstv %s3577_s21  ;;  %v1322_v18 = vmul.f32 %v3053_v22, %v1321_v24  ;;  %v1290_v19 = vadd.f32 %v1289_v23, %v1288_v0  ;;  %v1324_v2 = vmul.f32 %v3061_v27, %v1323_v48  ;;  %s3652_s21 = sld [smem:[#allocation9 + $0x1c]] }
 0x141   : > { %v1326_v14 = vstv %s3582_s30  ;;  %v1329_v26 = vstv %s3584_s8  ;;  %v956_v29 = vadd.f32 %v3439_v40, %v930_v9  ;;  %v1308_v52 = vadd.f32 %v1307_v55, %v1305_v11  ;;  %s3656_s30 = sld [smem:[#allocation9 + $0x9c]] }
 0x142   : > { %v1327_v44 = vmul.f32 %v1326_v14, %v2467_v1  ;;  %v1332_v45 = vstv %s3590_s17  ;;  %v3643_v13 = vmul.f32 %v1266_v58, %v1265_v50  ;;  %v1325_v16 = vadd.f32 %v1324_v2, %v1322_v18  ;;  %s3662_s8 = sld [smem:[#allocation9 + $0x11c]] }
 0x143   : > { %v1330_v38 = vmul.f32 %v1329_v26, %v2481_v3  ;;  %v1335_v31 = vstv %s3595_s15  ;;  %v982_v25 = vadd.f32 %v3449_v20, %v956_v29  ;;  %v1311_v40 = vadd.f32 %v1310_v59, %v1308_v52  ;;  %s3664_s17 = sld [smem:[#allocation9 + $0x19c]] }
 0x144   : > { %v1313_v32 = vmul.f32 %v1312_v47, %v2536_v28  ;;  %v1315_v6 = vstv %s3600_s22  ;;  %v1291_v46 = vmax.f32 %v1290_v19, 0.0  ;;  %v1318_v63 = vstv %s3604_s9  ;;  %s3672_s15 = sld [smem:[#allocation9 + $0x21c]]  ;;  %s3777_s9 = sld [smem:[#allocation9 + $0x1f]] }
 0x145   : > { %v1328_v43 = vadd.f32 %v1327_v44, %v1325_v16  ;;  %v1333_v7 = vmul.f32 %v1332_v45, %v2494_v8  ;;  %v1008_v35 = vadd.f32 %v3453_v61, %v982_v25  ;;  %v1336_v20 = vmul.f32 %v1335_v31, %v2500_v12  ;;  %s3674_s22 = sld [smem:[#allocation9 + $0x29c]] }
 0x146   : > { %v1338_v41 = vstv %s3611_s16  ;;  %v1347_v49 = vstv %s3613_s2  ;;  %v1349_v57 = vstv %s3617_s20  ;;  %v1352_v60 = vstv %s3619_s13  ;;  %s3679_s16 = sld [smem:[#allocation10 + $0x1b]]  ;;  %s3684_s2 = sld [smem:[#allocation9 + $0x31c]] }
 0x147   : > { %v1331_v51 = vadd.f32 %v1330_v38, %v1328_v43  ;;  %v1348_v17 = vmul.f32 %v3053_v22, %v1347_v49  ;;  %v1034_v21 = vadd.f32 %v3457_v33, %v1008_v35  ;;  %v1314_v61 = vadd.f32 %v1313_v32, %v1311_v40  ;;  %s3692_s20 = sld [smem:[#allocation9 + $0x1d]] }
 0x148   : > { %v1350_v34 = vmul.f32 %v3061_v27, %v1349_v57  ;;  %v1353_v42 = vmul.f32 %v1352_v60, %v2467_v1  ;;  %v1339_v58 = vmul.f32 %v1338_v41, %v2536_v28  ;;  %v1355_v23 = vstv %s3627_s0  ;;  %s3698_s13 = sld [smem:[#allocation9 + $0x9d]] }
 0x149   : > { %v1334_v5 = vadd.f32 %v1333_v7, %v1331_v51  ;;  %v1358_v30 = vstv %s3629_s19  ;;  %v1060_v33 = vadd.f32 %v3464_v10, %v1034_v21  ;;  %v1356_v15 = vmul.f32 %v1355_v23, %v2481_v3  ;;  %s3708_s0 = sld [smem:[#allocation9 + $0x19d]] }
 0x14a   : > { %v1351_v0 = vadd.f32 %v1350_v34, %v1348_v17  ;;  %v1361_v55 = vstv %s3634_s27  ;;  %v3688_v50 = vmul.f32 %v1292_v4, %v1291_v46  ;;  %v1341_v24 = vstv %s3639_s4  ;;  %s3710_s19 = sld [smem:[#allocation9 + $0x21d]] }
 0x14b   : > { %v1337_v59 = vadd.f32 %v1336_v20, %v1334_v5  ;;  %v1344_v48 = vstv %s3641_s18  ;;  %v1086_v9 = vadd.f32 %v3466_v53, %v1060_v33  ;;  %v3695_v10 = vadd.f32 %v1315_v6, %v1314_v61  ;;  %s3718_s27 = sld [smem:[#allocation9 + $0x29d]]  ;;  %s3784_s18 = sld [smem:[#allocation9 + $0x11f]] }
 0x14c   : > { %v1354_v11 = vadd.f32 %v1353_v42, %v1351_v0  ;;  %v1359_v47 = vmul.f32 %v1358_v30, %v2494_v8  ;;  %v1362_v18 = vmul.f32 %v1361_v55, %v2500_v12  ;;  %v1364_v19 = vstv %s3650_s1  ;;  %s3720_s4 = sld [smem:[#allocation9 + $0x31d]]  ;;  %s3725_s1 = sld [smem:[#allocation10 + $0x1c]] }
 0x14d   : > { %v1340_v4 = vadd.f32 %v1339_v58, %v1337_v59  ;;  %v1373_v2 = vstv %s3652_s21  ;;  %v1112_v14 = vadd.f32 %v3468_v37, %v1086_v9  ;;  %v1375_v29 = vstv %s3656_s30  ;;  %s3732_s21 = sld [smem:[#allocation9 + $0x1e]] }
 0x14e   : > { %v1357_v26 = vadd.f32 %v1356_v15, %v1354_v11  ;;  %v1374_v53 = vmul.f32 %v3053_v22, %v1373_v2  ;;  %v1376_v44 = vmul.f32 %v3061_v27, %v1375_v29  ;;  %v1378_v45 = vstv %s3662_s8  ;;  %s3734_s30 = sld [smem:[#allocation9 + $0x9e]]  ;;  %v2014_v29 = vld [vmem:[%s2431_s14] sm:$0xff] }
 0x14f   : > { %v1342_v52 = vadd.f32 %v1341_v24, %v1340_v4  ;;  %v1381_v16 = vstv %s3664_s17  ;;  %v1138_v38 = vadd.f32 %v3473_v62, %v1112_v14  ;;  %v1365_v37 = vmul.f32 %v1364_v19, %v2536_v28  ;;  %s3739_s8 = sld [smem:[#allocation9 + $0x11e]] }
 0x150   : > { %v1360_v31 = vadd.f32 %v1359_v47, %v1357_v26  ;;  %v1379_v25 = vmul.f32 %v1378_v45, %v2467_v1  ;;  %v1377_v40 = vadd.f32 %v1376_v44, %v1374_v53  ;;  %v1382_v32 = vmul.f32 %v1381_v16, %v2481_v3  ;;  %s3744_s17 = sld [smem:[#allocation9 + $0x19e]]  ;;  %v2015_v44 = vld [vmem:[%s2431_s14 + $0x8] sm:$0xff]  ;;  %s3807_s14 = sld [smem:[#allocation9 + $0x31f]] }
 0x151   : > { %v1384_v6 = vstv %s3672_s15  ;;  %v1387_v46 = vstv %s3674_s22  ;;  %v1164_v43 = vadd.f32 %v3479_v39, %v1138_v38  ;;  %v1317_v62 = vmax.f32 %v3695_v10, 0.0  ;;  %s3751_s15 = sld [smem:[#allocation9 + $0x21e]]  ;;  %s3753_s22 = sld [smem:[#allocation12 + $0x1b]] }
 0x152   : > { %v1363_v7 = vadd.f32 %v1362_v18, %v1360_v31  ;;  %v1367_v35 = vstv %s3679_s16  ;;  %v1343_v20 = vmax.f32 %v1342_v52, 0.0  ;;  %v1380_v41 = vadd.f32 %v1379_v25, %v1377_v40  ;;  %s3758_s16 = sld [smem:[#allocation9 + $0x29e]] }
 0x153   : > { %v1385_v49 = vmul.f32 %v1384_v6, %v2494_v8  ;;  %v1390_v51 = vstv %s3684_s2  ;;  %v1190_v17 = vadd.f32 %v3563_v36, %v1164_v43  ;;  %v1388_v39 = vmul.f32 %v1387_v46, %v2500_v12  ;;  %s3760_s2 = sld [smem:[#allocation12 + $0x1c]] }
 0x154   : > { %v1366_v57 = vadd.f32 %v1365_v37, %v1363_v7  ;;  %v1391_v60 = vmul.f32 %v1390_v51, %v2536_v28  ;;  %v1383_v21 = vadd.f32 %v1382_v32, %v1380_v41  ;;  %v1399_v61 = vstv %s3692_s20  ;;  %s3766_s20 = sld [smem:[#allocation9 + $0x31e]] }
 0x155   : > { %v1401_v34 = vstv %s3698_s13  ;;  %v1404_v42 = vstv %s3700_s29  ;;  %v1216_v5 = vadd.f32 %v3574_v56, %v1190_v17  ;;  %v1400_v36 = vmul.f32 %v3053_v22, %v1399_v61  ;;  %s3768_s13 = sld [smem:[#allocation10 + $0x1d]]  ;;  %s3779_s29 = sld [smem:[#allocation9 + $0x9f]] }
 0x156   : > { %v3747_v58 = vadd.f32 %v1367_v35, %v1366_v57  ;;  %v1402_v23 = vmul.f32 %v3061_v27, %v1401_v34  ;;  %v1386_v30 = vadd.f32 %v1385_v49, %v1383_v21  ;;  %v1405_v33 = vmul.f32 %v1404_v42, %v2467_v1 }
 0x157   : > { %v1407_v0 = vstv %s3708_s0  ;;  %v1410_v15 = vstv %s3710_s19  ;;  %v1242_v22 = vadd.f32 %v3606_v54, %v1216_v5  ;;  %v1319_v27 = vmul.f32 %v1318_v63, %v1317_v62  ;;  %s3789_s0 = sld [smem:[#allocation9 + $0x19f]] }
 0x158   : > { %v1403_v56 = vadd.f32 %v1402_v23, %v1400_v36  ;;  %v1408_v55 = vmul.f32 %v1407_v0, %v2481_v3  ;;  %v1345_v59 = vmul.f32 %v1344_v48, %v1343_v20  ;;  %v1389_v24 = vadd.f32 %v1388_v39, %v1386_v30  ;;  %s3791_s19 = sld [smem:[#allocation9 + $0x21f]] }
 0x159   : > { %v1413_v9 = vstv %s3718_s27  ;;  %v1416_v10 = vstv %s3720_s4  ;;  %v1268_v11 = vadd.f32 %v3643_v13, %v1242_v22  ;;  %v1393_v47 = vstv %s3725_s1  ;;  %s3798_s27 = sld [smem:[#allocation9 + $0x29f]]  ;;  %s3803_s4 = sld [smem:[#allocation10 + $0x1e]] }
 0x15a   : > { %v1406_v54 = vadd.f32 %v1405_v33, %v1403_v56  ;;  %v1411_v63 = vmul.f32 %v1410_v15, %v2494_v8  ;;  %v1369_v4 = vmax.f32 %v3747_v58, 0.0  ;;  %v1392_v48 = vadd.f32 %v1391_v60, %v1389_v24  ;;  %s3809_s1 = sld [smem:[#allocation12 + $0x1d]] }
 0x15b   : > { %v1414_v18 = vmul.f32 %v1413_v9, %v2500_v12  ;;  %v1417_v19 = vmul.f32 %v1416_v10, %v2536_v28  ;;  %v1294_v13 = vadd.f32 %v3688_v50, %v1268_v11  ;;  %v1425_v14 = vstv %s3732_s21  ;;  %s3818_s21 = sld [smem:[#allocation12 + $0x1e]] }
 0x15c   : > { %v1409_v2 = vadd.f32 %v1408_v55, %v1406_v54  ;;  %v1427_v26 = vstv %s3734_s30  ;;  %v1394_v53 = vadd.f32 %v1393_v47, %v1392_v48  ;;  %v1426_v52 = vmul.f32 %v2014_v29, %v1425_v14  ;;  %s1890_s30 = sld [smem:[#allocation10 + $0x1f]] }
 0x15d   : > { %v1428_v45 = vmul.f32 %v2015_v44, %v1427_v26  ;;  %v1430_v16 = vstv %s3739_s8  ;;  %v1320_v38 = vadd.f32 %v1319_v27, %v1294_v13  ;;  %v1433_v37 = vstv %s3744_s17  ;;  %s1921_s8 = sld [smem:[#allocation12 + $0x1f]]  ;;  %s1924_s17 = sshll.u32 %s2269_s5, 7 }
 0x15e   : > { %v1412_v50 = vadd.f32 %v1411_v63, %v1409_v2  ;;  %v1431_v31 = vmul.f32 %v1430_v16, %v2467_v1  ;;  %v1370_v25 = vstv %s3753_s22  ;;  %v1434_v32 = vmul.f32 %v1433_v37, %v2481_v3  ;;  %s2209_s5 = smov [#allocation13]  }
 0x15f   : > { %v1429_v40 = vadd.f32 %v1428_v45, %v1426_v52  ;;  %v1436_v6 = vstv %s3751_s15  ;;  %v1396_v46 = vstv %s3760_s2  ;;  %v1439_v62 = vstv %s3758_s16  ;;  %s3921_s15 = sshll.u32 %s2427_s3, 3 }
 0x160   : > { %v1415_v43 = vadd.f32 %v1414_v18, %v1412_v50  ;;  %v1419_v7 = vstv %s3768_s13  ;;  %v1437_v20 = vmul.f32 %v1436_v6, %v2494_v8  ;;  %v1442_v41 = vstv %s3766_s20  ;;  %s345_s22 = scalar_lea.vmem [#allocation13], %s3921_s15  ;;  %s3840_s13 = scalar_lea.hbm %s3890_s6, %s1924_s17 }
 0x161   : > { %v1432_v35 = vadd.f32 %v1431_v31, %v1429_v40  ;;  %v1346_v49 = vadd.f32 %v1345_v59, %v1320_v38  ;;  %v1371_v51 = vmul.f32 %v1370_v25, %v1369_v4  ;;  %v1395_v17 = vmax.f32 %v1394_v53, 0.0  ;;  %v1477_v38 = vld [vmem:[%s2441_s12] sm:$0xff]  ;;  %s1495_s16 = sshll.u32 %s345_s22, 4  ;;  %s1482_s12 = scalar_lea.sflag [#allocation5], %s2427_s3  ;;  %s3842_s16 = int_to_ptr.vmem [resolvable:$true] %s1495_s16 }
 0x162   : > { %v1418_v57 = vadd.f32 %v1417_v19, %v1415_v43  ;;  %v1440_v60 = vmul.f32 %v1439_v62, %v2500_v12  ;;  %v1451_v21 = vstv %s3777_s9  ;;  %v1453_v61 = vstv %s3779_s29  ;;  %s2121_s9 = scalar_lea.vmem %s3842_s16, 128  ;;  %s2125_s29 = sshll.u32 %s2209_s5, 4  ;;  %s2126_s29 = int_to_ptr.vmem [resolvable:$false] %s2125_s29 }
 0x163   : > { %v1435_v39 = vadd.f32 %v1434_v32, %v1432_v35  ;;  %v1443_v42 = vmul.f32 %v1442_v41, %v2536_v28  ;;  %v1452_v5 = vmul.f32 %v2014_v29, %v1451_v21  ;;  %v1454_v58 = vmul.f32 %v2015_v44, %v1453_v61  ;;  %p2122_p6 = scmp.ne.s32.totalorder %s3842_s16, %s2121_s9  ;;  %p2128_p9 = scmp.lt.s32.totalorder %s3842_s16, %s2126_s29 }
 0x164   : > { %v1420_v34 = vadd.f32 %v1419_v7, %v1418_v57  ;;  %v1456_v23 = vstv %s3784_s18  ;;  %v1459_v30 = vstv %s3789_s0  ;;  %v1462_v33 = vstv %s3791_s19  ;;  %s2127_s18 = scalar_lea.vmem %s2126_s29, 256 }
 0x165   : > { %v1438_v36 = vadd.f32 %v1437_v20, %v1435_v39  ;;  %v1455_v0 = vadd.f32 %v1454_v58, %v1452_v5  ;;  %v1457_v15 = vmul.f32 %v1456_v23, %v2467_v1  ;;  %v1460_v22 = vmul.f32 %v1459_v30, %v2481_v3  ;;  %p2123_p8 = pnand %p2122_p6, %p3922_p3  ;;  %p2129_p4 = scmp.lt.s32.totalorder %s2127_s18, %s2121_s9 }
 0x166   : > { %v1372_v27 = vadd.f32 %v1371_v51, %v1346_v49  ;;  %v1397_v56 = vmul.f32 %v1396_v46, %v1395_v17  ;;  %v1465_v59 = vstv %s3798_s27  ;;  %v1421_v24 = vmax.f32 %v1420_v34, 0.0 }
 0x167   : > { %v1441_v55 = vadd.f32 %v1440_v60, %v1438_v36  ;;  %v1445_v9 = vstv %s3803_s4  ;;  %v1458_v10 = vadd.f32 %v1457_v15, %v1455_v0  ;;  %v1463_v11 = vmul.f32 %v1462_v33, %v2494_v8  ;;  %p2124_p10 = pneg %p2123_p8  ;;  %p2130_p0 = por %p2129_p4, %p2128_p9 }
 0x168   : > { %v1422_v47 = vstv %s3809_s1  ;;  %v1468_v63 = vstv %s3807_s14  ;;  %v1466_v48 = vmul.f32 %v1465_v59, %v2500_v12  ;;  %v1398_v3 = vadd.f32 %v1397_v56, %v1372_v27 }
 0x169   : > { %v1444_v54 = vadd.f32 %v1443_v42, %v1441_v55  ;;  %v1461_v4 = vadd.f32 %v1460_v22, %v1458_v10  ;;  %v1423_v18 = vmul.f32 %v1422_v47, %v1421_v24  ;;  %v1469_v13 = vmul.f32 %v1468_v63, %v2536_v28  ;;  %p2131_p11 = pnand %p2130_p0, %p2124_p10 }
 0x16a   : > { %v1448_v14 = vstv %s3818_s21  ;;  %v1471_v8 = vstv %s1890_s30  ;;  %v1474_v12 = vstv %s1921_s8  ;;  %vm1478_vm0 = vcmp.ne.s32.totalorder %v1477_v38, 0 }
 0x16b   : > { %v1446_v1 = vadd.f32 %v1445_v9, %v1444_v54  ;;  %v1464_v19 = vadd.f32 %v1463_v11, %v1461_v4  ;;  %v1424_v53 = vadd.f32 %v1423_v18, %v1398_v3 }
 0x16d   : > { %v1447_v2 = vmax.f32 %v1446_v1, 0.0  ;;  %v1467_v26 = vadd.f32 %v1466_v48, %v1464_v19 }
 0x16f   : > { %v1449_v29 = vmul.f32 %v1448_v14, %v1447_v2  ;;  %v1470_v52 = vadd.f32 %v1469_v13, %v1467_v26 }
 0x171   : > { %v1472_v44 = vadd.f32 %v1471_v8, %v1470_v52  ;;  %v1450_v45 = vadd.f32 %v1449_v29, %v1424_v53 }
 0x173   : > { %v1473_v16 = vmax.f32 %v1472_v44, 0.0 }
 0x175   : > { %v1475_v50 = vmul.f32 %v1474_v12, %v1473_v16 }
 0x177   : > { %v1476_v28 = vadd.f32 %v1475_v50, %v1450_v45 }
 0x179   : > { %v1479_v31 = vsel %vm1478_vm0, 0.0, %v1476_v28 }
 0x17a   : > { %1480 = vst [vmem:[%s345_s22] sm:$0xff] %v1479_v31 }
 0x17b   : > { %2134 = shalt.err (!%p2131_p11)
}
 0x17c   : > { %s2135_s3 = scalar_lea.hbm %s3840_s13, 128  ;;  %s2139_s27 = scalar_lea.hbm %s3890_s6, 256 }
 0x17d   : > { %p2136_p12 = scmp.ne.s32.totalorder %s3840_s13, %s2135_s3  ;;  %p2140_p1 = scmp.lt.u32.totalorder %s3840_s13, %s3890_s6 }
 0x17e   : > { %p2141_p5 = scmp.lt.u32.totalorder %s2139_s27, %s2135_s3  ;;  %p2143_p6 = scmp.lt.u32.totalorder %s2135_s3, %s3840_s13 }
 0x17f   : > { %p2137_p7 = pnand %p2136_p12, %p3922_p3 }
 0x180   : > { %p2142_p2 = por %p2141_p5, %p2140_p1 }
 0x181   : > { %p2138_p13 = pneg %p2137_p7 }
 0x182   : > { %p2144_p8 = por %p2143_p6, %p2142_p2 }
 0x184   : > { %p2145_p10 = pnand %p2144_p8, %p2138_p13 }
 0x186   : > { %2148 = shalt.err (!%p2145_p10)
}
 0x187   : > { %1943 = dma.vmem_to_hbm [thread:$0]  (%p3922_p3), %s3842_s16, 128, %s3840_s13, %s1482_s12  }
 0x188 PF: > { %s1507_s1 = sand.u32 1, %s2187_s23   ;;  %p3923_p9 = scmp.ne.s32.totalorder %s3905_s11, 0 }
 0x189   : > { %p3924_p4 = scmp.ge.s32.totalorder %s2199_s26, 2  ;;  %s1508_s21 = scalar_lea.sflag [#allocation5], %s1507_s1 }
 0x18b   : > { %p1963_p0 = pnand %p3924_p4, %p3923_p9 }
 0x18d   : > { %2182 = dma.done.wait (!%p1963_p0), %s1508_s21, 128  }
 0x18e   : > { %2184 = vsyncadd (!%p1963_p0), %s1508_s21, 4294967168  ;;  %p25_p11 = scmp.ge.s32.totalorder %s2273_s28, 4   ;;  %s3925_s23 = smov %s2191_s24 }
 0x18f   : > { %s3926_s24 = smov %s2195_s25  ;;  %s3927_s25 = smov %s2285_s7 }
 0x190   : > { %s3928_s26 = smov %s2273_s28  ;;  %27 = sbr.rel (!%p25_p11) target bundleno = 16 (0x10), region = 116 }
 0x197   :  { %1513 = vsyncpa [#allocation4], 1 }
 0x198   :  { %1515 = vsyncpa [#allocation4 + $0x1], 1 }
 0x199   :  { %1516 = vsyncpa [#allocation8], 1 }
 0x19a   :  { %1518 = vsyncpa [#allocation8 + $0x1], 1 }
 0x19b   :  { %1519 = vsyncpa [#allocation5], 1 }
 0x19c   :  { %1521 = vsyncpa [#allocation5 + $0x1], 1 }
 0x19d   :  { %1522 = vsyncpa [#allocation6], 1 }
 0x19e   :  { %1524 = vsyncpa [#allocation6 + $0x1], 1 }
 0x19f   :  { %1525 = vsyncpa [#allocation11], 1 }

</bundles_post_ra>
